<compile_context>
chip_gen: v7x
topology: tpu7x:2x2x1
jax: 0.10.0
libtpu: 0.0.40
codegen_flags: <defaults>
</compile_context>

<pallas_src>
import numpy as np
import jax
import jax.numpy as jnp
from jax import lax
from jax.experimental import pallas as pl
from jax.experimental.pallas import tpu as pltpu

POOL_KS = (2, 3, 5, 6)  # MaxPool2d kernel_size == stride for the 4 branches


def _bilinear_matrix(out_size, in_size):
    """Row-interpolation matrix matching F.interpolate(bilinear, align_corners=False)."""
    scale = in_size / out_size
    o = np.arange(out_size)
    src = (o + 0.5) * scale - 0.5
    src = np.maximum(src, 0.0)
    i0 = np.minimum(np.floor(src).astype(np.int64), in_size - 1)
    i1 = np.minimum(i0 + 1, in_size - 1)
    lam = (src - i0).astype(np.float32)
    A = np.zeros((out_size, in_size), np.float32)
    A[o, i0] += (1.0 - lam)
    A[o, i1] += lam
    return A


def _make_kernel(C, H, W):
    n_branch = len(POOL_KS)

    def kernel(x_ref, w_ref, b_ref, ah_ref, awt_ref, o_ref, conv_ref):
        x = x_ref[0]          # (C, H, W) f32
        w_vec = w_ref[0]      # (C,)      f32, lane-aligned

        # conv_ref: (4, WPMAX, HPMAX) scratch holding zero-padded per-branch conv
        # results (transposed: [wp, hp]) for the batched upsample matmuls.
        conv_ref[...] = jnp.zeros(conv_ref.shape, conv_ref.dtype)

        for i, k in enumerate(POOL_KS):
            hp, wp = H // k, W // k

            # ---- max pool k x k, stride k (floor mode, no padding) ----
            # H pooling: contiguous static row-slices + sublane-dim max.
            # Result xh: (hp, C, W)  (pooled rows become a leading dim).
            xh = jnp.concatenate(
                [jnp.max(x[:, r * k:(r + 1) * k, :], axis=1)[None]
                 for r in range(hp)],
                axis=0)
            # W pooling: contiguous static lane-slices + lane-dim max.
            # Result pooled: (wp, hp, C)  (C becomes the minor/lane dim).
            pooled = jnp.concatenate(
                [jnp.max(xh[:, :, q * k:(q + 1) * k], axis=2)[None]
                 for q in range(wp)],
                axis=0)

            # ---- shared 1x1 conv, C -> 1: vectorized contraction over C ----
            conv_t = jnp.sum(pooled * w_vec, axis=2)          # (wp, hp)
            conv_ref[i, :wp, :hp] = conv_t

        # ---- bilinear upsample of all 4 branches: two batched matmuls ----
        # ah_ref:  (4, H, HPMAX)   zero-padded row-interp matrices
        # awt_ref: (4, WPMAX, W)   zero-padded col-interp matrices (transposed)
        tmp = jnp.einsum('bhp,bqp->bhq', ah_ref[...], conv_ref[...],
                         precision=lax.Precision.HIGHEST,
                         preferred_element_type=jnp.float32)   # (4, H, WPMAX)
        up = jnp.einsum('bhq,bqw->bhw', tmp, awt_ref[...],
                        precision=lax.Precision.HIGHEST,
                        preferred_element_type=jnp.float32)    # (4, H, W)

        # Bias: interpolation rows sum to 1, so adding b after upsampling is exact.
        o_ref[0, :n_branch, :, :] = up + b_ref[0]
        # In-kernel concat of the passthrough channels (torch.cat([l1..l4, x], 1)).
        o_ref[0, n_branch:, :, :] = x

    return kernel


def _padded_vmem_bytes(shape, itemsize=4):
    s = (1,) * max(0, 2 - len(shape)) + tuple(int(d) for d in shape)
    lead = int(np.prod(s[:-2])) if len(s) > 2 else 1
    sub = -(-s[-2] // 8) * 8
    lane = -(-s[-1] // 128) * 128
    return lead * sub * lane * itemsize


def spp_block(x, conv_w, conv_b):
    """x: (N, C, H, W) f32; conv_w: (1, C, 1, 1); conv_b: (1,). Returns (N, 4+C, H, W)."""
    N, C, H, W = x.shape
    x = x.astype(jnp.float32)
    nb = len(POOL_KS)
    HPMAX, WPMAX = H // POOL_KS[0], W // POOL_KS[0]   # largest pooled grid (k=2)

    # Pack all 8 interpolation matrices into 2 zero-padded stacked constants.
    ah_np = np.zeros((nb, H, HPMAX), np.float32)
    awt_np = np.zeros((nb, WPMAX, W), np.float32)
    for i, k in enumerate(POOL_KS):
        hp, wp = H // k, W // k
        ah_np[i, :, :hp] = _bilinear_matrix(H, hp)
        awt_np[i, :wp, :] = _bilinear_matrix(W, wp).T
    ah_stack = jnp.asarray(ah_np)
    awt_stack = jnp.asarray(awt_np)

    w = conv_w.reshape(1, C).astype(jnp.float32)   # lane-aligned weights in VMEM
    b = conv_b.reshape(1).astype(jnp.float32)      # scalar bias in SMEM

    # Explicit VMEM budget derived from the actual block bytes (double-buffered
    # inputs/outputs + scratch + headroom for in-kernel temporaries), capped so a
    # tiling that fits v5e/v6e cannot silently exceed v7x's 64 MiB physical VMEM.
    io_bytes = (_padded_vmem_bytes((C, H, W))
                + _padded_vmem_bytes((4 + C, H, W))
                + _padded_vmem_bytes((1, C))
                + _padded_vmem_bytes((nb, H, HPMAX))
                + _padded_vmem_bytes((nb, WPMAX, W)))
    scratch_bytes = _padded_vmem_bytes((nb, WPMAX, HPMAX))
    vmem_limit = int(min(2 * io_bytes + scratch_bytes + (8 << 20), 64 << 20))

    out = pl.pallas_call(
        _make_kernel(C, H, W),
        out_shape=jax.ShapeDtypeStruct((N, 4 + C, H, W), jnp.float32),
        grid=(N,),
        in_specs=[
            pl.BlockSpec((1, C, H, W), lambda n: (n, 0, 0, 0)),       # x
            pl.BlockSpec((1, C), lambda n: (0, 0)),                   # conv weight
            pl.BlockSpec(memory_space=pltpu.MemorySpace.SMEM),        # conv bias
            pl.BlockSpec((nb, H, HPMAX), lambda n: (0, 0, 0)),        # row interp
            pl.BlockSpec((nb, WPMAX, W), lambda n: (0, 0, 0)),        # col interp^T
        ],
        out_specs=pl.BlockSpec((1, 4 + C, H, W), lambda n: (n, 0, 0, 0)),
        scratch_shapes=[pltpu.VMEM((nb, WPMAX, HPMAX), jnp.float32)],
        compiler_params=pltpu.CompilerParams(
            dimension_semantics=("parallel",),   # shard batch across v7x's 2 TCs
            vmem_limit_bytes=vmem_limit,
        ),
    )(x, w, b, ah_stack, awt_stack)
    return out


def spp_block_reference(x, conv_w, conv_b):
    """Pure-JAX reference (same align_corners=False bilinear convention)."""
    N, C, H, W = x.shape
    w = conv_w.reshape(C).astype(jnp.float32)
    outs = []
    for k in POOL_KS:
        hp, wp = H // k, W // k
        xc = x[:, :, :hp * k, :wp * k].reshape(N, C, hp, k, wp, k)
        pooled = xc.max(axis=(3, 5))                                   # (N, C, hp, wp)
        conv = jnp.einsum('ncpq,c->npq', pooled, w,
                          precision=lax.Precision.HIGHEST) + conv_b[0]
        ah = jnp.asarray(_bilinear_matrix(H, hp))
        aw = jnp.asarray(_bilinear_matrix(W, wp))
        up = jnp.einsum('hp,npq,wq->nhw', ah, conv, aw,
                        precision=lax.Precision.HIGHEST)               # (N, H, W)
        outs.append(up[:, None])
    return jnp.concatenate(outs + [x.astype(jnp.float32)], axis=1)


if __name__ == "__main__":
    key = jax.random.PRNGKey(0)
    k1, k2, k3 = jax.random.split(key, 3)

    N, C, H, W = 2, 4, 16, 16
    x = jax.random.normal(k1, (N, C, H, W), jnp.float32)
    # Conv2d(in_channels=C, out_channels=1, kernel_size=1): weight (1, C, 1, 1), bias (1,)
    conv_w = jax.random.normal(k2, (1, C, 1, 1), jnp.float32) * (1.0 / np.sqrt(C))
    conv_b = jax.random.normal(k3, (1,), jnp.float32) * 0.1

    out = spp_block(x, conv_w, conv_b)
    jax.block_until_ready(out)
    assert out.shape == (N, 4 + C, H, W), out.shape

    ref = spp_block_reference(x, conv_w, conv_b)
    err = float(jnp.max(jnp.abs(out - ref)))
    # Loose-ish tolerance to accommodate MXU f32 matmul precision modes.
    assert np.isfinite(err) and err < 6e-2, f"max abs err {err}"
    print("KERNEL_OK")
</pallas_src>

<mosaic_0001>
module attributes {stable_mosaic.version = 11 : i64} {
  func.func @kernel(%arg0: i32, %arg1: memref<1x4x16x16xf32, #tpu.memory_space<vmem>>, %arg2: memref<1x4xf32, #tpu.memory_space<vmem>>, %arg3: memref<1xf32, #tpu.memory_space<smem>>, %arg4: memref<4x16x8xf32, #tpu.memory_space<vmem>>, %arg5: memref<4x8x16xf32, #tpu.memory_space<vmem>>, %arg6: memref<1x8x16x16xf32, #tpu.memory_space<vmem>>, %arg7: memref<4x8x8xf32, #tpu.memory_space<vmem>>) attributes {dimension_semantics = [#tpu.dimension_semantics<parallel>], iteration_bounds = array<i64: 2>, scalar_prefetch = 0 : i64, scratch_operands = 1 : i64, tpu.core_type = #tpu.core_type<tc>, window_params = [{transform_indices = @transform_0, window_bounds = array<i64: 1, 4, 16, 16>}, {pipeline_mode = #tpu.pipeline_mode<synchronous>, transform_indices = @transform_1, window_bounds = array<i64: 1, 4>}, {transform_indices = @transform_2, window_bounds = array<i64: 1>}, {pipeline_mode = #tpu.pipeline_mode<synchronous>, transform_indices = @transform_3, window_bounds = array<i64: 4, 16, 8>}, {pipeline_mode = #tpu.pipeline_mode<synchronous>, transform_indices = @transform_4, window_bounds = array<i64: 4, 8, 16>}, {transform_indices = @transform_5, window_bounds = array<i64: 1, 8, 16, 16>}]} {
    %c0 = arith.constant 0 : index
    %c0_0 = arith.constant 0 : index
    %c0_1 = arith.constant 0 : index
    %c0_2 = arith.constant 0 : index
    %0 = vector.load %arg1[%c0, %c0_0, %c0_1, %c0_2] : memref<1x4x16x16xf32, #tpu.memory_space<vmem>>, vector<1x4x16x16xf32>
    %1 = vector.shape_cast %0 : vector<1x4x16x16xf32> to vector<4x16x16xf32>
    %c0_3 = arith.constant 0 : index
    %c0_4 = arith.constant 0 : index
    %2 = vector.load %arg2[%c0_3, %c0_4] : memref<1x4xf32, #tpu.memory_space<vmem>>, vector<1x4xf32>
    %3 = vector.shape_cast %2 : vector<1x4xf32> to vector<4xf32>
    %cst = arith.constant 0.000000e+00 : f32
    %4 = vector.broadcast %cst : f32 to vector<4x8x8xf32>
    %c0_5 = arith.constant 0 : index
    %c0_6 = arith.constant 0 : index
    %c0_7 = arith.constant 0 : index
    %5 = vector.load %arg7[%c0_5, %c0_6, %c0_7] : memref<4x8x8xf32, #tpu.memory_space<vmem>>, vector<4x8x8xf32>
    tpu.vector_store %arg7[%c0_5, %c0_6, %c0_7], %4 {strides = array<i32>} : memref<4x8x8xf32, #tpu.memory_space<vmem>>, vector<4x8x8xf32>,
    %6 = vector.extract_strided_slice %1 {offsets = [0, 0, 0], sizes = [4, 2, 16], strides = [1, 1, 1]} : vector<4x16x16xf32> to vector<4x2x16xf32>
    %cst_8 = arith.constant dense<0xFF800000> : vector<4x16xf32>
    %7 = vector.multi_reduction <maximumf>, %6, %cst_8 [1] : vector<4x2x16xf32> to vector<4x16xf32>
    %8 = vector.shape_cast %7 : vector<4x16xf32> to vector<1x4x16xf32>
    %9 = vector.extract_strided_slice %1 {offsets = [0, 2, 0], sizes = [4, 2, 16], strides = [1, 1, 1]} : vector<4x16x16xf32> to vector<4x2x16xf32>
    %cst_9 = arith.constant dense<0xFF800000> : vector<4x16xf32>
    %10 = vector.multi_reduction <maximumf>, %9, %cst_9 [1] : vector<4x2x16xf32> to vector<4x16xf32>
    %11 = vector.shape_cast %10 : vector<4x16xf32> to vector<1x4x16xf32>
    %12 = vector.extract_strided_slice %1 {offsets = [0, 4, 0], sizes = [4, 2, 16], strides = [1, 1, 1]} : vector<4x16x16xf32> to vector<4x2x16xf32>
    %cst_10 = arith.constant dense<0xFF800000> : vector<4x16xf32>
    %13 = vector.multi_reduction <maximumf>, %12, %cst_10 [1] : vector<4x2x16xf32> to vector<4x16xf32>
    %14 = vector.shape_cast %13 : vector<4x16xf32> to vector<1x4x16xf32>
    %15 = vector.extract_strided_slice %1 {offsets = [0, 6, 0], sizes = [4, 2, 16], strides = [1, 1, 1]} : vector<4x16x16xf32> to vector<4x2x16xf32>
    %cst_11 = arith.constant dense<0xFF800000> : vector<4x16xf32>
    %16 = vector.multi_reduction <maximumf>, %15, %cst_11 [1] : vector<4x2x16xf32> to vector<4x16xf32>
    %17 = vector.shape_cast %16 : vector<4x16xf32> to vector<1x4x16xf32>
    %18 = vector.extract_strided_slice %1 {offsets = [0, 8, 0], sizes = [4, 2, 16], strides = [1, 1, 1]} : vector<4x16x16xf32> to vector<4x2x16xf32>
    %cst_12 = arith.constant dense<0xFF800000> : vector<4x16xf32>
    %19 = vector.multi_reduction <maximumf>, %18, %cst_12 [1] : vector<4x2x16xf32> to vector<4x16xf32>
    %20 = vector.shape_cast %19 : vector<4x16xf32> to vector<1x4x16xf32>
    %21 = vector.extract_strided_slice %1 {offsets = [0, 10, 0], sizes = [4, 2, 16], strides = [1, 1, 1]} : vector<4x16x16xf32> to vector<4x2x16xf32>
    %cst_13 = arith.constant dense<0xFF800000> : vector<4x16xf32>
    %22 = vector.multi_reduction <maximumf>, %21, %cst_13 [1] : vector<4x2x16xf32> to vector<4x16xf32>
    %23 = vector.shape_cast %22 : vector<4x16xf32> to vector<1x4x16xf32>
    %24 = vector.extract_strided_slice %1 {offsets = [0, 12, 0], sizes = [4, 2, 16], strides = [1, 1, 1]} : vector<4x16x16xf32> to vector<4x2x16xf32>
    %cst_14 = arith.constant dense<0xFF800000> : vector<4x16xf32>
    %25 = vector.multi_reduction <maximumf>, %24, %cst_14 [1] : vector<4x2x16xf32> to vector<4x16xf32>
    %26 = vector.shape_cast %25 : vector<4x16xf32> to vector<1x4x16xf32>
    %27 = vector.extract_strided_slice %1 {offsets = [0, 14, 0], sizes = [4, 2, 16], strides = [1, 1, 1]} : vector<4x16x16xf32> to vector<4x2x16xf32>
    %cst_15 = arith.constant dense<0xFF800000> : vector<4x16xf32>
    %28 = vector.multi_reduction <maximumf>, %27, %cst_15 [1] : vector<4x2x16xf32> to vector<4x16xf32>
    %29 = vector.shape_cast %28 : vector<4x16xf32> to vector<1x4x16xf32>
    %30 = tpu.concatenate %8, %11, %14, %17, %20, %23, %26, %29 in 0 : vector<1x4x16xf32>, vector<1x4x16xf32>, vector<1x4x16xf32>, vector<1x4x16xf32>, vector<1x4x16xf32>, vector<1x4x16xf32>, vector<1x4x16xf32>, vector<1x4x16xf32> -> vector<8x4x16xf32>
    %31 = vector.extract_strided_slice %30 {offsets = [0, 0, 0], sizes = [8, 4, 2], strides = [1, 1, 1]} : vector<8x4x16xf32> to vector<8x4x2xf32>
    %cst_16 = arith.constant dense<0xFF800000> : vector<8x4xf32>
    %32 = vector.multi_reduction <maximumf>, %31, %cst_16 [2] : vector<8x4x2xf32> to vector<8x4xf32>
    %33 = vector.shape_cast %32 : vector<8x4xf32> to vector<1x8x4xf32>
    %34 = vector.extract_strided_slice %30 {offsets = [0, 0, 2], sizes = [8, 4, 2], strides = [1, 1, 1]} : vector<8x4x16xf32> to vector<8x4x2xf32>
    %cst_17 = arith.constant dense<0xFF800000> : vector<8x4xf32>
    %35 = vector.multi_reduction <maximumf>, %34, %cst_17 [2] : vector<8x4x2xf32> to vector<8x4xf32>
    %36 = vector.shape_cast %35 : vector<8x4xf32> to vector<1x8x4xf32>
    %37 = vector.extract_strided_slice %30 {offsets = [0, 0, 4], sizes = [8, 4, 2], strides = [1, 1, 1]} : vector<8x4x16xf32> to vector<8x4x2xf32>
    %cst_18 = arith.constant dense<0xFF800000> : vector<8x4xf32>
    %38 = vector.multi_reduction <maximumf>, %37, %cst_18 [2] : vector<8x4x2xf32> to vector<8x4xf32>
    %39 = vector.shape_cast %38 : vector<8x4xf32> to vector<1x8x4xf32>
    %40 = vector.extract_strided_slice %30 {offsets = [0, 0, 6], sizes = [8, 4, 2], strides = [1, 1, 1]} : vector<8x4x16xf32> to vector<8x4x2xf32>
    %cst_19 = arith.constant dense<0xFF800000> : vector<8x4xf32>
    %41 = vector.multi_reduction <maximumf>, %40, %cst_19 [2] : vector<8x4x2xf32> to vector<8x4xf32>
    %42 = vector.shape_cast %41 : vector<8x4xf32> to vector<1x8x4xf32>
    %43 = vector.extract_strided_slice %30 {offsets = [0, 0, 8], sizes = [8, 4, 2], strides = [1, 1, 1]} : vector<8x4x16xf32> to vector<8x4x2xf32>
    %cst_20 = arith.constant dense<0xFF800000> : vector<8x4xf32>
    %44 = vector.multi_reduction <maximumf>, %43, %cst_20 [2] : vector<8x4x2xf32> to vector<8x4xf32>
    %45 = vector.shape_cast %44 : vector<8x4xf32> to vector<1x8x4xf32>
    %46 = vector.extract_strided_slice %30 {offsets = [0, 0, 10], sizes = [8, 4, 2], strides = [1, 1, 1]} : vector<8x4x16xf32> to vector<8x4x2xf32>
    %cst_21 = arith.constant dense<0xFF800000> : vector<8x4xf32>
    %47 = vector.multi_reduction <maximumf>, %46, %cst_21 [2] : vector<8x4x2xf32> to vector<8x4xf32>
    %48 = vector.shape_cast %47 : vector<8x4xf32> to vector<1x8x4xf32>
    %49 = vector.extract_strided_slice %30 {offsets = [0, 0, 12], sizes = [8, 4, 2], strides = [1, 1, 1]} : vector<8x4x16xf32> to vector<8x4x2xf32>
    %cst_22 = arith.constant dense<0xFF800000> : vector<8x4xf32>
    %50 = vector.multi_reduction <maximumf>, %49, %cst_22 [2] : vector<8x4x2xf32> to vector<8x4xf32>
    %51 = vector.shape_cast %50 : vector<8x4xf32> to vector<1x8x4xf32>
    %52 = vector.extract_strided_slice %30 {offsets = [0, 0, 14], sizes = [8, 4, 2], strides = [1, 1, 1]} : vector<8x4x16xf32> to vector<8x4x2xf32>
    %cst_23 = arith.constant dense<0xFF800000> : vector<8x4xf32>
    %53 = vector.multi_reduction <maximumf>, %52, %cst_23 [2] : vector<8x4x2xf32> to vector<8x4xf32>
    %54 = vector.shape_cast %53 : vector<8x4xf32> to vector<1x8x4xf32>
    %55 = tpu.concatenate %33, %36, %39, %42, %45, %48, %51, %54 in 0 : vector<1x8x4xf32>, vector<1x8x4xf32>, vector<1x8x4xf32>, vector<1x8x4xf32>, vector<1x8x4xf32>, vector<1x8x4xf32>, vector<1x8x4xf32>, vector<1x8x4xf32> -> vector<8x8x4xf32>
    %56 = vector.shape_cast %3 : vector<4xf32> to vector<1x1x4xf32>
    %57 = vector.broadcast %56 : vector<1x1x4xf32> to vector<8x8x4xf32>
    %58 = arith.mulf %55, %57 : vector<8x8x4xf32>
    %cst_24 = arith.constant dense<0.000000e+00> : vector<8x8xf32>
    %59 = vector.multi_reduction <add>, %58, %cst_24 [2] : vector<8x8x4xf32> to vector<8x8xf32>
    %c0_25 = arith.constant 0 : index
    %c0_26 = arith.constant 0 : index
    %c0_27 = arith.constant 0 : index
    %60 = vector.load %arg7[%c0_25, %c0_26, %c0_27] : memref<4x8x8xf32, #tpu.memory_space<vmem>>, vector<1x8x8xf32>
    %61 = vector.shape_cast %60 : vector<1x8x8xf32> to vector<8x8xf32>
    %62 = vector.shape_cast %59 : vector<8x8xf32> to vector<1x8x8xf32>
    tpu.vector_store %arg7[%c0_25, %c0_26, %c0_27], %62 {strides = array<i32>} : memref<4x8x8xf32, #tpu.memory_space<vmem>>, vector<1x8x8xf32>,
    %63 = vector.extract_strided_slice %1 {offsets = [0, 0, 0], sizes = [4, 3, 16], strides = [1, 1, 1]} : vector<4x16x16xf32> to vector<4x3x16xf32>
    %cst_28 = arith.constant dense<0xFF800000> : vector<4x16xf32>
    %64 = vector.multi_reduction <maximumf>, %63, %cst_28 [1] : vector<4x3x16xf32> to vector<4x16xf32>
    %65 = vector.shape_cast %64 : vector<4x16xf32> to vector<1x4x16xf32>
    %66 = vector.extract_strided_slice %1 {offsets = [0, 3, 0], sizes = [4, 3, 16], strides = [1, 1, 1]} : vector<4x16x16xf32> to vector<4x3x16xf32>
    %cst_29 = arith.constant dense<0xFF800000> : vector<4x16xf32>
    %67 = vector.multi_reduction <maximumf>, %66, %cst_29 [1] : vector<4x3x16xf32> to vector<4x16xf32>
    %68 = vector.shape_cast %67 : vector<4x16xf32> to vector<1x4x16xf32>
    %69 = vector.extract_strided_slice %1 {offsets = [0, 6, 0], sizes = [4, 3, 16], strides = [1, 1, 1]} : vector<4x16x16xf32> to vector<4x3x16xf32>
    %cst_30 = arith.constant dense<0xFF800000> : vector<4x16xf32>
    %70 = vector.multi_reduction <maximumf>, %69, %cst_30 [1] : vector<4x3x16xf32> to vector<4x16xf32>
    %71 = vector.shape_cast %70 : vector<4x16xf32> to vector<1x4x16xf32>
    %72 = vector.extract_strided_slice %1 {offsets = [0, 9, 0], sizes = [4, 3, 16], strides = [1, 1, 1]} : vector<4x16x16xf32> to vector<4x3x16xf32>
    %cst_31 = arith.constant dense<0xFF800000> : vector<4x16xf32>
    %73 = vector.multi_reduction <maximumf>, %72, %cst_31 [1] : vector<4x3x16xf32> to vector<4x16xf32>
    %74 = vector.shape_cast %73 : vector<4x16xf32> to vector<1x4x16xf32>
    %75 = vector.extract_strided_slice %1 {offsets = [0, 12, 0], sizes = [4, 3, 16], strides = [1, 1, 1]} : vector<4x16x16xf32> to vector<4x3x16xf32>
    %cst_32 = arith.constant dense<0xFF800000> : vector<4x16xf32>
    %76 = vector.multi_reduction <maximumf>, %75, %cst_32 [1] : vector<4x3x16xf32> to vector<4x16xf32>
    %77 = vector.shape_cast %76 : vector<4x16xf32> to vector<1x4x16xf32>
    %78 = tpu.concatenate %65, %68, %71, %74, %77 in 0 : vector<1x4x16xf32>, vector<1x4x16xf32>, vector<1x4x16xf32>, vector<1x4x16xf32>, vector<1x4x16xf32> -> vector<5x4x16xf32>
    %79 = vector.extract_strided_slice %78 {offsets = [0, 0, 0], sizes = [5, 4, 3], strides = [1, 1, 1]} : vector<5x4x16xf32> to vector<5x4x3xf32>
    %cst_33 = arith.constant dense<0xFF800000> : vector<5x4xf32>
    %80 = vector.multi_reduction <maximumf>, %79, %cst_33 [2] : vector<5x4x3xf32> to vector<5x4xf32>
    %81 = vector.shape_cast %80 : vector<5x4xf32> to vector<1x5x4xf32>
    %82 = vector.extract_strided_slice %78 {offsets = [0, 0, 3], sizes = [5, 4, 3], strides = [1, 1, 1]} : vector<5x4x16xf32> to vector<5x4x3xf32>
    %cst_34 = arith.constant dense<0xFF800000> : vector<5x4xf32>
    %83 = vector.multi_reduction <maximumf>, %82, %cst_34 [2] : vector<5x4x3xf32> to vector<5x4xf32>
    %84 = vector.shape_cast %83 : vector<5x4xf32> to vector<1x5x4xf32>
    %85 = vector.extract_strided_slice %78 {offsets = [0, 0, 6], sizes = [5, 4, 3], strides = [1, 1, 1]} : vector<5x4x16xf32> to vector<5x4x3xf32>
    %cst_35 = arith.constant dense<0xFF800000> : vector<5x4xf32>
    %86 = vector.multi_reduction <maximumf>, %85, %cst_35 [2] : vector<5x4x3xf32> to vector<5x4xf32>
    %87 = vector.shape_cast %86 : vector<5x4xf32> to vector<1x5x4xf32>
    %88 = vector.extract_strided_slice %78 {offsets = [0, 0, 9], sizes = [5, 4, 3], strides = [1, 1, 1]} : vector<5x4x16xf32> to vector<5x4x3xf32>
    %cst_36 = arith.constant dense<0xFF800000> : vector<5x4xf32>
    %89 = vector.multi_reduction <maximumf>, %88, %cst_36 [2] : vector<5x4x3xf32> to vector<5x4xf32>
    %90 = vector.shape_cast %89 : vector<5x4xf32> to vector<1x5x4xf32>
    %91 = vector.extract_strided_slice %78 {offsets = [0, 0, 12], sizes = [5, 4, 3], strides = [1, 1, 1]} : vector<5x4x16xf32> to vector<5x4x3xf32>
    %cst_37 = arith.constant dense<0xFF800000> : vector<5x4xf32>
    %92 = vector.multi_reduction <maximumf>, %91, %cst_37 [2] : vector<5x4x3xf32> to vector<5x4xf32>
    %93 = vector.shape_cast %92 : vector<5x4xf32> to vector<1x5x4xf32>
    %94 = tpu.concatenate %81, %84, %87, %90, %93 in 0 : vector<1x5x4xf32>, vector<1x5x4xf32>, vector<1x5x4xf32>, vector<1x5x4xf32>, vector<1x5x4xf32> -> vector<5x5x4xf32>
    %95 = vector.shape_cast %3 : vector<4xf32> to vector<1x1x4xf32>
    %96 = vector.broadcast %95 : vector<1x1x4xf32> to vector<5x5x4xf32>
    %97 = arith.mulf %94, %96 : vector<5x5x4xf32>
    %cst_38 = arith.constant dense<0.000000e+00> : vector<5x5xf32>
    %98 = vector.multi_reduction <add>, %97, %cst_38 [2] : vector<5x5x4xf32> to vector<5x5xf32>
    %c1 = arith.constant 1 : index
    %c0_39 = arith.constant 0 : index
    %c0_40 = arith.constant 0 : index
    %99 = vector.load %arg7[%c1, %c0_39, %c0_40] : memref<4x8x8xf32, #tpu.memory_space<vmem>>, vector<1x5x5xf32>
    %100 = vector.shape_cast %99 : vector<1x5x5xf32> to vector<5x5xf32>
    %101 = vector.shape_cast %98 : vector<5x5xf32> to vector<1x5x5xf32>
    tpu.vector_store %arg7[%c1, %c0_39, %c0_40], %101 {strides = array<i32>} : memref<4x8x8xf32, #tpu.memory_space<vmem>>, vector<1x5x5xf32>,
    %102 = vector.extract_strided_slice %1 {offsets = [0, 0, 0], sizes = [4, 5, 16], strides = [1, 1, 1]} : vector<4x16x16xf32> to vector<4x5x16xf32>
    %cst_41 = arith.constant dense<0xFF800000> : vector<4x16xf32>
    %103 = vector.multi_reduction <maximumf>, %102, %cst_41 [1] : vector<4x5x16xf32> to vector<4x16xf32>
    %104 = vector.shape_cast %103 : vector<4x16xf32> to vector<1x4x16xf32>
    %105 = vector.extract_strided_slice %1 {offsets = [0, 5, 0], sizes = [4, 5, 16], strides = [1, 1, 1]} : vector<4x16x16xf32> to vector<4x5x16xf32>
    %cst_42 = arith.constant dense<0xFF800000> : vector<4x16xf32>
    %106 = vector.multi_reduction <maximumf>, %105, %cst_42 [1] : vector<4x5x16xf32> to vector<4x16xf32>
    %107 = vector.shape_cast %106 : vector<4x16xf32> to vector<1x4x16xf32>
    %108 = vector.extract_strided_slice %1 {offsets = [0, 10, 0], sizes = [4, 5, 16], strides = [1, 1, 1]} : vector<4x16x16xf32> to vector<4x5x16xf32>
    %cst_43 = arith.constant dense<0xFF800000> : vector<4x16xf32>
    %109 = vector.multi_reduction <maximumf>, %108, %cst_43 [1] : vector<4x5x16xf32> to vector<4x16xf32>
    %110 = vector.shape_cast %109 : vector<4x16xf32> to vector<1x4x16xf32>
    %111 = tpu.concatenate %104, %107, %110 in 0 : vector<1x4x16xf32>, vector<1x4x16xf32>, vector<1x4x16xf32> -> vector<3x4x16xf32>
    %112 = vector.extract_strided_slice %111 {offsets = [0, 0, 0], sizes = [3, 4, 5], strides = [1, 1, 1]} : vector<3x4x16xf32> to vector<3x4x5xf32>
    %cst_44 = arith.constant dense<0xFF800000> : vector<3x4xf32>
    %113 = vector.multi_reduction <maximumf>, %112, %cst_44 [2] : vector<3x4x5xf32> to vector<3x4xf32>
    %114 = vector.shape_cast %113 : vector<3x4xf32> to vector<1x3x4xf32>
    %115 = vector.extract_strided_slice %111 {offsets = [0, 0, 5], sizes = [3, 4, 5], strides = [1, 1, 1]} : vector<3x4x16xf32> to vector<3x4x5xf32>
    %cst_45 = arith.constant dense<0xFF800000> : vector<3x4xf32>
    %116 = vector.multi_reduction <maximumf>, %115, %cst_45 [2] : vector<3x4x5xf32> to vector<3x4xf32>
    %117 = vector.shape_cast %116 : vector<3x4xf32> to vector<1x3x4xf32>
    %118 = vector.extract_strided_slice %111 {offsets = [0, 0, 10], sizes = [3, 4, 5], strides = [1, 1, 1]} : vector<3x4x16xf32> to vector<3x4x5xf32>
    %cst_46 = arith.constant dense<0xFF800000> : vector<3x4xf32>
    %119 = vector.multi_reduction <maximumf>, %118, %cst_46 [2] : vector<3x4x5xf32> to vector<3x4xf32>
    %120 = vector.shape_cast %119 : vector<3x4xf32> to vector<1x3x4xf32>
    %121 = tpu.concatenate %114, %117, %120 in 0 : vector<1x3x4xf32>, vector<1x3x4xf32>, vector<1x3x4xf32> -> vector<3x3x4xf32>
    %122 = vector.shape_cast %3 : vector<4xf32> to vector<1x1x4xf32>
    %123 = vector.broadcast %122 : vector<1x1x4xf32> to vector<3x3x4xf32>
    %124 = arith.mulf %121, %123 : vector<3x3x4xf32>
    %cst_47 = arith.constant dense<0.000000e+00> : vector<3x3xf32>
    %125 = vector.multi_reduction <add>, %124, %cst_47 [2] : vector<3x3x4xf32> to vector<3x3xf32>
    %c2 = arith.constant 2 : index
    %c0_48 = arith.constant 0 : index
    %c0_49 = arith.constant 0 : index
    %126 = vector.load %arg7[%c2, %c0_48, %c0_49] : memref<4x8x8xf32, #tpu.memory_space<vmem>>, vector<1x3x3xf32>
    %127 = vector.shape_cast %126 : vector<1x3x3xf32> to vector<3x3xf32>
    %128 = vector.shape_cast %125 : vector<3x3xf32> to vector<1x3x3xf32>
    tpu.vector_store %arg7[%c2, %c0_48, %c0_49], %128 {strides = array<i32>} : memref<4x8x8xf32, #tpu.memory_space<vmem>>, vector<1x3x3xf32>,
    %129 = vector.extract_strided_slice %1 {offsets = [0, 0, 0], sizes = [4, 6, 16], strides = [1, 1, 1]} : vector<4x16x16xf32> to vector<4x6x16xf32>
    %cst_50 = arith.constant dense<0xFF800000> : vector<4x16xf32>
    %130 = vector.multi_reduction <maximumf>, %129, %cst_50 [1] : vector<4x6x16xf32> to vector<4x16xf32>
    %131 = vector.shape_cast %130 : vector<4x16xf32> to vector<1x4x16xf32>
    %132 = vector.extract_strided_slice %1 {offsets = [0, 6, 0], sizes = [4, 6, 16], strides = [1, 1, 1]} : vector<4x16x16xf32> to vector<4x6x16xf32>
    %cst_51 = arith.constant dense<0xFF800000> : vector<4x16xf32>
    %133 = vector.multi_reduction <maximumf>, %132, %cst_51 [1] : vector<4x6x16xf32> to vector<4x16xf32>
    %134 = vector.shape_cast %133 : vector<4x16xf32> to vector<1x4x16xf32>
    %135 = tpu.concatenate %131, %134 in 0 : vector<1x4x16xf32>, vector<1x4x16xf32> -> vector<2x4x16xf32>
    %136 = vector.extract_strided_slice %135 {offsets = [0, 0, 0], sizes = [2, 4, 6], strides = [1, 1, 1]} : vector<2x4x16xf32> to vector<2x4x6xf32>
    %cst_52 = arith.constant dense<0xFF800000> : vector<2x4xf32>
    %137 = vector.multi_reduction <maximumf>, %136, %cst_52 [2] : vector<2x4x6xf32> to vector<2x4xf32>
    %138 = vector.shape_cast %137 : vector<2x4xf32> to vector<1x2x4xf32>
    %139 = vector.extract_strided_slice %135 {offsets = [0, 0, 6], sizes = [2, 4, 6], strides = [1, 1, 1]} : vector<2x4x16xf32> to vector<2x4x6xf32>
    %cst_53 = arith.constant dense<0xFF800000> : vector<2x4xf32>
    %140 = vector.multi_reduction <maximumf>, %139, %cst_53 [2] : vector<2x4x6xf32> to vector<2x4xf32>
    %141 = vector.shape_cast %140 : vector<2x4xf32> to vector<1x2x4xf32>
    %142 = tpu.concatenate %138, %141 in 0 : vector<1x2x4xf32>, vector<1x2x4xf32> -> vector<2x2x4xf32>
    %143 = vector.shape_cast %3 : vector<4xf32> to vector<1x1x4xf32>
    %144 = vector.broadcast %143 : vector<1x1x4xf32> to vector<2x2x4xf32>
    %145 = arith.mulf %142, %144 : vector<2x2x4xf32>
    %cst_54 = arith.constant dense<0.000000e+00> : vector<2x2xf32>
    %146 = vector.multi_reduction <add>, %145, %cst_54 [2] : vector<2x2x4xf32> to vector<2x2xf32>
    %c3 = arith.constant 3 : index
    %c0_55 = arith.constant 0 : index
    %c0_56 = arith.constant 0 : index
    %147 = vector.load %arg7[%c3, %c0_55, %c0_56] : memref<4x8x8xf32, #tpu.memory_space<vmem>>, vector<1x2x2xf32>
    %148 = vector.shape_cast %147 : vector<1x2x2xf32> to vector<2x2xf32>
    %149 = vector.shape_cast %146 : vector<2x2xf32> to vector<1x2x2xf32>
    tpu.vector_store %arg7[%c3, %c0_55, %c0_56], %149 {strides = array<i32>} : memref<4x8x8xf32, #tpu.memory_space<vmem>>, vector<1x2x2xf32>,
    %c0_57 = arith.constant 0 : index
    %c0_58 = arith.constant 0 : index
    %c0_59 = arith.constant 0 : index
    %150 = vector.load %arg4[%c0_57, %c0_58, %c0_59] : memref<4x16x8xf32, #tpu.memory_space<vmem>>, vector<4x16x8xf32>
    %c0_60 = arith.constant 0 : index
    %c0_61 = arith.constant 0 : index
    %c0_62 = arith.constant 0 : index
    %151 = vector.load %arg7[%c0_60, %c0_61, %c0_62] : memref<4x8x8xf32, #tpu.memory_space<vmem>>, vector<4x8x8xf32>
    "tpu.trace_start"() <{level = 10 : i32, message = "bhp,bqp->bhq"}> : () -> ()
    %cst_63 = arith.constant dense<0.000000e+00> : vector<4x16x8xf32>
    %152 = tpu.matmul %150, %151, %cst_63 {dimension_numbers = #tpu.dot_dimension_numbers<[2], [2], [1], [1], [0, 0, 0, 1, 1, 1], [0], [0]>, precision = #tpu.contract_precision<fp32>} : vector<4x16x8xf32>, vector<4x8x8xf32>, vector<4x16x8xf32> -> vector<4x16x8xf32>
    "tpu.trace_stop"() : () -> ()
    %c0_64 = arith.constant 0 : index
    %c0_65 = arith.constant 0 : index
    %c0_66 = arith.constant 0 : index
    %153 = vector.load %arg5[%c0_64, %c0_65, %c0_66] : memref<4x8x16xf32, #tpu.memory_space<vmem>>, vector<4x8x16xf32>
    "tpu.trace_start"() <{level = 10 : i32, message = "bhq,bqw->bhw"}> : () -> ()
    %cst_67 = arith.constant dense<0.000000e+00> : vector<4x16x16xf32>
    %154 = tpu.matmul %152, %153, %cst_67 {dimension_numbers = #tpu.dot_dimension_numbers<[2], [1], [1], [2], [0, 0, 0, 1, 1, 2], [0], [0]>, precision = #tpu.contract_precision<fp32>} : vector<4x16x8xf32>, vector<4x8x16xf32>, vector<4x16x16xf32> -> vector<4x16x16xf32>
    "tpu.trace_stop"() : () -> ()
    %c0_68 = arith.constant 0 : index
    %155 = memref.load %arg3[%c0_68] : memref<1xf32, #tpu.memory_space<smem>>
    %156 = vector.broadcast %155 : f32 to vector<4x16x16xf32>
    %157 = arith.addf %154, %156 : vector<4x16x16xf32>
    %c0_69 = arith.constant 0 : index
    %c0_70 = arith.constant 0 : index
    %c0_71 = arith.constant 0 : index
    %c0_72 = arith.constant 0 : index
    %158 = vector.load %arg6[%c0_69, %c0_70, %c0_71, %c0_72] : memref<1x8x16x16xf32, #tpu.memory_space<vmem>>, vector<1x4x16x16xf32>
    %159 = vector.shape_cast %158 : vector<1x4x16x16xf32> to vector<4x16x16xf32>
    %160 = vector.shape_cast %157 : vector<4x16x16xf32> to vector<1x4x16x16xf32>
    tpu.vector_store %arg6[%c0_69, %c0_70, %c0_71, %c0_72], %160 {strides = array<i32>} : memref<1x8x16x16xf32, #tpu.memory_space<vmem>>, vector<1x4x16x16xf32>,
    %c0_73 = arith.constant 0 : index
    %c4 = arith.constant 4 : index
    %c0_74 = arith.constant 0 : index
    %c0_75 = arith.constant 0 : index
    %161 = vector.load %arg6[%c0_73, %c4, %c0_74, %c0_75] : memref<1x8x16x16xf32, #tpu.memory_space<vmem>>, vector<1x4x16x16xf32>
    %162 = vector.shape_cast %161 : vector<1x4x16x16xf32> to vector<4x16x16xf32>
    %163 = vector.shape_cast %1 : vector<4x16x16xf32> to vector<1x4x16x16xf32>
    tpu.vector_store %arg6[%c0_73, %c4, %c0_74, %c0_75], %163 {strides = array<i32>} : memref<1x8x16x16xf32, #tpu.memory_space<vmem>>, vector<1x4x16x16xf32>,
    return
  }
  func.func @transform_0(%arg0: i32) -> (i32, i32, i32, i32) {
    %c0_i32 = arith.constant 0 : i32
    %c0_i32_0 = arith.constant 0 : i32
    %c0_i32_1 = arith.constant 0 : i32
    %c0_i32_2 = arith.constant 0 : i32
    return %arg0, %c0_i32, %c0_i32_0, %c0_i32_1 : i32, i32, i32, i32
  }
  func.func @transform_1(%arg0: i32) -> (i32, i32) {
    %c0_i32 = arith.constant 0 : i32
    %c0_i32_0 = arith.constant 0 : i32
    %c0_i32_1 = arith.constant 0 : i32
    return %c0_i32, %c0_i32_0 : i32, i32
  }
  func.func @transform_2(%arg0: i32) -> i32 {
    %c0_i32 = arith.constant 0 : i32
    %c0_i32_0 = arith.constant 0 : i32
    return %c0_i32 : i32
  }
  func.func @transform_3(%arg0: i32) -> (i32, i32, i32) {
    %c0_i32 = arith.constant 0 : i32
    %c0_i32_0 = arith.constant 0 : i32
    %c0_i32_1 = arith.constant 0 : i32
    %c0_i32_2 = arith.constant 0 : i32
    return %c0_i32, %c0_i32_0, %c0_i32_1 : i32, i32, i32
  }
  func.func @transform_4(%arg0: i32) -> (i32, i32, i32) {
    %c0_i32 = arith.constant 0 : i32
    %c0_i32_0 = arith.constant 0 : i32
    %c0_i32_1 = arith.constant 0 : i32
    %c0_i32_2 = arith.constant 0 : i32
    return %c0_i32, %c0_i32_0, %c0_i32_1 : i32, i32, i32
  }
  func.func @transform_5(%arg0: i32) -> (i32, i32, i32, i32) {
    %c0_i32 = arith.constant 0 : i32
    %c0_i32_0 = arith.constant 0 : i32
    %c0_i32_1 = arith.constant 0 : i32
    %c0_i32_2 = arith.constant 0 : i32
    return %arg0, %c0_i32, %c0_i32_0, %c0_i32_1 : i32, i32, i32, i32
  }
}

</mosaic_0001>

<bundles_post_ra>
// kernel: tpu_custom_call.1
= control target key start
LH: loop header
LB: loop body
LE: loop exit
PB: predicated region body
PF: predicated region fallthrough
CT: control target
= control target key end

     0   :  { %s9176_s0 = inlined_call_operand.hbm [shape: f32[2,4,16,16], index: 0, kind: input, shape index: {}]   ;;  %s9177_s1 = inlined_call_operand.vmem [shape: f32[1,4], index: 1, kind: input, shape index: {}]   ;;  %s9178_s2 = inlined_call_operand.<no memory space> [shape: f32[1], index: 2, kind: input, shape index: {}]   ;;  %s9179_s3 = inlined_call_operand.vmem [shape: f32[4,16,8], index: 3, kind: input, shape index: {}]   ;;  %s9180_s4 = inlined_call_operand.vmem [shape: f32[4,8,16], index: 4, kind: input, shape index: {}]   ;;  %s9181_s5 = inlined_call_operand.hbm [shape: f32[2,8,16,16], index: 5, kind: output, shape index: {}]  }
   0x1   :  { %10 = sst [smem:[#allocation3]] %s9178_s2 }
   0x2   :  { %11 = vsyncpa [#allocation5], 0 }
   0x3   :  { %13 = vsyncpa [#allocation5 + $0x1], 0 }
   0x4   :  { %14 = vsyncpa [#allocation6], 0 }
   0x5   :  { %16 = vsyncpa [#allocation6 + $0x1], 0  ;;  %s7317_s20 = smov 0   ;;  %s7319_s21 = smov 0  }
   0x6   :  { %s7321_s22 = smov 0   ;;  %s7323_s23 = smov 0  }
   0x7 LB: > { %s7338_s2 = sadd.s32 4294967295, %s7274_s23   ;;  %s6619_s24 = sadd.s32 4294967294, %s7274_s23   ;;  %s7274_s23 = sphi %s7323_s23, %s9264_s23   ;;  %s7270_s22 = sphi %s7321_s22, %s9263_s22   ;;  %s7266_s21 = sphi %s7319_s21, %s9262_s21   ;;  %s7262_s20 = sphi %s7317_s20, %s9261_s20  }
   0x8   : > { %s7342_s25 = sadd.s32 1, %s7274_s23   ;;  %s29_s26 = sadd.s32 1, %s7270_s22 }
   0x9   : > { %s26_s27 = ssub.s32 %s7274_s23, %s7342_s25  ;;  %p36_p0 = scmp.ne.s32.totalorder %s7270_s22, %s7266_s21 }
   0xa   : > { %p27_p1 = scmp.eq.s32.totalorder %s26_s27, 0  ;;  %p37_p2 = scmp.eq.s32.totalorder %s7274_s23, 0 }
   0xb   : > { %p42_p3 = scmp.ne.s32.totalorder %s7266_s21, %s7262_s20  ;;  %p43_p4 = scmp.eq.s32.totalorder %s7338_s2, 0 }
   0xc   : > { %s7354_s28 = scalar_select %p27_p1, %s7270_s22, %s29_s26  }
   0xd   : > { %p7356_p5 = por %p37_p2, %p36_p0  ;;  %p7360_p6 = por %p43_p4, %p42_p3 }
   0xe   : > { %p150_p7 = scmp.eq.s32.totalorder %s7338_s2, 1  ;;  %p156_p8 = scmp.eq.s32.totalorder %s6619_s24, 1 }
   0xf   : > { %p7128_p10 = scmp.lt.s32.totalorder %s7274_s23, 2  ;;  %s188_s8 = sand.u32 1, %s7270_s22  }
  0x10   : > { %p7367_p11 = por %p150_p7, %p36_p0  ;;  %p7371_p12 = por %p156_p8, %p42_p3 }
  0x11   : > { %s6642_s9 = sshll.u32 %s7274_s23, 10  ;;  %s6622_s10 = sshll.u32 %s188_s8, 6 }
  0x12   : > { %s9193_s6 = scalar_select %p7367_p11, 1, 0 }
  0x13   : > { %s9194_s7 = scalar_select %p7371_p12, 1, 0 }
  0x14   : > { %s7380_s13 = scalar_lea.hbm %s9176_s0, %s6642_s9  ;;  %s192_s14 = scalar_lea.vmem [#allocation4], %s6622_s10 }
  0x15   : > { %s199_s15 = sshll.u32 %s192_s14, 4  ;;  %p7384_p13 = pnand %p7128_p10, %p7356_p5  ;;  %s7388_s15 = int_to_ptr.vmem [resolvable:$true] %s199_s15 }
  0x16   : > { %s7390_s17 = scalar_lea.sflag [#allocation5], %s188_s8  ;;  %s7178_s18 = scalar_lea.hbm %s7380_s13, 1024 }
  0x17   : > { %p7179_p0 = scmp.ne.s32.totalorder %s7380_s13, %s7178_s18  ;;  %p7180_p1 = pneg %p7384_p13 }
  0x18   : > { %s7183_s26 = scalar_lea.hbm %s9176_s0, 2048  ;;  %p7184_p4 = scmp.lt.u32.totalorder %s7380_s13, %s9176_s0 }
  0x19   : > { %p7181_p2 = pnand %p7180_p1, %p7179_p0  ;;  %p7185_p5 = scmp.lt.u32.totalorder %s7183_s26, %s7178_s18 }
  0x1a   : > { %p7187_p8 = scmp.lt.u32.totalorder %s7178_s18, %s7380_s13 }
  0x1b   : > { %p7182_p3 = pneg %p7181_p2  ;;  %p7186_p7 = por %p7185_p5, %p7184_p4 }
  0x1d   : > { %p7188_p10 = por %p7187_p8, %p7186_p7 }
  0x1f   : > { %p7189_p9 = pnand %p7188_p10, %p7182_p3 }
  0x21   : > { %7192 = shalt.err (!%p7189_p9)
}
  0x22   : > { %s7193_s8 = scalar_lea.vmem %s7388_s15, 1024  ;;  %s7276_s9 = smov [#allocation4]  }
  0x23   : > { %p7194_p0 = scmp.ne.s32.totalorder %s7388_s15, %s7193_s8  ;;  %s7198_s10 = sshll.u32 %s7276_s9, 4  ;;  %s7199_s10 = int_to_ptr.vmem [resolvable:$false] %s7198_s10 }
  0x24   : > { %s7200_s11 = scalar_lea.vmem %s7199_s10, 2048  ;;  %p7201_p11 = scmp.lt.s32.totalorder %s7388_s15, %s7199_s10 }
  0x25   : > { %p7196_p2 = pnand %p7194_p0, %p7180_p1  ;;  %p7202_p4 = scmp.lt.s32.totalorder %s7200_s11, %s7193_s8 }
  0x27   : > { %p7197_p12 = pneg %p7196_p2  ;;  %p7203_p5 = por %p7202_p4, %p7201_p11 }
  0x29   : > { %p7204_p7 = pnand %p7203_p5, %p7197_p12 }
  0x2b   : > { %7207 = shalt.err (!%p7204_p7)
}
  0x2c   : > { %s7277_s12 = smov 128   ;;  %s7278_s14 = smov 8  }
  0x2d   : > { %7123 = dma.hbm_to_vmem [thread:$0]  (!%p7384_p13), %s7380_s13, 1024, %s7388_s15, %s7390_s17, %s7277_s12, %s7277_s12, %s7278_s14  }
  0x2e   : > { %p6625_p9 = scmp.ge.s32.totalorder %s7274_s23, 1  ;;  %p207_p1 = scmp.lt.s32.totalorder %s7274_s23, 3 }
  0x30   : > { %p208_p3 = pnand %p6625_p9, %p207_p1 }
  0x32   : > { %211 = sbr.rel (%p208_p3) target bundleno = 1474 (0x5c2), region = 40 }
  0x39   : > { %s7421_s18 = sand.u32 1, %s7266_s21  }
  0x3a   : > { %s6626_s19 = sshll.u32 %s7421_s18, 6  ;;  %s214_s24 = scalar_lea.sflag [#allocation5], %s7421_s18 }
  0x3b   : > { %s7425_s26 = scalar_lea.vmem [#allocation4], %s6626_s19 }
  0x3c   : > { %7253 = dma.done.wait (%p7360_p6), %s214_s24, 1024  }
  0x3d   : > { %7255 = vsyncadd (%p7360_p6), %s214_s24, 4294966272  ;;  %vm258_vm0 = vcmask 123904   ;;  %v7432_v0 = vld [vmem:[%s7425_s26] sm:$0xff]  ;;  %v7435_v1 = vld [vmem:[%s7425_s26 + $0x10] sm:$0xff]  ;;  %vm287_vm1 = vcmask 125954   ;;  %vm519_vm2 = vcmask 1041409  }
  0x3e   : > { %v7438_v2 = vld [vmem:[%s7425_s26 + $0x20] sm:$0xff]  ;;  %v7441_v3 = vld [vmem:[%s7425_s26 + $0x30] sm:$0xff]  ;;  %v259_v4 = vsel %vm258_vm0, %v7432_v0, -inf  ;;  %v266_v5 = vsel %vm258_vm0, %v7435_v1, -inf  ;;  %v288_v7 = vsel %vm287_vm1, %v7432_v0, -inf  ;;  %v295_v14 = vsel %vm287_vm1, %v7435_v1, -inf }
  0x3f   : > { %v273_v6 = vsel %vm258_vm0, %v7438_v2, -inf  ;;  %v260_v8 = vrot.slane %v259_v4, 4  ;;  %v267_v9 = vrot.slane %v266_v5, 4  ;;  %v280_v11 = vsel %vm258_vm0, %v7441_v3, -inf  ;;  %s6627_s11 = sshll.u32 %s7421_s18, 7  ;;  %s4532_s14 = sld [smem:[#allocation3]] }
  0x40   : > { %v274_v10 = vrot.slane %v273_v6, 4  ;;  %v281_v12 = vrot.slane %v280_v11, 4  ;;  %v289_v13 = vrot.slane %v288_v7, 4  ;;  %v302_v15 = vsel %vm287_vm1, %v7438_v2, -inf  ;;  %s9083_s12 = scalar_lea.vmem [#allocation7], %s6627_s11  ;;  %s6643_s19 = sshll.u32 %s7338_s2, 11 }
  0x41   : > { %v261_v16 = vmax.f32 %v259_v4, %v260_v8  ;;  %v268_v17 = vmax.f32 %v266_v5, %v267_v9  ;;  %v296_v19 = vrot.slane %v295_v14, 4  ;;  %v303_v22 = vrot.slane %v302_v15, 4  ;;  %s6546_s24 = sshll.u32 %s9083_s12, 4  ;;  %s9126_s13 = scalar_lea.hbm %s9181_s5, %s6643_s19  ;;  %s9128_s24 = int_to_ptr.vmem [resolvable:$true] %s6546_s24 }
  0x42   : > { %v275_v18 = vmax.f32 %v273_v6, %v274_v10  ;;  %v282_v20 = vmax.f32 %v280_v11, %v281_v12  ;;  %v290_v21 = vmax.f32 %v288_v7, %v289_v13  ;;  %v309_v23 = vsel %vm287_vm1, %v7441_v3, -inf  ;;  %s6533_s2 = scalar_lea.sflag [#allocation6], %s7421_s18  ;;  %s7208_s15 = scalar_lea.vmem %s9128_s24, 2048 }
  0x43   : > { %vm316_vm3 = vcmask 128004   ;;  %v262_v24 = vrot.slane %v261_v16, 2  ;;  %v269_v25 = vrot.slane %v268_v17, 2  ;;  %vm522_vm4 = vcmask 1042434   ;;  %p7209_p6 = scmp.ne.s32.totalorder %s9128_s24, %s7208_s15  ;;  %p9258_p11 = scmp.ne.s32.totalorder %s9193_s6, 0 }
  0x44   : > { %v276_v26 = vrot.slane %v275_v18, 2  ;;  %v297_v27 = vmax.f32 %v295_v14, %v296_v19  ;;  %v283_v28 = vrot.slane %v282_v20, 2  ;;  %vm525_vm5 = vcmask 1043459   ;;  %s7281_s16 = smov [#allocation7]  }
  0x45   : > { %v291_v29 = vrot.slane %v290_v21, 2  ;;  %v304_v30 = vmax.f32 %v302_v15, %v303_v22  ;;  %v310_v31 = vrot.slane %v309_v23, 4  ;;  %v263_v32 = vmax.f32 %v261_v16, %v262_v24  ;;  %p7210_p12 = pnand %p7209_p6, %p9258_p11  ;;  %s7212_s17 = sshll.u32 %s7281_s16, 4  ;;  %s7213_s17 = int_to_ptr.vmem [resolvable:$false] %s7212_s17 }
  0x46   : > { %v270_v33 = vmax.f32 %v268_v17, %v269_v25  ;;  %v277_v34 = vmax.f32 %v275_v18, %v276_v26  ;;  %vm602_vm6 = vcmask 27664   ;;  %vm577_vm7 = vcmask 11264   ;;  %s7214_s27 = scalar_lea.vmem %s7213_s17, 4096  ;;  %p7215_p8 = scmp.lt.s32.totalorder %s9128_s24, %s7213_s17 }
  0x47   : > { %v298_v35 = vrot.slane %v297_v27, 2  ;;  %v284_v36 = vmax.f32 %v282_v20, %v283_v28  ;;  %v292_v37 = vmax.f32 %v290_v21, %v291_v29  ;;  %v305_v38 = vrot.slane %v304_v30, 2  ;;  %p7211_p13 = pneg %p7210_p12  ;;  %p7216_p10 = scmp.lt.s32.totalorder %s7214_s27, %s7208_s15 }
  0x48   : > { %v311_v39 = vmax.f32 %v309_v23, %v310_v31  ;;  %v264_v40 = vrot.slane %v263_v32, 1  ;;  %v271_v41 = vrot.slane %v270_v33, 1  ;;  %v278_v42 = vrot.slane %v277_v34, 1 }
  0x49   : > { %v299_v43 = vmax.f32 %v297_v27, %v298_v35  ;;  %v285_v44 = vrot.slane %v284_v36, 1  ;;  %v293_v45 = vrot.slane %v292_v37, 1  ;;  %v306_v46 = vmax.f32 %v304_v30, %v305_v38  ;;  %p7217_p0 = por %p7216_p10, %p7215_p8 }
  0x4a   : > { %v312_v47 = vrot.slane %v311_v39, 2  ;;  %v265_v48 = vmax.f32 %v263_v32, %v264_v40  ;;  %v272_v49 = vmax.f32 %v270_v33, %v271_v41  ;;  %v279_v50 = vmax.f32 %v277_v34, %v278_v42 }
  0x4b   : > { %v300_v51 = vrot.slane %v299_v43, 1  ;;  %vm345_vm8 = vcmask 130054   ;;  %v286_v52 = vmax.f32 %v284_v36, %v285_v44  ;;  %v294_v53 = vmax.f32 %v292_v37, %v293_v45  ;;  %p7218_p2 = pnand %p7217_p0, %p7211_p13 }
  0x4c   : > { %v307_v54 = vrot.slane %v306_v46, 1  ;;  %v313_v55 = vmax.f32 %v311_v39, %v312_v47  ;;  %v518_v56 = vrot.slane %v272_v49, 7  ;;  %v521_v57 = vrot.slane %v279_v50, 6  ;;  %v7511_v50 = vld [vmem:[%s7425_s26 + $0x8] sm:$0xff] }
  0x4d   : > { %v301_v58 = vmax.f32 %v299_v43, %v300_v51  ;;  %v317_v59 = vsel %vm316_vm3, %v7432_v0, -inf  ;;  %v524_v60 = vrot.slane %v286_v52, 5  ;;  %v324_v6 = vsel %vm316_vm3, %v7435_v1, -inf }
  0x4e   : > { %v308_v61 = vmax.f32 %v306_v46, %v307_v54  ;;  %v314_v62 = vrot.slane %v313_v55, 1  ;;  %v318_v63 = vrot.slane %v317_v59, 4  ;;  %v520_v4 = vsel %vm519_vm2, %v518_v56, %v265_v48 }
  0x4f   : > { %v527_v5 = vrot.slane %v301_v58, 7  ;;  %v331_v7 = vsel %vm316_vm3, %v7438_v2, -inf  ;;  %v523_v8 = vsel %vm522_vm4, %v521_v57, %v520_v4  ;;  %v325_v14 = vrot.slane %v324_v6, 4 }
  0x50   : > { %v315_v9 = vmax.f32 %v313_v55, %v314_v62  ;;  %v529_v10 = vrot.slane %v308_v61, 6  ;;  %v319_v11 = vmax.f32 %v317_v59, %v318_v63  ;;  %v7468_v12 = vsel %vm525_vm5, %v524_v60, %v523_v8 }
  0x51   : > { %v528_v13 = vsel %vm519_vm2, %v527_v5, %v294_v53  ;;  %v332_v15 = vrot.slane %v331_v7, 4  ;;  %v603_v16 = vsel %vm602_vm6, %v7468_v12, -inf  ;;  %v578_v17 = vsel %vm577_vm7, %v7468_v12, -inf }
  0x52   : > { %v530_v18 = vsel %vm522_vm4, %v529_v10, %v528_v13  ;;  %v531_v19 = vrot.slane %v315_v9, 5  ;;  %604 = vmax.xlane.f32.xlu1 %v603_v16  ;;  %579 = vmax.xlane.f32.xlu0 %v578_v17  ;;  %v320_v20 = vrot.slane %v319_v11, 2  ;;  %v326_v21 = vmax.f32 %v324_v6, %v325_v14 }
  0x53   : > { %v333_v22 = vmax.f32 %v331_v7, %v332_v15  ;;  %v338_v23 = vsel %vm316_vm3, %v7441_v3, -inf  ;;  %v7483_v26 = vsel %vm345_vm8, %v7432_v0, -inf  ;;  %vm627_vm9 = vcmask 44064   ;;  %v7521_v7 = vld [vmem:[%s7425_s26 + $0x18] sm:$0xff] }
  0x54   : > { %v7479_v24 = vsel %vm525_vm5, %v531_v19, %v530_v18  ;;  %v339_v25 = vrot.slane %v338_v23, 4  ;;  %v321_v29 = vmax.f32 %v319_v11, %v320_v20  ;;  %v327_v30 = vrot.slane %v326_v21, 2  ;;  %v7525_v11 = vld [vmem:[%s7425_s26 + $0x28] sm:$0xff] }
  0x55   : > { %v606_v27 = vsel %vm602_vm6, %v7479_v24, -inf  ;;  %v581_v28 = vsel %vm577_vm7, %v7479_v24, -inf  ;;  %v334_v31 = vrot.slane %v333_v22, 2  ;;  %v347_v33 = vrot.slane %v7483_v26, 4 }
  0x56   : > { %v340_v32 = vmax.f32 %v338_v23, %v339_v25  ;;  %607 = vmax.xlane.f32.xlu1 %v606_v27  ;;  %582 = vmax.xlane.f32.xlu0 %v581_v28  ;;  %v322_v34 = vrot.slane %v321_v29, 1  ;;  %v328_v35 = vmax.f32 %v326_v21, %v327_v30  ;;  %v7492_v36 = vsel %vm345_vm8, %v7435_v1, -inf  ;;  %v7538_v25 = vld [vmem:[%s7425_s26 + $0x38] sm:$0xff] }
  0x57   : > { %v7496_v37 = vsel %vm345_vm8, %v7438_v2, -inf  ;;  %v335_v38 = vmax.f32 %v333_v22, %v334_v31  ;;  %v348_v40 = vmax.f32 %v7483_v26, %v347_v33  ;;  %v354_v41 = vrot.slane %v7492_v36, 4 }
  0x58   : > { %v341_v39 = vrot.slane %v340_v32, 2  ;;  %v329_v42 = vrot.slane %v328_v35, 1  ;;  %v7502_v43 = vsel %vm627_vm9, %v7468_v12, -inf  ;;  %v361_v44 = vrot.slane %v7496_v37, 4 }
  0x59   : > { %v7507_v45 = vsel %vm345_vm8, %v7441_v3, -inf  ;;  %v336_v46 = vrot.slane %v335_v38, 1  ;;  %v349_v48 = vrot.slane %v348_v40, 2  ;;  %v355_v49 = vmax.f32 %v7492_v36, %v354_v41 }
  0x5a   : > { %v342_v47 = vmax.f32 %v340_v32, %v341_v39  ;;  %v323_v51 = vmax.f32 %v321_v29, %v322_v34  ;;  %v330_v52 = vmax.f32 %v328_v35, %v329_v42  ;;  %v362_v53 = vmax.f32 %v7496_v37, %v361_v44 }
  0x5b   : > { %v368_v54 = vrot.slane %v7507_v45, 4  ;;  %v337_v55 = vmax.f32 %v335_v38, %v336_v46  ;;  %v350_v57 = vmax.f32 %v348_v40, %v349_v48  ;;  %v356_v58 = vrot.slane %v355_v49, 2 }
  0x5c   : > { %v343_v56 = vrot.slane %v342_v47, 1  ;;  %v533_v59 = vrot.slane %v330_v52, 7  ;;  %v363_v60 = vrot.slane %v362_v53, 2  ;;  %v7518_v62 = vsel %vm258_vm0, %v7511_v50, -inf }
  0x5d   : > { %v369_v61 = vmax.f32 %v7507_v45, %v368_v54  ;;  %v535_v4 = vrot.slane %v337_v55, 6  ;;  %v351_v5 = vrot.slane %v350_v57, 1  ;;  %v357_v6 = vmax.f32 %v355_v49, %v356_v58 }
  0x5e   : > { %v344_v63 = vmax.f32 %v342_v47, %v343_v56  ;;  %vm652_vm10 = vcmask 60464   ;;  %v534_v8 = vsel %vm519_vm2, %v533_v59, %v323_v51  ;;  %v364_v9 = vmax.f32 %v362_v53, %v363_v60 }
  0x5f   : > { %v370_v10 = vrot.slane %v369_v61, 2  ;;  %v375_v13 = vrot.slane %v7518_v62, 4  ;;  %v536_v14 = vsel %vm522_vm4, %v535_v4, %v534_v8  ;;  %v352_v16 = vmax.f32 %v350_v57, %v351_v5 }
  0x60   : > { %v537_v15 = vrot.slane %v344_v63, 5  ;;  %v358_v17 = vrot.slane %v357_v6, 1  ;;  %v365_v18 = vrot.slane %v364_v9, 1  ;;  %v7532_v21 = vsel %vm258_vm0, %v7521_v7, -inf }
  0x61   : > { %v371_v19 = vmax.f32 %v369_v61, %v370_v10  ;;  %v376_v20 = vmax.f32 %v7518_v62, %v375_v13  ;;  %v382_v27 = vrot.slane %v7532_v21, 4  ;;  %v7543_v28 = vsel %vm258_vm0, %v7525_v11, -inf }
  0x62   : > { %v7535_v22 = vsel %vm525_vm5, %v537_v15, %v536_v14  ;;  %v359_v23 = vmax.f32 %v357_v6, %v358_v17  ;;  %v366_v31 = vmax.f32 %v364_v9, %v365_v18  ;;  %v631_v33 = vsel %vm627_vm9, %v7479_v24, -inf }
  0x63   : > { %v609_v29 = vsel %vm602_vm6, %v7535_v22, -inf  ;;  %v584_v30 = vsel %vm577_vm7, %v7535_v22, -inf  ;;  %v372_v32 = vrot.slane %v371_v19, 1  ;;  %v377_v35 = vrot.slane %v376_v20, 2 }
  0x64   : > { %610 = vmax.xlane.f32.xlu1 %v609_v29  ;;  %585 = vmax.xlane.f32.xlu0 %v584_v30  ;;  %v539_v34 = vrot.slane %v359_v23, 7  ;;  %v383_v38 = vmax.f32 %v7532_v21, %v382_v27  ;;  %v541_v40 = vrot.slane %v366_v31, 6  ;;  %v389_v41 = vrot.slane %v7543_v28, 4 }
  0x65   : > { %v373_v39 = vmax.f32 %v371_v19, %v372_v32  ;;  %v7555_v42 = vsel %vm258_vm0, %v7538_v25, -inf  ;;  %v378_v46 = vmax.f32 %v376_v20, %v377_v35  ;;  %v653_v57 = vsel %vm652_vm10, %v7468_v12, -inf }
  0x66   : > { %v540_v44 = vsel %vm519_vm2, %v539_v34, %v352_v16  ;;  %v384_v47 = vrot.slane %v383_v38, 2  ;;  %v396_v48 = vrot.slane %v7555_v42, 4  ;;  %v390_v52 = vmax.f32 %v7543_v28, %v389_v41 }
  0x67   : > { %v542_v49 = vsel %vm522_vm4, %v541_v40, %v540_v44  ;;  %v543_v51 = vrot.slane %v373_v39, 5  ;;  %v379_v53 = vrot.slane %v378_v46, 1  ;;  %v402_v59 = vsel %vm287_vm1, %v7511_v50, -inf }
  0x68   : > { %632 = vmax.xlane.f32.xlu1 %v631_v33  ;;  %629 = vmax.xlane.f32.xlu0 %v7502_v43  ;;  %v385_v54 = vmax.f32 %v383_v38, %v384_v47  ;;  %v397_v55 = vmax.f32 %v7555_v42, %v396_v48  ;;  %v391_v58 = vrot.slane %v390_v52, 2  ;;  %v634_v61 = vsel %vm627_vm9, %v7535_v22, -inf }
  0x69   : > { %v7564_v56 = vsel %vm525_vm5, %v543_v51, %v542_v49  ;;  %v380_v4 = vmax.f32 %v378_v46, %v379_v53  ;;  %v403_v8 = vrot.slane %v402_v59, 4  ;;  %v409_v10 = vsel %vm287_vm1, %v7521_v7, -inf }
  0x6a   : > { %v612_v60 = vsel %vm602_vm6, %v7564_v56, -inf  ;;  %v587_v43 = vsel %vm577_vm7, %v7564_v56, -inf  ;;  %v386_v63 = vrot.slane %v385_v54, 1  ;;  %v392_v5 = vmax.f32 %v390_v52, %v391_v58 }
  0x6b   : > { %v398_v6 = vrot.slane %v397_v55, 2  ;;  %v416_v13 = vsel %vm287_vm1, %v7525_v11, -inf  ;;  %v423_v14 = vsel %vm287_vm1, %v7538_v25, -inf  ;;  %v404_v17 = vmax.f32 %v402_v59, %v403_v8 }
  0x6c   : > { %613 = vmax.xlane.f32.xlu1 %v612_v60  ;;  %588 = vmax.xlane.f32.xlu0 %v587_v43  ;;  %v387_v9 = vmax.f32 %v385_v54, %v386_v63  ;;  %v393_v15 = vrot.slane %v392_v5, 1  ;;  %v410_v18 = vrot.slane %v409_v10, 4  ;;  %v417_v20 = vrot.slane %v416_v13, 4 }
  0x6d   : > { %v399_v16 = vmax.f32 %v397_v55, %v398_v6  ;;  %v424_v23 = vrot.slane %v423_v14, 4  ;;  %v405_v30 = vrot.slane %v404_v17, 2  ;;  %v656_v33 = vsel %vm652_vm10, %v7479_v24, -inf }
  0x6e   : > { %v545_v19 = vrot.slane %v387_v9, 7  ;;  %v394_v27 = vmax.f32 %v392_v5, %v393_v15  ;;  %v411_v31 = vmax.f32 %v409_v10, %v410_v18  ;;  %v418_v34 = vmax.f32 %v416_v13, %v417_v20 }
  0x6f   : > { %v400_v29 = vrot.slane %v399_v16, 1  ;;  %v425_v35 = vmax.f32 %v423_v14, %v424_v23  ;;  %v406_v40 = vmax.f32 %v404_v17, %v405_v30  ;;  %vm677_vm11 = vcmask 76864  }
  0x70   : > { %654 = vmax.xlane.f32.xlu1 %v653_v57  ;;  %635 = vmax.xlane.f32.xlu0 %v634_v61  ;;  %v546_v32 = vsel %vm519_vm2, %v545_v19, %v380_v4  ;;  %v547_v39 = vrot.slane %v394_v27, 6  ;;  %v412_v41 = vrot.slane %v411_v31, 2  ;;  %v419_v44 = vrot.slane %v418_v34, 2 }
  0x71   : > { %v401_v38 = vmax.f32 %v399_v16, %v400_v29  ;;  %v426_v46 = vrot.slane %v425_v35, 2  ;;  %v407_v49 = vrot.slane %v406_v40, 1  ;;  %v659_v52 = vsel %vm652_vm10, %v7535_v22, -inf }
  0x72   : > { %v548_v47 = vsel %vm522_vm4, %v547_v39, %v546_v32  ;;  %v413_v51 = vmax.f32 %v411_v31, %v412_v41  ;;  %v420_v53 = vmax.f32 %v418_v34, %v419_v44  ;;  %v430_v55 = vsel %vm316_vm3, %v7511_v50, -inf }
  0x73   : > { %v549_v48 = vrot.slane %v401_v38, 5  ;;  %v427_v54 = vmax.f32 %v425_v35, %v426_v46  ;;  %v637_v58 = vsel %vm627_vm9, %v7564_v56, -inf  ;;  %v431_v60 = vrot.slane %v430_v55, 4 }
  0x74   : > { %657 = vmax.xlane.f32.xlu0 %v656_v33  ;;  %v414_v59 = vrot.slane %v413_v51, 1  ;;  %v421_v63 = vrot.slane %v420_v53, 1  ;;  %v408_v5 = vmax.f32 %v406_v40, %v407_v49  ;;  %v437_v9 = vsel %vm316_vm3, %v7521_v7, -inf }
  0x75   : > { %v7591_v57 = vsel %vm525_vm5, %v549_v48, %v548_v47  ;;  %v428_v4 = vrot.slane %v427_v54, 1  ;;  %v432_v8 = vmax.f32 %v430_v55, %v431_v60  ;;  %v438_v14 = vrot.slane %v437_v9, 4 }
  0x76   : > { %v590_v43 = vsel %vm577_vm7, %v7591_v57, -inf  ;;  %v615_v61 = vsel %vm602_vm6, %v7591_v57, -inf  ;;  %v415_v6 = vmax.f32 %v413_v51, %v414_v59  ;;  %v422_v10 = vmax.f32 %v420_v53, %v421_v63 }
  0x77   : > { %591 = vmax.xlane.f32.xlu1 %v590_v43  ;;  %v429_v13 = vmax.f32 %v427_v54, %v428_v4  ;;  %v444_v15 = vsel %vm316_vm3, %v7525_v11, -inf  ;;  %v433_v17 = vrot.slane %v432_v8, 2  ;;  %v451_v19 = vsel %vm316_vm3, %v7538_v25, -inf }
  0x78   : > { %616 = vmax.xlane.f32.xlu0 %v615_v61  ;;  %v551_v16 = vrot.slane %v415_v6, 7  ;;  %v445_v18 = vrot.slane %v444_v15, 4  ;;  %v553_v20 = vrot.slane %v422_v10, 6  ;;  %v439_v27 = vmax.f32 %v437_v9, %v438_v14 }
  0x79   : > { %v555_v23 = vrot.slane %v429_v13, 5  ;;  %v452_v29 = vrot.slane %v451_v19, 4  ;;  %v434_v31 = vmax.f32 %v432_v8, %v433_v17  ;;  %v678_v33 = vsel %vm677_vm11, %v7468_v12, -inf }
  0x7a   : > { %v552_v30 = vsel %vm519_vm2, %v551_v16, %v408_v5  ;;  %v446_v32 = vmax.f32 %v444_v15, %v445_v18  ;;  %v440_v35 = vrot.slane %v439_v27, 2  ;;  %v681_v40 = vsel %vm677_vm11, %v7479_v24, -inf }
  0x7b   : > { %638 = vmax.xlane.f32.xlu1 %v637_v58  ;;  %v554_v34 = vsel %vm522_vm4, %v553_v20, %v552_v30  ;;  %v453_v38 = vmax.f32 %v451_v19, %v452_v29  ;;  %v435_v41 = vrot.slane %v434_v31, 1  ;;  %vm702_vm12 = vcmask 93264  }
  0x7c   : > { %660 = vmax.xlane.f32.xlu0 %v659_v52  ;;  %v7610_v39 = vsel %vm525_vm5, %v555_v23, %v554_v34  ;;  %v447_v44 = vrot.slane %v446_v32, 2  ;;  %v441_v46 = vmax.f32 %v439_v27, %v440_v35  ;;  %v458_v55 = vsel %vm345_vm8, %v7511_v50, -inf }
  0x7d   : > { %v454_v47 = vrot.slane %v453_v38, 2  ;;  %v593_v48 = vsel %vm577_vm7, %v7610_v39, -inf  ;;  %v618_v49 = vsel %vm602_vm6, %v7610_v39, -inf  ;;  %v436_v52 = vmax.f32 %v434_v31, %v435_v41 }
  0x7e   : > { %v448_v51 = vmax.f32 %v446_v32, %v447_v44  ;;  %v442_v53 = vrot.slane %v441_v46, 1  ;;  %v459_v59 = vrot.slane %v458_v55, 4  ;;  %v465_v60 = vsel %vm345_vm8, %v7521_v7, -inf }
  0x7f   : > { %679 = vmax.xlane.f32.xlu1 %v678_v33  ;;  %v455_v54 = vmax.f32 %v453_v38, %v454_v47  ;;  %v472_v43 = vsel %vm345_vm8, %v7525_v11, -inf  ;;  %v466_v4 = vrot.slane %v465_v60, 4  ;;  %v640_v6 = vsel %vm627_vm9, %v7591_v57, -inf }
  0x80   : > { %682 = vmax.xlane.f32.xlu0 %v681_v40  ;;  %v449_v58 = vrot.slane %v448_v51, 1  ;;  %v443_v61 = vmax.f32 %v441_v46, %v442_v53  ;;  %v473_v5 = vrot.slane %v472_v43, 4  ;;  %v460_v9 = vmax.f32 %v458_v55, %v459_v59 }
  0x81   : > { %v456_v63 = vrot.slane %v455_v54, 1  ;;  %v479_v10 = vsel %vm345_vm8, %v7538_v25, -inf  ;;  %v467_v15 = vmax.f32 %v465_v60, %v466_v4  ;;  %v662_v17 = vsel %vm652_vm10, %v7564_v56, -inf }
  0x82   : > { %v450_v8 = vmax.f32 %v448_v51, %v449_v58  ;;  %v557_v14 = vrot.slane %v443_v61, 7  ;;  %v474_v16 = vmax.f32 %v472_v43, %v473_v5  ;;  %v461_v19 = vrot.slane %v460_v9, 2 }
  0x83   : > { %594 = vmax.xlane.f32.xlu1 %v593_v48  ;;  %v457_v13 = vmax.f32 %v455_v54, %v456_v63  ;;  %v480_v20 = vrot.slane %v479_v10, 4  ;;  %v468_v29 = vrot.slane %v467_v15, 2  ;;  %v684_v34 = vsel %vm677_vm11, %v7535_v22, -inf }
  0x84   : > { %619 = vmax.xlane.f32.xlu0 %v618_v49  ;;  %v559_v18 = vrot.slane %v450_v8, 6  ;;  %v558_v23 = vsel %vm519_vm2, %v557_v14, %v436_v52  ;;  %v475_v30 = vrot.slane %v474_v16, 2  ;;  %v462_v32 = vmax.f32 %v460_v9, %v461_v19 }
  0x85   : > { %v561_v27 = vrot.slane %v457_v13, 5  ;;  %v481_v33 = vmax.f32 %v479_v10, %v480_v20  ;;  %v469_v35 = vmax.f32 %v467_v15, %v468_v29  ;;  %vm1506_vm13 = vcmask 124928  }
  0x86   : > { %v560_v31 = vsel %vm522_vm4, %v559_v18, %v558_v23  ;;  %v476_v38 = vmax.f32 %v474_v16, %v475_v30  ;;  %v703_v40 = vsel %vm702_vm12, %v7468_v12, -inf  ;;  %v463_v46 = vrot.slane %v462_v32, 1 }
  0x87   : > { %641 = vmax.xlane.f32.xlu1 %v640_v6  ;;  %v482_v41 = vrot.slane %v481_v33, 2  ;;  %v7637_v44 = vsel %vm525_vm5, %v561_v27, %v560_v31  ;;  %v470_v47 = vrot.slane %v469_v35, 1  ;;  %v1507_v51 = vsel %vm1506_vm13, %v7432_v0, -inf }
  0x88   : > { %663 = vmax.xlane.f32.xlu0 %v662_v17  ;;  %v477_v48 = vrot.slane %v476_v38, 1  ;;  %v1514_v52 = vsel %vm1506_vm13, %v7435_v1, -inf  ;;  %vm1535_vm14 = vcmask 128003   ;;  %v706_v53 = vsel %vm702_vm12, %v7479_v24, -inf }
  0x89   : > { %v483_v49 = vmax.f32 %v481_v33, %v482_v41  ;;  %v471_v54 = vmax.f32 %v469_v35, %v470_v47  ;;  %v1508_v55 = vrot.slane %v1507_v51, 4  ;;  %v1515_v58 = vrot.slane %v1514_v52, 4 }
  0x8a   : > { %v596_v59 = vsel %vm577_vm7, %v7637_v44, -inf  ;;  %v478_v60 = vmax.f32 %v476_v38, %v477_v48  ;;  %v1521_v61 = vsel %vm1506_vm13, %v7438_v2, -inf  ;;  %v464_v63 = vmax.f32 %v462_v32, %v463_v46 }
  0x8b   : > { %685 = vmax.xlane.f32.xlu1 %v684_v34  ;;  %v484_v43 = vrot.slane %v483_v49, 1  ;;  %v563_v4 = vrot.slane %v471_v54, 7  ;;  %v1516_v5 = vmax.f32 %v1514_v52, %v1515_v58  ;;  %v1528_v6 = vsel %vm1506_vm13, %v7441_v3, -inf }
  0x8c   : > { %704 = vmax.xlane.f32.xlu0 %v703_v40  ;;  %v1522_v8 = vrot.slane %v1521_v61, 4  ;;  %v1536_v9 = vsel %vm1535_vm14, %v7432_v0, -inf  ;;  %v621_v10 = vsel %vm602_vm6, %v7637_v44, -inf  ;;  %v1509_v13 = vmax.f32 %v1507_v51, %v1508_v55 }
  0x8d   : > { %v1537_v14 = vrot.slane %v1536_v9, 4  ;;  %v643_v15 = vsel %vm627_vm9, %v7610_v39, -inf  ;;  %v485_v16 = vmax.f32 %v483_v49, %v484_v43  ;;  %v565_v17 = vrot.slane %v478_v60, 6 }
  0x8e   : > { %v1529_v18 = vrot.slane %v1528_v6, 4  ;;  %v564_v19 = vsel %vm519_vm2, %v563_v4, %v464_v63  ;;  %v1517_v20 = vrot.slane %v1516_v5, 2  ;;  %v1523_v23 = vmax.f32 %v1521_v61, %v1522_v8 }
  0x8f   : > { %707 = vmax.xlane.f32.xlu1 %v706_v53  ;;  %v1543_v27 = vsel %vm1535_vm14, %v7435_v1, -inf  ;;  %vm727_vm15 = vcmask 109664   ;;  %v665_v29 = vsel %vm652_vm10, %v7591_v57, -inf  ;;  %v687_v30 = vsel %vm677_vm11, %v7564_v56, -inf }
  0x90   : > { %597 = vmax.xlane.f32.xlu0 %v596_v59  ;;  %v1544_v0 = vrot.slane %v1543_v27, 4  ;;  %v1510_v31 = vrot.slane %v1509_v13, 2  ;;  %v1538_v32 = vmax.f32 %v1536_v9, %v1537_v14  ;;  %v566_v33 = vsel %vm522_vm4, %v565_v17, %v564_v19 }
  0x91   : > { %v567_v34 = vrot.slane %v485_v16, 5  ;;  %v1530_v35 = vmax.f32 %v1528_v6, %v1529_v18  ;;  %v1518_v40 = vmax.f32 %v1516_v5, %v1517_v20  ;;  %v1524_v41 = vrot.slane %v1523_v23, 2 }
  0x92   : > { %v1545_v38 = vmax.f32 %v1543_v27, %v1544_v0  ;;  %v1550_v1 = vsel %vm1535_vm14, %v7438_v2, -inf  ;;  %v1557_v46 = vsel %vm1535_vm14, %v7441_v3, -inf  ;;  %v709_v47 = vsel %vm702_vm12, %v7535_v22, -inf }
  0x93   : > { %622 = vmax.xlane.f32.xlu1 %v621_v10  ;;  %v728_v49 = vsel %vm727_vm15, %v7468_v12, -inf  ;;  %v1539_v51 = vrot.slane %v1538_v32, 2  ;;  %v1551_v52 = vrot.slane %v1550_v1, 4  ;;  %v1558_v53 = vrot.slane %v1557_v46, 4 }
  0x94   : > { %644 = vmax.xlane.f32.xlu0 %v643_v15  ;;  %v1546_v48 = vrot.slane %v1545_v38, 2  ;;  %v7674_v54 = vsel %vm525_vm5, %v567_v34, %v566_v33  ;;  %v1511_v55 = vmax.f32 %v1509_v13, %v1510_v31  ;;  %v1531_v2 = vrot.slane %v1530_v35, 2 }
  0x95   : > { %v1519_v59 = vrot.slane %v1518_v40, 1  ;;  %v1525_v3 = vmax.f32 %v1523_v23, %v1524_v41  ;;  %v1552_v60 = vmax.f32 %v1550_v1, %v1551_v52  ;;  %v1559_v43 = vmax.f32 %v1557_v46, %v1558_v53 }
  0x96   : > { %v1547_v58 = vmax.f32 %v1545_v38, %v1546_v48  ;;  %v731_v61 = vsel %vm727_vm15, %v7479_v24, -inf  ;;  %vm1564_vm0 = vcmask 122880   ;;  %v1540_v63 = vmax.f32 %v1538_v32, %v1539_v51 }
  0x97   : > { %666 = vmax.xlane.f32.xlu1 %v665_v29  ;;  %v1553_v5 = vrot.slane %v1552_v60, 2  ;;  %v1560_v6 = vrot.slane %v1559_v43, 2  ;;  %v599_v8 = vsel %vm577_vm7, %v7674_v54, -inf  ;;  %v1512_v9 = vrot.slane %v1511_v55, 1 }
  0x98   : > { %688 = vmax.xlane.f32.xlu0 %v687_v30  ;;  %v1548_v4 = vrot.slane %v1547_v58, 1  ;;  %v1532_v10 = vmax.f32 %v1530_v35, %v1531_v2  ;;  %v1565_v13 = vsel %vm1564_vm0, %v7511_v50, -inf  ;;  %v1520_v14 = vmax.f32 %v1518_v40, %v1519_v59 }
  0x99   : > { %v1526_v15 = vrot.slane %v1525_v3, 1  ;;  %v1554_v16 = vmax.f32 %v1552_v60, %v1553_v5  ;;  %v1561_v17 = vmax.f32 %v1559_v43, %v1560_v6  ;;  %v624_v18 = vsel %vm602_vm6, %v7674_v54, -inf }
  0x9a   : > { %v646_v19 = vsel %vm627_vm9, %v7637_v44, -inf  ;;  %v1566_v20 = vmax.f32 %v7483_v26, %v1565_v13  ;;  %v1573_v23 = vsel %vm1564_vm0, %v7521_v7, -inf  ;;  %v1541_v27 = vrot.slane %v1540_v63, 1 }
  0x9b   : > { %710 = vmax.xlane.f32.xlu1 %v709_v47  ;;  %v1549_v0 = vmax.f32 %v1547_v58, %v1548_v4  ;;  %v1555_v29 = vrot.slane %v1554_v16, 1  ;;  %v1574_v30 = vmax.f32 %v7492_v36, %v1573_v23  ;;  %v1513_v31 = vmax.f32 %v1511_v55, %v1512_v9 }
  0x9c   : > { %729 = vmax.xlane.f32.xlu0 %v728_v49  ;;  %v1533_v32 = vrot.slane %v1532_v10, 1  ;;  %v1581_v33 = vsel %vm1564_vm0, %v7525_v11, -inf  ;;  %v1589_v34 = vsel %vm1564_vm0, %v7538_v25, -inf  ;;  %v1527_v35 = vmax.f32 %v1525_v3, %v1526_v15 }
  0x9d   : > { %v1675_v38 = vrot.slane %v1520_v14, 7  ;;  %v1562_v40 = vrot.slane %v1561_v17, 1  ;;  %v1575_v41 = vrot.slane %v1574_v30, 4  ;;  %v1556_v1 = vmax.f32 %v1554_v16, %v1555_v29 }
  0x9e   : > { %v1567_v46 = vrot.slane %v1566_v20, 4  ;;  %v1582_v47 = vmax.f32 %v7496_v37, %v1581_v33  ;;  %v1590_v48 = vmax.f32 %v7507_v45, %v1589_v34  ;;  %v668_v49 = vsel %vm652_vm10, %v7610_v39, -inf }
  0x9f   : > { %732 = vmax.xlane.f32.xlu1 %v731_v61  ;;  %v1542_v51 = vmax.f32 %v1540_v63, %v1541_v27  ;;  %v1681_v52 = vrot.slane %v1549_v0, 7  ;;  %v1576_v53 = vmax.f32 %v1574_v30, %v1575_v41  ;;  %v690_v55 = vsel %vm677_vm11, %v7591_v57, -inf }
  0xa0   : > { %600 = vmax.xlane.f32.xlu0 %v599_v8  ;;  %v1534_v2 = vmax.f32 %v1532_v10, %v1533_v32  ;;  %v1583_v58 = vrot.slane %v1582_v47, 4  ;;  %v1591_v59 = vrot.slane %v1590_v48, 4  ;;  %v1676_v3 = vsel %vm519_vm2, %v1675_v38, %v1513_v31 }
  0xa1   : > { %v1677_v60 = vrot.slane %v1527_v35, 6  ;;  %v1563_v43 = vmax.f32 %v1561_v17, %v1562_v40  ;;  %v1683_v61 = vrot.slane %v1556_v1, 6  ;;  %v1568_v4 = vmax.f32 %v1566_v20, %v1567_v46 }
  0xa2   : > { %v1577_v5 = vrot.slane %v1576_v53, 2  ;;  %v1584_v6 = vmax.f32 %v1582_v47, %v1583_v58  ;;  %v712_v63 = vsel %vm702_vm12, %v7564_v56, -inf  ;;  %v1682_v8 = vsel %vm519_vm2, %v1681_v52, %v1542_v51 }
  0xa3   : > { %625 = vmax.xlane.f32.xlu1 %v624_v18  ;;  %vm752_vm1 = vcmask 126064   ;;  %v734_v9 = vsel %vm727_vm15, %v7535_v22, -inf  ;;  %v1679_v10 = vrot.slane %v1534_v2, 5  ;;  %v1592_v13 = vmax.f32 %v1590_v48, %v1591_v59 }
  0xa4   : > { %647 = vmax.xlane.f32.xlu0 %v646_v19  ;;  %v1678_v14 = vsel %vm522_vm4, %v1677_v60, %v1676_v3  ;;  %v1685_v15 = vrot.slane %v1563_v43, 5  ;;  %v1585_v16 = vrot.slane %v1584_v6, 2  ;;  %vm1597_vm3 = vcmask 125953  }
  0xa5   : > { %v1684_v17 = vsel %vm522_vm4, %v1683_v61, %v1682_v8  ;;  %v1569_v18 = vrot.slane %v1568_v4, 2  ;;  %v1578_v19 = vmax.f32 %v1576_v53, %v1577_v5  ;;  %v753_v20 = vsel %vm752_vm1, %v7468_v12, -inf }
  0xa6   : > { %vm1710_vm6 = vcmask 19456   ;;  %v7711_v23 = vsel %vm525_vm5, %v1679_v10, %v1678_v14  ;;  %v756_v27 = vsel %vm752_vm1, %v7479_v24, -inf  ;;  %v1593_v0 = vrot.slane %v1592_v13, 2 }
  0xa7   : > { %669 = vmax.xlane.f32.xlu1 %v668_v49  ;;  %v1605_v29 = vsel %vm1597_vm3, %v7521_v7, -inf  ;;  %v7718_v30 = vsel %vm525_vm5, %v1685_v15, %v1684_v17  ;;  %v1586_v31 = vmax.f32 %v1584_v6, %v1585_v16  ;;  %v1570_v32 = vmax.f32 %v1568_v4, %v1569_v18 }
  0xa8   : > { %691 = vmax.xlane.f32.xlu0 %v690_v55  ;;  %v1579_v33 = vrot.slane %v1578_v19, 1  ;;  %v1711_v12 = vsel %vm1710_vm6, %v7711_v23, -inf  ;;  %v1606_v34 = vrot.slane %v1605_v29, 4  ;;  %v1612_v35 = vsel %vm1597_vm3, %v7525_v11, -inf }
  0xa9   : > { %vm1726_vm7 = vcmask 44056   ;;  %v1714_v24 = vsel %vm1710_vm6, %v7718_v30, -inf  ;;  %v1594_v38 = vmax.f32 %v1592_v13, %v1593_v0  ;;  %v1598_v40 = vsel %vm1597_vm3, %v7511_v50, -inf }
  0xaa   : > { %v1587_v41 = vrot.slane %v1586_v31, 1  ;;  %v1571_v1 = vrot.slane %v1570_v32, 1  ;;  %v1580_v46 = vmax.f32 %v1578_v19, %v1579_v33  ;;  %v1613_v47 = vrot.slane %v1612_v35, 4 }
  0xab   : > { %713 = vmax.xlane.f32.xlu1 %v712_v63  ;;  %v1619_v48 = vsel %vm1597_vm3, %v7538_v25, -inf  ;;  %v1727_v49 = vsel %vm1726_vm7, %v7711_v23, -inf  ;;  %v1599_v51 = vrot.slane %v1598_v40, 4  ;;  %v1607_v52 = vmax.f32 %v1605_v29, %v1606_v34 }
  0xac   : > { %735 = vmax.xlane.f32.xlu0 %v734_v9  ;;  %v1730_v53 = vsel %vm1726_vm7, %v7718_v30, -inf  ;;  %v1595_v55 = vrot.slane %v1594_v38, 1  ;;  %v1588_v2 = vmax.f32 %v1586_v31, %v1587_v41  ;;  %v1620_v58 = vrot.slane %v1619_v48, 4 }
  0xad   : > { %v1572_v59 = vmax.f32 %v1570_v32, %v1571_v1  ;;  %v1687_v3 = vrot.slane %v1580_v46, 7  ;;  %v1614_v60 = vmax.f32 %v1612_v35, %v1613_v47  ;;  %v649_v43 = vsel %vm627_vm9, %v7674_v54, -inf }
  0xae   : > { %v1600_v61 = vmax.f32 %v1598_v40, %v1599_v51  ;;  %v1608_v4 = vrot.slane %v1607_v52, 2  ;;  %v671_v5 = vsel %vm652_vm10, %v7637_v44, -inf  ;;  %v1596_v6 = vmax.f32 %v1594_v38, %v1595_v55 }
  0xaf   : > { %754 = vmax.xlane.f32.xlu1 %v753_v20  ;;  %v1689_v63 = vrot.slane %v1588_v2, 6  ;;  %v1621_v8 = vmax.f32 %v1619_v48, %v1620_v58  ;;  %v1688_v9 = vsel %vm519_vm2, %v1687_v3, %v1572_v59  ;;  %v1615_v10 = vrot.slane %v1614_v60, 2 }
  0xb0   : > { %757 = vmax.xlane.f32.xlu0 %v756_v27  ;;  %v693_v13 = vsel %vm677_vm11, %v7610_v39, -inf  ;;  %v1601_v14 = vrot.slane %v1600_v61, 2  ;;  %v1609_v15 = vmax.f32 %v1607_v52, %v1608_v4  ;;  %v715_v16 = vsel %vm702_vm12, %v7591_v57, -inf }
  0xb1   : > { %v1691_v17 = vrot.slane %v1596_v6, 5  ;;  %vm1626_vm8 = vcmask 129028   ;;  %v1690_v18 = vsel %vm522_vm4, %v1689_v63, %v1688_v9  ;;  %v1622_v19 = vrot.slane %v1621_v8, 2 }
  0xb2   : > { %v1616_v20 = vmax.f32 %v1614_v60, %v1615_v10  ;;  %v737_v27 = vsel %vm727_vm15, %v7564_v56, -inf  ;;  %v1602_v0 = vmax.f32 %v1600_v61, %v1601_v14  ;;  %v1610_v29 = vrot.slane %v1609_v15, 1 }
  0xb3   : > { %1712 = vmax.xlane.f32.xlu1 %v1711_v12  ;;  %v1634_v31 = vsel %vm1626_vm8, %v7521_v7, -inf  ;;  %v7749_v32 = vsel %vm525_vm5, %v1691_v17, %v1690_v18  ;;  %v759_v33 = vsel %vm752_vm1, %v7535_v22, -inf  ;;  %v1623_v12 = vmax.f32 %v1621_v8, %v1622_v19 }
  0xb4   : > { %1715 = vmax.xlane.f32.xlu0 %v1714_v24  ;;  %v7755_v34 = vsel %vm752_vm1, %v7637_v44, -inf  ;;  %v1617_v35 = vrot.slane %v1616_v20, 1  ;;  %v1635_v24 = vrot.slane %v1634_v31, 4  ;;  %v1641_v38 = vsel %vm1626_vm8, %v7525_v11, -inf }
  0xb5   : > { %v7761_v7 = vsel %vm752_vm1, %v7674_v54, -inf  ;;  %v1717_v40 = vsel %vm1710_vm6, %v7749_v32, -inf  ;;  %v1603_v22 = vrot.slane %v1602_v0, 1  ;;  %v1611_v41 = vmax.f32 %v1609_v15, %v1610_v29 }
  0xb6   : > { %v1627_v1 = vsel %vm1626_vm8, %v7511_v50, -inf  ;;  %vm1742_vm9 = vcmask 68656   ;;  %v1733_v46 = vsel %vm1726_vm7, %v7749_v32, -inf  ;;  %v1624_v47 = vrot.slane %v1623_v12, 1 }
  0xb7   : > { %1728 = vmax.xlane.f32.xlu1 %v1727_v49  ;;  %v1642_v48 = vrot.slane %v1641_v38, 4  ;;  %v1648_v11 = vsel %vm1626_vm8, %v7538_v25, -inf  ;;  %v1618_v49 = vmax.f32 %v1616_v20, %v1617_v35  ;;  %v1628_v51 = vrot.slane %v1627_v1, 4 }
  0xb8   : > { %1731 = vmax.xlane.f32.xlu0 %v1730_v53  ;;  %v1636_v52 = vmax.f32 %v1634_v31, %v1635_v24  ;;  %v1743_v53 = vsel %vm1742_vm9, %v7711_v23, -inf  ;;  %v1604_v55 = vmax.f32 %v1602_v0, %v1603_v22  ;;  %v1693_v2 = vrot.slane %v1611_v41, 7 }
  0xb9   : > { %v1746_v50 = vsel %vm1742_vm9, %v7718_v30, -inf  ;;  %v1649_v58 = vrot.slane %v1648_v11, 4  ;;  %v1625_v59 = vmax.f32 %v1623_v12, %v1624_v47  ;;  %v1643_v3 = vmax.f32 %v1641_v38, %v1642_v48 }
  0xba   : > { %v1695_v60 = vrot.slane %v1618_v49, 6  ;;  %v1637_v25 = vrot.slane %v1636_v52, 2  ;;  %v674_v61 = vsel %vm652_vm10, %v7674_v54, -inf  ;;  %v1694_v4 = vsel %vm519_vm2, %v1693_v2, %v1604_v55 }
  0xbb   : > { %650 = vmax.xlane.f32.xlu1 %v649_v43  ;;  %v1629_v43 = vmax.f32 %v1627_v1, %v1628_v51  ;;  %v1650_v6 = vmax.f32 %v1648_v11, %v1649_v58  ;;  %v1697_v63 = vrot.slane %v1625_v59, 5  ;;  %v1644_v8 = vrot.slane %v1643_v3, 2  ;;  %v7816_v58 = vld [vmem:[%s7425_s26] sm:$0xff] }
  0xbc   : > { %672 = vmax.xlane.f32.xlu0 %v671_v5  ;;  %v696_v5 = vsel %vm677_vm11, %v7637_v44, -inf  ;;  %v1696_v9 = vsel %vm522_vm4, %v1695_v60, %v1694_v4  ;;  %v718_v14 = vsel %vm702_vm12, %v7610_v39, -inf  ;;  %v740_v15 = vsel %vm727_vm15, %v7591_v57, -inf  ;;  %9197 = vst [vmem:[#allocation11_spill] sm:$0xff] %v7816_v58  ;;  %v7821_v60 = vld [vmem:[%s7425_s26 + $0x20] sm:$0xff] }
  0xbd   : > { %v1630_v10 = vrot.slane %v1629_v43, 2  ;;  %v7786_v17 = vsel %vm525_vm5, %v1697_v63, %v1696_v9  ;;  %v1645_v18 = vmax.f32 %v1643_v3, %v1644_v8  ;;  %vm1758_vm10 = vcmask 93256   ;;  %9198 = vst [vmem:[#allocation12_spill] sm:$0xff] %v7821_v60 }
  0xbe   : > { %v1720_v0 = vsel %vm1710_vm6, %v7786_v17, -inf  ;;  %v1736_v35 = vsel %vm1726_vm7, %v7786_v17, -inf  ;;  %v1749_v24 = vsel %vm1742_vm9, %v7749_v32, -inf  ;;  %v1759_v41 = vsel %vm1758_vm10, %v7711_v23, -inf }
  0xbf   : > { %694 = vmax.xlane.f32.xlu1 %v693_v13  ;;  %v1638_v13 = vmax.f32 %v1636_v52, %v1637_v25  ;;  %v1631_v19 = vmax.f32 %v1629_v43, %v1630_v10  ;;  %v1646_v31 = vrot.slane %v1645_v18, 1  ;;  %v1762_v1 = vsel %vm1758_vm10, %v7718_v30, -inf  ;;  %v7806_v52 = vld [vmem:[%s7425_s26 + $0x10] sm:$0xff] }
  0xc0   : > { %716 = vmax.xlane.f32.xlu0 %v715_v16  ;;  %v1651_v16 = vrot.slane %v1650_v6, 2  ;;  %vm2089_vm13 = vcmask 126976   ;;  %vm2118_vm14 = vcmask 130053   ;;  %v699_v11 = vsel %vm677_vm11, %v7674_v54, -inf  ;;  %9196 = vst [vmem:[#allocation10_spill] sm:$0xff] %v7806_v52 }
  0xc1   : > { %v1639_v20 = vrot.slane %v1638_v13, 1  ;;  %v721_v49 = vsel %vm702_vm12, %v7637_v44, -inf  ;;  %v2127_v2 = vsel %vm2118_vm14, %v7806_v52, -inf  ;;  %v2090_v59 = vsel %vm2089_vm13, %v7816_v58, -inf }
  0xc2   : > { %v1652_v29 = vmax.f32 %v1650_v6, %v1651_v16  ;;  %v2104_v43 = vsel %vm2089_vm13, %v7821_v60, -inf  ;;  %v2119_v6 = vsel %vm2118_vm14, %v7816_v58, -inf  ;;  %v2128_v63 = vmax.f32 %v2127_v2, %v7532_v21  ;;  %v7845_v16 = vld [vmem:[%s7425_s26 + $0x30] sm:$0xff] }
  0xc3   : > { %738 = vmax.xlane.f32.xlu1 %v737_v27  ;;  %v762_v27 = vsel %vm752_vm1, %v7564_v56, -inf  ;;  %v1640_v12 = vmax.f32 %v1638_v13, %v1639_v20  ;;  %v2135_v8 = vsel %vm2118_vm14, %v7821_v60, -inf  ;;  %v2091_v9 = vrot.slane %v2090_v59, 4  ;;  %9199 = vst [vmem:[#allocation13_spill] sm:$0xff] %v7845_v16 }
  0xc4   : > { %760 = vmax.xlane.f32.xlu0 %v759_v33  ;;  %v1632_v33 = vrot.slane %v1631_v19, 1  ;;  %v1653_v38 = vrot.slane %v1652_v29, 1  ;;  %v2105_v10 = vrot.slane %v2104_v43, 4  ;;  %v2111_v21 = vsel %vm2089_vm13, %v7845_v16, -inf }
  0xc5   : > { %v1699_v22 = vrot.slane %v1640_v12, 7  ;;  %v2143_v20 = vsel %vm2118_vm14, %v7845_v16, -inf  ;;  %vm1774_vm11 = vcmask 117856   ;;  %v2112_v12 = vrot.slane %v2111_v21, 4 }
  0xc6   : > { %v1633_v56 = vmax.f32 %v1631_v19, %v1632_v33  ;;  %v2136_v19 = vmax.f32 %v2135_v8, %v7543_v28  ;;  %v1765_v28 = vsel %vm1758_vm10, %v7749_v32, -inf  ;;  %vm2151_vm0 = vcmask 129026  }
  0xc7   : > { %1718 = vmax.xlane.f32.xlu1 %v1717_v40  ;;  %v1647_v40 = vmax.f32 %v1645_v18, %v1646_v31  ;;  %v2129_v18 = vrot.slane %v2128_v63, 4  ;;  %v1752_v31 = vsel %vm1742_vm9, %v7786_v17, -inf  ;;  %vm2223_vm3 = vcmask 76840  }
  0xc8   : > { %1734 = vmax.xlane.f32.xlu0 %v1733_v46  ;;  %v1654_v46 = vmax.f32 %v1652_v29, %v1653_v38  ;;  %v1700_v48 = vsel %vm519_vm2, %v1699_v22, %v1633_v56  ;;  %v2106_v29 = vmax.f32 %v2104_v43, %v2105_v10  ;;  %v2137_v38 = vrot.slane %v2136_v19, 4 }
  0xc9   : > { %v1701_v47 = vrot.slane %v1647_v40, 6  ;;  %v2144_v40 = vmax.f32 %v2143_v20, %v7555_v42  ;;  %v1775_v56 = vsel %vm1774_vm11, %v7711_v23, -inf  ;;  %v724_v23 = vsel %vm702_vm12, %v7674_v54, -inf }
  0xca   : > { %v1703_v51 = vrot.slane %v1654_v46, 5  ;;  %v2138_v42 = vmax.f32 %v2136_v19, %v2137_v38  ;;  %v7892_v19 = vld [vmem:[%s7425_s26 + $0x28] sm:$0xff]  ;;  %v1768_v38 = vsel %vm1758_vm10, %v7786_v17, -inf  ;;  %vm2364_vm12 = vcmask 128000  }
  0xcb   : > { %1744 = vmax.xlane.f32.xlu1 %v1743_v53  ;;  %v2097_v53 = vsel %vm2089_vm13, %v7806_v52, -inf  ;;  %v1702_v55 = vsel %vm522_vm4, %v1701_v47, %v1700_v48  ;;  %v2113_v47 = vmax.f32 %v2111_v21, %v2112_v12  ;;  %9202 = vst [vmem:[#allocation16_spill] sm:$0xff] %v7892_v19  ;;  %vm2455_vm8 = vcmask 93232  }
  0xcc   : > { %1747 = vmax.xlane.f32.xlu0 %v1746_v50  ;;  %v743_v50 = vsel %vm727_vm15, %v7610_v39, -inf  ;;  %v2098_v3 = vrot.slane %v2097_v53, 4  ;;  %v7826_v25 = vsel %vm525_vm5, %v1703_v51, %v1702_v55  ;;  %vm1371_vm13 = vcmask 1046534  }
  0xcd   : > { %v1723_v13 = vsel %vm1710_vm6, %v7826_v25, -inf  ;;  %vm2233_vm6 = vcmask 117840   ;;  %vm1373_vm14 = vcmask 1047559  }
  0xcf   : > { %675 = vmax.xlane.f32.xlu1 %v674_v61  ;;  %v765_v61 = vsel %vm752_vm1, %v7591_v57, -inf  ;;  %v2099_v57 = vmax.f32 %v2097_v53, %v2098_v3  ;;  %v2145_v53 = vrot.slane %v2144_v40, 4  ;;  %v7872_v3 = vld [vmem:[%s7425_s26 + $0x18] sm:$0xff] }
  0xd0   : > { %697 = vmax.xlane.f32.xlu0 %v696_v5  ;;  %9200 = vst [vmem:[#allocation14_spill] sm:$0xff] %v7872_v3  ;;  %v2159_v43 = vsel %vm2151_vm0, %v7872_v3, -inf }
  0xd1   : > { %v2100_v33 = vrot.slane %v2099_v57, 2  ;;  %v2146_v10 = vmax.f32 %v2144_v40, %v2145_v53 }
  0xd3   : > { %719 = vmax.xlane.f32.xlu1 %v718_v14  ;;  %v2120_v14 = vmax.f32 %v2119_v6, %v7518_v62  ;;  %v2092_v62 = vmax.f32 %v2090_v59, %v2091_v9  ;;  %v2101_v46 = vmax.f32 %v2099_v57, %v2100_v33  ;;  %v2139_v9 = vrot.slane %v2138_v42, 2  ;;  %v7885_v57 = vld [vmem:[%s7425_s26 + $0x8] sm:$0xff] }
  0xd4   : > { %741 = vmax.xlane.f32.xlu0 %v740_v15  ;;  %v1739_v15 = vsel %vm1726_vm7, %v7826_v25, -inf  ;;  %9201 = vst [vmem:[#allocation15_spill] sm:$0xff] %v7885_v57  ;;  %vm2448_vm7 = vcmask 44032  }
  0xd5   : > { %v2093_v22 = vrot.slane %v2092_v62, 2 }
  0xd7   : > { %763 = vmax.xlane.f32.xlu1 %v762_v27  ;;  %v2094_v55 = vmax.f32 %v2092_v62, %v2093_v22 }
  0xd8   : > { %1721 = vmax.xlane.f32.xlu0 %v1720_v0 }
  0xd9   : > { %v2095_v21 = vrot.slane %v2094_v55, 1 }
  0xdb   : > { %1737 = vmax.xlane.f32.xlu1 %v1736_v35  ;;  %v2121_v35 = vrot.slane %v2120_v14, 4  ;;  %v2096_v22 = vmax.f32 %v2094_v55, %v2095_v21 }
  0xdc   : > { %1750 = vmax.xlane.f32.xlu0 %v1749_v24  ;;  %v2130_v24 = vmax.f32 %v2128_v63, %v2129_v18  ;;  %v746_v63 = vsel %vm727_vm15, %v7637_v44, -inf  ;;  %v2160_v18 = vrot.slane %v2159_v43, 4  ;;  %v2166_v44 = vsel %vm2151_vm0, %v7892_v19, -inf }
  0xdd   : > { %v2122_v48 = vmax.f32 %v2120_v14, %v2121_v35  ;;  %v2152_v14 = vsel %vm2151_vm0, %v7885_v57, -inf  ;;  %v2140_v35 = vmax.f32 %v2138_v42, %v2139_v9  ;;  %v2167_v40 = vrot.slane %v2166_v44, 4 }
  0xde   : > { %v2131_v51 = vrot.slane %v2130_v24, 2 }
  0xdf   : > { %1760 = vmax.xlane.f32.xlu1 %v1759_v41  ;;  %v7830_v4 = vpop.xlane.xlu1 %604  ;;  %v7832_v5 = vpop.xlane.xlu0 %579  ;;  %v2107_v41 = vrot.slane %v2106_v29, 2  ;;  %v2123_v59 = vrot.slane %v2122_v48, 2 }
  0xe0   : > { %1763 = vmax.xlane.f32.xlu0 %v1762_v1  ;;  %v1778_v1 = vsel %vm1774_vm11, %v7718_v30, -inf  ;;  %v2102_v30 = vrot.slane %v2101_v46, 1  ;;  %v2132_v8 = vmax.f32 %v2130_v24, %v2131_v51  ;;  %v2153_v24 = vrot.slane %v2152_v14, 4 }
  0xe1   : > { %v2108_v2 = vmax.f32 %v2106_v29, %v2107_v41  ;;  %v2124_v29 = vmax.f32 %v2122_v48, %v2123_v59  ;;  %v2161_v41 = vmax.f32 %v2159_v43, %v2160_v18  ;;  %v749_v43 = vsel %vm727_vm15, %v7674_v54, -inf }
  0xe2   : > { %v2103_v20 = vmax.f32 %v2101_v46, %v2102_v30  ;;  %v2133_v12 = vrot.slane %v2132_v8, 1  ;;  %v2141_v30 = vrot.slane %v2140_v35, 1  ;;  %v2154_v59 = vmax.f32 %v2152_v14, %v2153_v24 }
  0xe3   : > { %700 = vmax.xlane.f32.xlu1 %v699_v11  ;;  %v7852_v27 = vpop.xlane.xlu1 %607  ;;  %v7854_v0 = vpop.xlane.xlu0 %582  ;;  %v2125_v42 = vrot.slane %v2124_v29, 1  ;;  %v2162_v9 = vrot.slane %v2161_v41, 2  ;;  %vm2213_vm15 = vcmask 35840  }
  0xe4   : > { %722 = vmax.xlane.f32.xlu0 %v721_v49  ;;  %v2192_v51 = vrot.slane %v2103_v20, 7  ;;  %v2155_v20 = vrot.slane %v2154_v59, 2 }
  0xe5   : > { %v2126_v21 = vmax.f32 %v2124_v29, %v2125_v42  ;;  %v1784_v29 = vsel %vm1774_vm11, %v7786_v17, -inf  ;;  %v1787_v17 = vsel %vm1774_vm11, %v7826_v25, -inf }
  0xe7   : > { %744 = vmax.xlane.f32.xlu1 %v743_v50  ;;  %v2114_v50 = vrot.slane %v2113_v47, 2 }
  0xe8   : > { %766 = vmax.xlane.f32.xlu0 %v765_v61 }
  0xe9   : > { %v2115_v62 = vmax.f32 %v2113_v47, %v2114_v50 }
  0xeb   : > { %1724 = vmax.xlane.f32.xlu1 %v1723_v13  ;;  %v768_v13 = vsel %vm752_vm1, %v7610_v39, -inf  ;;  %v2109_v39 = vrot.slane %v2108_v2, 1  ;;  %v2116_v48 = vrot.slane %v2115_v62, 1  ;;  %vm2393_vm1 = vcmask 125952  }
  0xec   : > { %1740 = vmax.xlane.f32.xlu0 %v1739_v15  ;;  %v1755_v15 = vsel %vm1742_vm9, %v7826_v25, -inf  ;;  %vm1367_vm9 = vcmask 1044484  }
  0xed   : > { %v2110_v47 = vmax.f32 %v2108_v2, %v2109_v39  ;;  %v2117_v2 = vmax.f32 %v2115_v62, %v2116_v48  ;;  %v1771_v62 = vsel %vm1758_vm10, %v7826_v25, -inf  ;;  %vm1369_vm10 = vcmask 1045509  }
  0xef   : > { %1753 = vmax.xlane.f32.xlu1 %v1752_v31 }
  0xf0   : > { %1766 = vmax.xlane.f32.xlu0 %v1765_v28  ;;  %v2147_v28 = vrot.slane %v2146_v10, 2 }
  0xf1   : > { %v7865_v11 = vpop.xlane.xlu1 %610  ;;  %v7867_v49 = vpop.xlane.xlu0 %585 }
  0xf2   : > { %v2148_v50 = vmax.f32 %v2146_v10, %v2147_v28  ;;  %v2196_v28 = vrot.slane %v2117_v2, 5 }
  0xf3   : > { %1776 = vmax.xlane.f32.xlu1 %v1775_v56  ;;  %v1781_v56 = vsel %vm1774_vm11, %v7749_v32, -inf  ;;  %v2168_v32 = vmax.f32 %v2166_v44, %v2167_v40  ;;  %vm1432_vm11 = vcmask 31744  }
  0xf4   : > { %1779 = vmax.xlane.f32.xlu0 %v1778_v1  ;;  %v7905_v1 = vld [vmem:[%s7425_s26 + $0x38] sm:$0xff]  ;;  %v2149_v10 = vrot.slane %v2148_v50, 1 }
  0xf5   : > { %v7876_v61 = vpop.xlane.xlu1 %632  ;;  %v7878_v6 = vpop.xlane.xlu0 %629  ;;  %9203 = vst [vmem:[#allocation17_spill] sm:$0xff] %v7905_v1  ;;  %v2173_v46 = vsel %vm2151_vm0, %v7905_v1, -inf  ;;  %v2169_v39 = vrot.slane %v2168_v32, 2  ;;  %vm2040_vm0 = vcmask 28672  }
  0xf6   : > { %v2174_v55 = vrot.slane %v2173_v46, 4 }
  0xf7   : > { %725 = vmax.xlane.f32.xlu1 %v724_v23  ;;  %v2134_v23 = vmax.f32 %v2132_v8, %v2133_v12  ;;  %v2142_v8 = vmax.f32 %v2140_v35, %v2141_v30  ;;  %v2163_v12 = vmax.f32 %v2161_v41, %v2162_v9  ;;  %v2379_v30 = vsel %vm2364_vm12, %v7821_v60, -inf }
  0xf8   : > { %747 = vmax.xlane.f32.xlu0 %v746_v63  ;;  %v2175_v44 = vmax.f32 %v2173_v46, %v2174_v55  ;;  %v2156_v46 = vmax.f32 %v2154_v59, %v2155_v20  ;;  %v2410_v59 = vsel %vm2393_vm1, %v7892_v19, -inf  ;;  %v2394_v9 = vsel %vm2393_vm1, %v7885_v57, -inf }
  0xf9   : > { %v7896_v31 = vpop.xlane.xlu1 %613  ;;  %v7898_v33 = vpop.xlane.xlu0 %588  ;;  %v2198_v14 = vrot.slane %v2134_v23, 7  ;;  %v2200_v40 = vrot.slane %v2142_v8, 6  ;;  %v2164_v48 = vrot.slane %v2163_v12, 1  ;;  %v2386_v8 = vsel %vm2364_vm12, %v7845_v16, -inf }
  0xfa   : > { %v2157_v2 = vrot.slane %v2156_v46, 1 }
  0xfb   : > { %769 = vmax.xlane.f32.xlu1 %v768_v13  ;;  %v2193_v13 = vsel %vm519_vm2, %v2192_v51, %v2096_v22  ;;  %v2402_v22 = vsel %vm2393_vm1, %v7872_v3, -inf  ;;  %v2199_v41 = vsel %vm519_vm2, %v2198_v14, %v2126_v21  ;;  %v2365_v51 = vsel %vm2364_vm12, %v7816_v58, -inf }
  0xfc   : > { %1756 = vmax.xlane.f32.xlu0 %v1755_v15  ;;  %v2194_v15 = vrot.slane %v2110_v47, 6  ;;  %v2176_v47 = vrot.slane %v2175_v44, 2  ;;  %v2201_v55 = vsel %vm522_vm4, %v2200_v40, %v2199_v41  ;;  %v2366_v21 = vrot.slane %v2365_v51, 4 }
  0xfd   : > { %v7909_v53 = vpop.xlane.xlu0 %635  ;;  %v7911_v63 = vpop.xlane.xlu1 %654  ;;  %v2418_v14 = vsel %vm2393_vm1, %v7905_v1, -inf  ;;  %v2387_v40 = vrot.slane %v2386_v8, 4  ;;  %vm253_vm1 = vcmask 64512  }
  0xfe   : > { %v2195_v35 = vsel %vm522_vm4, %v2194_v15, %v2193_v13  ;;  %v2177_v15 = vmax.f32 %v2175_v44, %v2176_v47  ;;  %v2367_v47 = vmax.f32 %v2365_v51, %v2366_v21 }
  0xff   : > { %1769 = vmax.xlane.f32.xlu1 %v1768_v38  ;;  %v2150_v38 = vmax.f32 %v2148_v50, %v2149_v10  ;;  %v2403_v50 = vmax.f32 %v7492_v36, %v2402_v22  ;;  %v7947_v25 = vsel %vm525_vm5, %v2196_v28, %v2195_v35  ;;  %v2380_v36 = vrot.slane %v2379_v30, 4 }
 0x100   : > { %1782 = vmax.xlane.f32.xlu0 %v1781_v56  ;;  %v2372_v56 = vsel %vm2364_vm12, %v7806_v52, -inf  ;;  %v2411_v10 = vmax.f32 %v7496_v37, %v2410_v59  ;;  %v2158_v37 = vmax.f32 %v2156_v46, %v2157_v2  ;;  %v2419_v22 = vmax.f32 %v7507_v45, %v2418_v14 }
 0x101   : > { %v7916_v18 = vpop.xlane.xlu0 %657  ;;  %v2373_v23 = vrot.slane %v2372_v56, 4  ;;  %v2404_v44 = vrot.slane %v2403_v50, 4  ;;  %v2368_v51 = vrot.slane %v2367_v47, 2  ;;  %vm2333_vm12 = vcmask 26624  }
 0x102   : > { %v2420_v45 = vrot.slane %v2419_v22, 4 }
 0x103   : > { %750 = vmax.xlane.f32.xlu1 %v749_v43  ;;  %v2202_v43 = vrot.slane %v2150_v38, 5  ;;  %v2178_v38 = vrot.slane %v2177_v15, 1  ;;  %v2405_v59 = vmax.f32 %v2403_v50, %v2404_v44  ;;  %v2224_v44 = vsel %vm2223_vm3, %v7947_v25, -inf }
 0x104   : > { %v7918_v54 = vpop.xlane.xlu1 %591  ;;  %772 = vmax.xlane.f32.xlu0 %v7755_v34  ;;  %v2170_v34 = vmax.f32 %v2168_v32, %v2169_v39  ;;  %v2165_v39 = vmax.f32 %v2163_v12, %v2164_v48  ;;  %v2381_v12 = vmax.f32 %v2379_v30, %v2380_v36 }
 0x105   : > { %v7926_v24 = vpop.xlane.xlu0 %616  ;;  %v7966_v28 = vsel %vm525_vm5, %v2202_v43, %v2201_v55  ;;  %v2179_v55 = vmax.f32 %v2177_v15, %v2178_v38  ;;  %v2388_v43 = vmax.f32 %v2386_v8, %v2387_v40  ;;  %v2406_v14 = vrot.slane %v2405_v59, 2 }
 0x106   : > { %v2171_v13 = vrot.slane %v2170_v34, 1  ;;  %v2217_v46 = vsel %vm2213_vm15, %v7966_v28, -inf  ;;  %v2382_v30 = vrot.slane %v2381_v12, 2 }
 0x107   : > { %1772 = vmax.xlane.f32.xlu1 %v1771_v62  ;;  %v2374_v62 = vmax.f32 %v2372_v56, %v2373_v23  ;;  %v2412_v56 = vrot.slane %v2411_v10, 4  ;;  %v2208_v15 = vrot.slane %v2179_v55, 5  ;;  %v2389_v8 = vrot.slane %v2388_v43, 2 }
 0x108   : > { %v7937_v42 = vpop.xlane.xlu1 %638  ;;  %1785 = vmax.xlane.f32.xlu0 %v1784_v29  ;;  %v2395_v29 = vmax.f32 %v7483_v26, %v2394_v9  ;;  %v2172_v41 = vmax.f32 %v2170_v34, %v2171_v13  ;;  %v2204_v26 = vrot.slane %v2165_v39, 7  ;;  %v2383_v40 = vmax.f32 %v2381_v12, %v2382_v30 }
 0x109   : > { %v7944_v32 = vpop.xlane.xlu0 %660  ;;  %v2375_v48 = vrot.slane %v2374_v62, 2  ;;  %v2413_v2 = vmax.f32 %v2411_v10, %v2412_v56  ;;  %v2369_v56 = vmax.f32 %v2367_v47, %v2368_v51  ;;  %v2390_v12 = vmax.f32 %v2388_v43, %v2389_v8 }
 0x10a   : > { %v2396_v23 = vrot.slane %v2395_v29, 4  ;;  %v2206_v34 = vrot.slane %v2172_v41, 6  ;;  %v2205_v21 = vsel %vm519_vm2, %v2204_v26, %v2158_v37  ;;  %v6628_v26 = vld [vmem:[%s9177_s1] ss:$0 sm:$0xff]  ;;  %v2384_v55 = vrot.slane %v2383_v40, 1 }
 0x10b   : > { %775 = vmax.xlane.f32.xlu1 %v7761_v7  ;;  %v2214_v7 = vsel %vm2213_vm15, %v7947_v25, -inf  ;;  %v2376_v36 = vmax.f32 %v2374_v62, %v2375_v48  ;;  %v2414_v10 = vrot.slane %v2413_v2, 2  ;;  %v7279_v43 = vmov 0  }
 0x10c   : > { %v7958_v20 = vpop.xlane.xlu1 %679  ;;  %1788 = vmax.xlane.f32.xlu0 %v1787_v17  ;;  %v2397_v50 = vmax.f32 %v2395_v29, %v2396_v23  ;;  %v2207_v38 = vsel %vm522_vm4, %v2206_v34, %v2205_v21  ;;  %v2407_v29 = vmax.f32 %v2405_v59, %v2406_v14  ;;  %v2370_v59 = vrot.slane %v2369_v56, 1  ;;  %7169 = vset.pattern.permute.xlu1 %v7279_v43 }
 0x10d   : > { %v7961_v35 = vpop.xlane.xlu0 %682  ;;  %v2377_v37 = vrot.slane %v2376_v36, 1  ;;  %v7993_v23 = vsel %vm525_vm5, %v2208_v15, %v2207_v38  ;;  %7168 = vset.pattern.permute.xlu0 %v7279_v43 }
 0x10e   : > { %v2398_v62 = vrot.slane %v2397_v50, 2  ;;  %v2408_v30 = vrot.slane %v2407_v29, 1  ;;  %v2230_v14 = vsel %vm2223_vm3, %v7993_v23, -inf }
 0x10f   : > { %v2378_v34 = vmax.f32 %v2376_v36, %v2377_v37 }
 0x110   : > { %v7969_v17 = vpop.xlane.xlu1 %594  ;;  %2215 = vmax.xlane.f32.xlu0 %v2214_v7  ;;  %v2421_v7 = vmax.f32 %v2419_v22, %v2420_v45  ;;  %v2227_v22 = vsel %vm2223_vm3, %v7966_v28, -inf  ;;  %v2415_v45 = vmax.f32 %v2413_v2, %v2414_v10  ;;  %v2399_v51 = vmax.f32 %v2397_v50, %v2398_v62 }
 0x111   : > { %v7971_v9 = vpop.xlane.xlu0 %619  ;;  %v2385_v2 = vmax.f32 %v2383_v40, %v2384_v55  ;;  %v2371_v10 = vmax.f32 %v2369_v56, %v2370_v59  ;;  %v2434_v36 = vrot.slane %v2378_v34, 7  ;;  %v2409_v37 = vmax.f32 %v2407_v29, %v2408_v30 }
 0x112   : > { %v2416_v8 = vrot.slane %v2415_v45, 1  ;;  %v2400_v50 = vrot.slane %v2399_v51, 1  ;;  %v2237_v29 = vsel %vm2233_vm6, %v7966_v28, -inf  ;;  %vm2087_vm3 = vcmask 36864  }
 0x113   : > { %v2435_v40 = vsel %vm519_vm2, %v2434_v36, %v2371_v10 }
 0x114   : > { %v7975_v13 = vpop.xlane.xlu1 %641  ;;  %2218 = vmax.xlane.f32.xlu0 %v2217_v46  ;;  %v2422_v46 = vrot.slane %v2421_v7, 2  ;;  %v2401_v55 = vmax.f32 %v2399_v51, %v2400_v50 }
 0x115   : > { %v7978_v39 = vpop.xlane.xlu0 %663 }
 0x116   : > { %v2423_v15 = vmax.f32 %v2421_v7, %v2422_v46  ;;  %v2436_v7 = vrot.slane %v2385_v2, 6  ;;  %v2417_v46 = vmax.f32 %v2415_v45, %v2416_v8 }
 0x118   : > { %v7983_v41 = vpop.xlane.xlu1 %685  ;;  %2225 = vmax.xlane.f32.xlu0 %v2224_v44  ;;  %v2391_v44 = vrot.slane %v2390_v12, 1  ;;  %v2424_v1 = vrot.slane %v2423_v15, 1 }
 0x119   : > { %v7988_v48 = vpop.xlane.xlu0 %704 }
 0x11a   : > { %v2425_v34 = vmax.f32 %v2423_v15, %v2424_v1 }
 0x11c   : > { %783 = vbcast.lane.b32.xlu1 %v6628_v26, 256  ;;  %v7995_v47 = vpop.xlane.xlu1 %707  ;;  %2228 = vmax.xlane.f32.xlu0 %v2227_v22  ;;  %v2234_v26 = vsel %vm2233_vm6, %v7947_v25, -inf  ;;  %v2392_v22 = vmax.f32 %v2390_v12, %v2391_v44  ;;  %v2437_v25 = vsel %vm522_vm4, %v2436_v7, %v2435_v40  ;;  %v2442_v12 = vrot.slane %v2417_v46, 6 }
 0x11d   : > { %v7997_v21 = vpop.xlane.xlu0 %597  ;;  %v2240_v44 = vsel %vm2233_vm6, %v7993_v23, -inf  ;;  %v2444_v2 = vrot.slane %v2425_v34, 5  ;;  %vm2522_vm6 = vcmask 9216  }
 0x11e   : > { %v2438_v59 = vrot.slane %v2392_v22, 5 }
 0x120   : > { %v8001_v38 = vpop.xlane.xlu1 %622  ;;  %2231 = vmax.xlane.f32.xlu0 %v2230_v14  ;;  %v2440_v14 = vrot.slane %v2409_v37, 7  ;;  %v2439_v43 = vsel %vm525_vm5, %v2438_v59, %v2437_v25 }
 0x121   : > { %v8003_v62 = vpop.xlane.xlu0 %644  ;;  %v2449_v15 = vsel %vm2448_vm7, %v2439_v43, -inf }
 0x122   : > { %v2441_v45 = vsel %vm519_vm2, %v2440_v14, %v2401_v55  ;;  %v2220_v14 = vsel %vm2213_vm15, %v7993_v23, -inf  ;;  %vm2502_vm15 = vcmask 25600  }
 0x123   : > { %v2443_v28 = vsel %vm522_vm4, %v2442_v12, %v2441_v45 }
 0x124   : > { %v8007_v16 = vpop.xlane.xlu1 %666  ;;  %2235 = vmax.xlane.f32.xlu0 %v2234_v26  ;;  %v2445_v8 = vsel %vm525_vm5, %v2444_v2, %v2443_v28  ;;  %v2456_v26 = vsel %vm2455_vm8, %v2439_v43, -inf }
 0x125   : > { %v8010_v56 = vpop.xlane.xlu0 %688  ;;  %v2452_v50 = vsel %vm2448_vm7, %v2445_v8, -inf  ;;  %v2459_v46 = vsel %vm2455_vm8, %v2445_v8, -inf }
 0x128   : > { %v8015_v30 = vpop.xlane.xlu1 %710  ;;  %2238 = vmax.xlane.f32.xlu0 %v2237_v29 }
 0x129   : > { %v8020_v51 = vpop.xlane.xlu0 %729 }
 0x12c   : > { %v8024_v1 = vpop.xlane.xlu1 %732  ;;  %2241 = vmax.xlane.f32.xlu0 %v2240_v44 }
 0x12d   : > { %v8029_v36 = vpop.xlane.xlu0 %600 }
 0x130   : > { %v8027_v10 = vpop.xlane.xlu1 %625  ;;  %2450 = vmax.xlane.f32.xlu0 %v2449_v15 }
 0x131   : > { %v8033_v22 = vpop.xlane.xlu0 %647 }
 0x134   : > { %v8031_v37 = vpop.xlane.xlu1 %669  ;;  %2453 = vmax.xlane.f32.xlu0 %v2452_v50 }
 0x135   : > { %v8037_v40 = vpop.xlane.xlu0 %691 }
 0x138   : > { %v8035_v7 = vpop.xlane.xlu1 %713  ;;  %2457 = vmax.xlane.f32.xlu0 %v2456_v26 }
 0x139   : > { %v8045_v59 = vpop.xlane.xlu0 %735 }
 0x13c   : > { %v8039_v55 = vpop.xlane.xlu1 %754  ;;  %2460 = vmax.xlane.f32.xlu0 %v2459_v46 }
 0x13d   : > { %v8049_v25 = vpop.xlane.xlu0 %757 }
 0x140   : > { %2221 = vmax.xlane.f32.xlu1 %v2220_v14  ;;  %v8043_v29 = vpop.xlane.xlu1 %1712 }
 0x141   : > { %v8055_v44 = vpop.xlane.xlu0 %1715 }
 0x144   : > { %v8047_v34 = vpop.xlane.xlu1 %1728 }
 0x145   : > { %v8059_v2 = vpop.xlane.xlu0 %1731 }
 0x148   : > { %v8051_v12 = vpop.xlane.xlu1 %650 }
 0x149   : > { %v8065_v15 = vpop.xlane.xlu0 %672 }
 0x14a   : > { %9204 = vst [vmem:[#allocation18_spill] sm:$0xff] %v8065_v15 }
 0x14c   : > { %v8053_v45 = vpop.xlane.xlu1 %694 }
 0x14d   : > { %v8069_v50 = vpop.xlane.xlu0 %716 }
 0x14e   : > { %9205 = vst [vmem:[#allocation19_spill] sm:$0xff] %v8069_v50 }
 0x150   : > { %v8057_v43 = vpop.xlane.xlu1 %738 }
 0x151   : > { %v8075_v14 = vpop.xlane.xlu0 %760 }
 0x152   : > { %9208 = vst [vmem:[#allocation22_spill] sm:$0xff] %v8075_v14 }
 0x154   : > { %v8061_v23 = vpop.xlane.xlu1 %1718 }
 0x155   : > { %v8079_v60 = vpop.xlane.xlu0 %1734 }
 0x156   : > { %9210 = vst [vmem:[#allocation24_spill] sm:$0xff] %v8079_v60 }
 0x158   : > { %v8063_v28 = vpop.xlane.xlu1 %1744 }
 0x159   : > { %v8085_v57 = vpop.xlane.xlu0 %1747 }
 0x15a   : > { %9213 = vst [vmem:[#allocation27_spill] sm:$0xff] %v8085_v57 }
 0x15c   : > { %v8067_v8 = vpop.xlane.xlu1 %675 }
 0x15d   : > { %v8089_v15 = vpop.xlane.xlu0 %697 }
 0x15e   : > { %9215 = vst [vmem:[#allocation29_spill] sm:$0xff] %v8089_v15 }
 0x160   : > { %v8071_v26 = vpop.xlane.xlu1 %719 }
 0x161   : > { %9206 = vst [vmem:[#allocation20_spill] sm:$0xff] %v8071_v26 }
 0x164   : > { %v8073_v46 = vpop.xlane.xlu1 %763 }
 0x165   : > { %9207 = vst [vmem:[#allocation21_spill] sm:$0xff] %v8073_v46  ;;  %v8095_v46 = vpop.xlane.xlu0 %741 }
 0x166   : > { %9218 = vst [vmem:[#allocation32_spill] sm:$0xff] %v8095_v46 }
 0x168   : > { %v8077_v19 = vpop.xlane.xlu1 %1737 }
 0x169   : > { %9209 = vst [vmem:[#allocation23_spill] sm:$0xff] %v8077_v19  ;;  %v8099_v19 = vpop.xlane.xlu0 %1721 }
 0x16a   : > { %9220 = vst [vmem:[#allocation34_spill] sm:$0xff] %v8099_v19 }
 0x16c   : > { %v8081_v3 = vpop.xlane.xlu1 %1760 }
 0x16d   : > { %9211 = vst [vmem:[#allocation25_spill] sm:$0xff] %v8081_v3 }
 0x170   : > { %v8083_v52 = vpop.xlane.xlu1 %700 }
 0x171   : > { %9212 = vst [vmem:[#allocation26_spill] sm:$0xff] %v8083_v52  ;;  %v8105_v52 = vpop.xlane.xlu0 %1750 }
 0x174   : > { %v8087_v58 = vpop.xlane.xlu1 %744 }
 0x175   : > { %9214 = vst [vmem:[#allocation28_spill] sm:$0xff] %v8087_v58  ;;  %v8109_v58 = vpop.xlane.xlu0 %1763 }
 0x178   : > { %v8091_v50 = vpop.xlane.xlu1 %1724 }
 0x179   : > { %9216 = vst [vmem:[#allocation30_spill] sm:$0xff] %v8091_v50 }
 0x17c   : > { %v8093_v26 = vpop.xlane.xlu1 %1753 }
 0x17d   : > { %9217 = vst [vmem:[#allocation31_spill] sm:$0xff] %v8093_v26  ;;  %v8115_v26 = vpop.xlane.xlu0 %722 }
 0x17e   : > { %9225 = vst [vmem:[#allocation39_spill] sm:$0xff] %v8115_v26 }
 0x180   : > { %v8097_v14 = vpop.xlane.xlu1 %1776 }
 0x181   : > { %9219 = vst [vmem:[#allocation33_spill] sm:$0xff] %v8097_v14  ;;  %v8119_v14 = vpop.xlane.xlu0 %766 }
 0x184   : > { %v8101_v60 = vpop.xlane.xlu1 %725 }
 0x185   : > { %v8131_v26 = vpop.xlane.xlu0 %1740 }
 0x188   : > { %v8103_v3 = vpop.xlane.xlu1 %769 }
 0x189   : > { %9221 = vst [vmem:[#allocation35_spill] sm:$0xff] %v8103_v3 }
 0x18c   : > { %v8107_v57 = vpop.xlane.xlu1 %1769 }
 0x18d   : > { %9222 = vst [vmem:[#allocation36_spill] sm:$0xff] %v8107_v57 }
 0x190   : > { %v8111_v15 = vpop.xlane.xlu1 %750 }
 0x191   : > { %9223 = vst [vmem:[#allocation37_spill] sm:$0xff] %v8111_v15 }
 0x194   : > { %v8113_v50 = vpop.xlane.xlu1 %1772 }
 0x195   : > { %9224 = vst [vmem:[#allocation38_spill] sm:$0xff] %v8113_v50 }
 0x198   : > { %v8117_v46 = vpop.xlane.xlu1 %775 }
 0x199   : > { %9226 = vst [vmem:[#allocation40_spill] sm:$0xff] %v8117_v46 }
 0x19c   : > { %v8121_v19 = vpop.permute.xlu1 %783 }
 0x19d   : > { %v787_v3 = vmul.f32 %v8121_v19, %v7854_v0  ;;  %v786_v57 = vmul.f32 %v8121_v19, %v7832_v5  ;;  %v794_v15 = vmul.f32 %v8121_v19, %v7830_v4  ;;  %v797_v50 = vmul.f32 %v8121_v19, %v7896_v31  ;;  %v8137_v5 = vpop.xlane.xlu0 %1766 }
 0x19e   : > { %v795_v46 = vmul.f32 %v8121_v19, %v7852_v27  ;;  %v810_v0 = vmul.f32 %v8121_v19, %v7911_v63  ;;  %v788_v4 = vmul.f32 %v8121_v19, %v7867_v49  ;;  %v805_v27 = vmul.f32 %v8121_v19, %v7937_v42 }
 0x19f   : > { %918 = vperm.xlu1 %7169, %v787_v3   ;;  %915 = vperm.xlu0 %7168, %v786_v57   ;;  %v790_v3 = vmul.f32 %v8121_v19, %v7918_v54  ;;  %v796_v57 = vmul.f32 %v8121_v19, %v7865_v11  ;;  %v802_v63 = vmul.f32 %v8121_v19, %v7878_v6 }
 0x1a0   : > { %v818_v49 = vmul.f32 %v8121_v19, %v7958_v20  ;;  %v803_v11 = vmul.f32 %v8121_v19, %v7876_v61  ;;  %v791_v42 = vmul.f32 %v8121_v19, %v7969_v17  ;;  %v806_v6 = vmul.f32 %v8121_v19, %v7975_v13 }
 0x1a1   : > { %v8147_v31 = vpop.xlane.xlu0 %1779  ;;  %v804_v20 = vmul.f32 %v8121_v19, %v7909_v53  ;;  %v820_v61 = vmul.f32 %v8121_v19, %v7983_v41  ;;  %v827_v13 = vmul.f32 %v8121_v19, %v7995_v47  ;;  %v800_v53 = vmul.f32 %v8121_v19, %v8001_v38 }
 0x1a2   : > { %v812_v41 = vmul.f32 %v8121_v19, %v7944_v32  ;;  %v828_v38 = vmul.f32 %v8121_v19, %v8015_v30  ;;  %v835_v32 = vmul.f32 %v8121_v19, %v8024_v1  ;;  %v815_v1 = vmul.f32 %v8121_v19, %v8031_v37 }
 0x1a3   : > { %939 = vperm.xlu1 %7169, %v794_v15   ;;  %948 = vperm.xlu0 %7168, %v797_v50   ;;  %v789_v15 = vmul.f32 %v8121_v19, %v7898_v33  ;;  %v811_v33 = vmul.f32 %v8121_v19, %v7916_v18  ;;  %v814_v18 = vmul.f32 %v8121_v19, %v8007_v16 }
 0x1a4   : > { %v813_v16 = vmul.f32 %v8121_v19, %v7978_v39  ;;  %v829_v39 = vmul.f32 %v8121_v19, %v8035_v7  ;;  %v1790_v7 = vmul.f32 %v8043_v29, %v8121_v19 }
 0x1a5   : > { %v8153_v54 = vpop.xlane.xlu0 %747 }
 0x1a7   : > { %942 = vperm.xlu1 %7169, %v795_v46   ;;  %987 = vperm.xlu0 %7168, %v810_v0   ;;  %v798_v46 = vmul.f32 %v8121_v19, %v7926_v24  ;;  %v819_v24 = vmul.f32 %v8121_v19, %v7961_v35  ;;  %v801_v35 = vmul.f32 %v8121_v19, %v8027_v10 }
 0x1a8   : > { %v807_v10 = vmul.f32 %v8121_v19, %v8003_v62  ;;  %v1795_v62 = vmul.f32 %v8047_v34, %v8121_v19  ;;  %v823_v34 = vmul.f32 %v8121_v19, %v8053_v45 }
 0x1a9   : > { %v8163_v50 = vpop.xlane.xlu0 %1756 }
 0x1ab   : > { %921 = vperm.xlu1 %7169, %v788_v4   ;;  %927 = vperm.xlu0 %7168, %v790_v3   ;;  %v799_v4 = vmul.f32 %v8121_v19, %v7971_v9  ;;  %v826_v9 = vmul.f32 %v8121_v19, %v7988_v48  ;;  %v842_v48 = vmul.f32 %v8121_v19, %v8039_v55 }
 0x1ac   : > { %v793_v55 = vmul.f32 %v8121_v19, %v8029_v36  ;;  %v837_v36 = vmul.f32 %v8121_v19, %v8057_v43  ;;  %v1800_v43 = vmul.f32 %v8063_v28, %v8121_v19 }
 0x1ad   : > { %v8169_v17 = vpop.xlane.xlu0 %1782 }
 0x1af   : > { %945 = vperm.xlu1 %7169, %v796_v57   ;;  %972 = vperm.xlu0 %7168, %v805_v27   ;;  %v792_v57 = vmul.f32 %v8121_v19, %v7997_v21  ;;  %v821_v21 = vmul.f32 %v8121_v19, %v8010_v56  ;;  %v809_v56 = vmul.f32 %v8121_v19, %v8051_v12 }
 0x1b0   : > { %v836_v12 = vmul.f32 %v8121_v19, %v8045_v59  ;;  %v817_v59 = vmul.f32 %v8121_v19, %v8067_v8 }
 0x1b1   : > { %v8179_v0 = vpop.xlane.xlu0 %772 }
 0x1b3   : > { %963 = vperm.xlu1 %7169, %v802_v63   ;;  %1011 = vperm.xlu0 %7168, %v818_v49   ;;  %v834_v63 = vmul.f32 %v8121_v19, %v8020_v51  ;;  %v808_v51 = vmul.f32 %v8121_v19, %v8033_v22  ;;  %v1792_v22 = vmul.f32 %v8061_v23, %v8121_v19 }
 0x1b4   : > { %v1796_v23 = vmul.f32 %v8059_v2, %v8121_v19  ;;  %v9231_v2 = vld [vmem:[#allocation23_spill] sm:$0xff] }
 0x1b5   : > { %v8185_v47 = vpop.xlane.xlu0 %1785 }
 0x1b7   : > { %966 = vperm.xlu1 %7169, %v803_v11   ;;  %930 = vperm.xlu0 %7168, %v791_v42   ;;  %v822_v11 = vmul.f32 %v8121_v19, %v8037_v40  ;;  %v843_v40 = vmul.f32 %v8121_v19, %v8049_v25 }
 0x1b9   : > { %v8195_v3 = vpop.xlane.xlu0 %1788 }
 0x1bb   : > { %924 = vperm.xlu1 %7169, %v789_v15   ;;  %975 = vperm.xlu0 %7168, %v806_v6   ;;  %v1791_v15 = vmul.f32 %v8055_v44, %v8121_v19 }
 0x1bd   : > { %v8201_v30 = vpop.xlane.xlu0 %2215 }
 0x1bf   : > { %969 = vperm.xlu1 %7169, %v804_v20   ;;  %1017 = vperm.xlu0 %7168, %v820_v61   ;;  %v9227_v20 = vld [vmem:[#allocation20_spill] sm:$0xff]  ;;  %v9228_v61 = vld [vmem:[#allocation18_spill] sm:$0xff] }
 0x1c0   : > { %v831_v25 = vmul.f32 %v8121_v19, %v9227_v20  ;;  %v816_v44 = vmul.f32 %v8121_v19, %v9228_v61 }
 0x1c1   : > { %v8211_v27 = vpop.xlane.xlu0 %2218 }
 0x1c3   : > { %990 = vperm.xlu1 %7169, %v811_v33   ;;  %1038 = vperm.xlu0 %7168, %v827_v13   ;;  %v9229_v33 = vld [vmem:[#allocation21_spill] sm:$0xff]  ;;  %v9230_v13 = vld [vmem:[#allocation19_spill] sm:$0xff] }
 0x1c4   : > { %v845_v8 = vmul.f32 %v8121_v19, %v9229_v33  ;;  %v833_v33 = vmul.f32 %v8121_v19, %v8101_v60 }
 0x1c5   : > { %v8217_v37 = vpop.xlane.xlu0 %2225 }
 0x1c7   : > { %951 = vperm.xlu1 %7169, %v798_v46   ;;  %957 = vperm.xlu0 %7168, %v800_v53   ;;  %v830_v46 = vmul.f32 %v8121_v19, %v9230_v13  ;;  %v1798_v53 = vmul.f32 %v9231_v2, %v8121_v19  ;;  %v9244_v2 = vld [vmem:[#allocation35_spill] sm:$0xff] }
 0x1c9   : > { %v8227_v49 = vpop.xlane.xlu0 %2228 }
 0x1cb   : > { %993 = vperm.xlu1 %7169, %v812_v41   ;;  %999 = vperm.xlu0 %7168, %v814_v18   ;;  %v9232_v18 = vld [vmem:[#allocation22_spill] sm:$0xff] }
 0x1cd   : > { %v8233_v29 = vpop.xlane.xlu0 %2231 }
 0x1cf   : > { %1014 = vperm.xlu1 %7169, %v819_v24   ;;  %1041 = vperm.xlu0 %7168, %v828_v38   ;;  %v844_v24 = vmul.f32 %v8121_v19, %v9232_v18  ;;  %v9233_v38 = vld [vmem:[#allocation25_spill] sm:$0xff] }
 0x1d1   : > { %v8243_v42 = vpop.xlane.xlu0 %2235 }
 0x1d3   : > { %954 = vperm.xlu1 %7169, %v799_v4   ;;  %1062 = vperm.xlu0 %7168, %v835_v32   ;;  %v1805_v4 = vmul.f32 %v9233_v38, %v8121_v19  ;;  %v9246_v38 = vld [vmem:[#allocation36_spill] sm:$0xff] }
 0x1d5   : > { %v8249_v45 = vpop.xlane.xlu0 %2238 }
 0x1d7   : > { %996 = vperm.xlu1 %7169, %v813_v16   ;;  %960 = vperm.xlu0 %7168, %v801_v35   ;;  %v9234_v16 = vld [vmem:[#allocation24_spill] sm:$0xff] }
 0x1d8   : > { %v1797_v35 = vmul.f32 %v9234_v16, %v8121_v19 }
 0x1d9   : > { %v8259_v6 = vpop.xlane.xlu0 %2241 }
 0x1db   : > { %1035 = vperm.xlu1 %7169, %v826_v9   ;;  %1002 = vperm.xlu0 %7168, %v815_v1   ;;  %v9235_v9 = vld [vmem:[#allocation26_spill] sm:$0xff] }
 0x1dc   : > { %v825_v1 = vmul.f32 %v8121_v19, %v9235_v9  ;;  %v9247_v9 = vld [vmem:[#allocation37_spill] sm:$0xff] }
 0x1dd   : > { %v8265_v28 = vpop.xlane.xlu0 %2450 }
 0x1df   : > { %933 = vperm.xlu1 %7169, %v792_v57   ;;  %1044 = vperm.xlu0 %7168, %v829_v39   ;;  %v9236_v57 = vld [vmem:[#allocation27_spill] sm:$0xff] }
 0x1e0   : > { %v1801_v39 = vmul.f32 %v9236_v57, %v8121_v19 }
 0x1e1   : > { %v8275_v41 = vpop.xlane.xlu0 %2453 }
 0x1e3   : > { %978 = vperm.xlu1 %7169, %v807_v10   ;;  %1083 = vperm.xlu0 %7168, %v842_v48   ;;  %v9237_v10 = vld [vmem:[#allocation28_spill] sm:$0xff] }
 0x1e4   : > { %v839_v48 = vmul.f32 %v8121_v19, %v9237_v10  ;;  %v1799_v10 = vmul.f32 %v8131_v26, %v8121_v19  ;;  %v2243_v26 = vmul.f32 %v8201_v30, %v8121_v19  ;;  %v1804_v30 = vmul.f32 %v8163_v50, %v8121_v19 }
 0x1e5   : > { %v8281_v32 = vpop.xlane.xlu0 %2457  ;;  %v2251_v50 = vmul.f32 %v8259_v6, %v8121_v19 }
 0x1e7   : > { %1020 = vperm.xlu1 %7169, %v821_v21   ;;  %1841 = vperm.xlu0 %7168, %v1790_v7   ;;  %v8293_v7 = vpop.xlane.xlu1 %2221 }
 0x1e9   : > { %v8291_v21 = vpop.xlane.xlu0 %2460 }
 0x1eb   : > { %1059 = vperm.xlu1 %7169, %v834_v63   ;;  %1856 = vperm.xlu0 %7168, %v1795_v62   ;;  %v9238_v63 = vld [vmem:[#allocation29_spill] sm:$0xff] }
 0x1ec   : > { %v824_v62 = vmul.f32 %v8121_v19, %v9238_v63 }
 0x1ef   : > { %936 = vperm.xlu1 %7169, %v793_v55   ;;  %984 = vperm.xlu0 %7168, %v809_v56   ;;  %v9239_v55 = vld [vmem:[#allocation30_spill] sm:$0xff] }
 0x1f0   : > { %v1794_v56 = vmul.f32 %v9239_v55, %v8121_v19 }
 0x1f3   : > { %981 = vperm.xlu1 %7169, %v808_v51   ;;  %1026 = vperm.xlu0 %7168, %v823_v34  }
 0x1f7   : > { %1023 = vperm.xlu1 %7169, %v822_v11   ;;  %1068 = vperm.xlu0 %7168, %v837_v36   ;;  %v9240_v11 = vld [vmem:[#allocation32_spill] sm:$0xff] }
 0x1f8   : > { %v838_v36 = vmul.f32 %v8121_v19, %v9240_v11 }
 0x1fb   : > { %1065 = vperm.xlu1 %7169, %v836_v12   ;;  %1847 = vperm.xlu0 %7168, %v1792_v22   ;;  %v9241_v12 = vld [vmem:[#allocation31_spill] sm:$0xff] }
 0x1fc   : > { %v1803_v22 = vmul.f32 %v9241_v12, %v8121_v19 }
 0x1ff   : > { %1086 = vperm.xlu1 %7169, %v843_v40   ;;  %1871 = vperm.xlu0 %7168, %v1800_v43  }
 0x203   : > { %1844 = vperm.xlu1 %7169, %v1791_v15   ;;  %1008 = vperm.xlu0 %7168, %v817_v59   ;;  %v9242_v15 = vld [vmem:[#allocation34_spill] sm:$0xff] }
 0x204   : > { %v1793_v59 = vmul.f32 %v9242_v15, %v8121_v19 }
 0x207   : > { %1859 = vperm.xlu1 %7169, %v1796_v23   ;;  %1050 = vperm.xlu0 %7168, %v831_v25   ;;  %v9243_v23 = vld [vmem:[#allocation33_spill] sm:$0xff] }
 0x208   : > { %v1810_v20 = vmul.f32 %v9243_v23, %v8121_v19  ;;  %v840_v23 = vmul.f32 %v8121_v19, %v8153_v54  ;;  %v2249_v54 = vmul.f32 %v8243_v42, %v8121_v19 }
 0x20b   : > { %1005 = vperm.xlu1 %7169, %v816_v44   ;;  %1092 = vperm.xlu0 %7168, %v845_v8   ;;  %v1802_v44 = vmul.f32 %v8105_v52, %v8121_v19  ;;  %v9245_v52 = vld [vmem:[#allocation39_spill] sm:$0xff] }
 0x20c   : > { %v832_v60 = vmul.f32 %v8121_v19, %v9245_v52  ;;  %v848_v52 = vmul.f32 %v8121_v19, %v8179_v0  ;;  %v1814_v0 = vmul.f32 %v8195_v3, %v8121_v19 }
 0x20f   : > { %1047 = vperm.xlu1 %7169, %v830_v46   ;;  %1865 = vperm.xlu0 %7168, %v1798_v53   ;;  %v1806_v46 = vmul.f32 %v8109_v58, %v8121_v19  ;;  %v847_v53 = vmul.f32 %v8121_v19, %v9244_v2  ;;  %v846_v58 = vmul.f32 %v8121_v19, %v8119_v14 }
 0x210   : > { %v1807_v14 = vmul.f32 %v8137_v5, %v8121_v19  ;;  %v2246_v5 = vmul.f32 %v8217_v37, %v8121_v19  ;;  %v1812_v37 = vmul.f32 %v8169_v17, %v8121_v19  ;;  %v2463_v17 = vmul.f32 %v8275_v41, %v8121_v19 }
 0x213   : > { %1089 = vperm.xlu1 %7169, %v844_v24   ;;  %1886 = vperm.xlu0 %7168, %v1805_v4   ;;  %v1808_v4 = vmul.f32 %v9246_v38, %v8121_v19 }
 0x217   : > { %1862 = vperm.xlu1 %7169, %v1797_v35   ;;  %1032 = vperm.xlu0 %7168, %v825_v1   ;;  %v841_v1 = vmul.f32 %v8121_v19, %v9247_v9 }
 0x21b   : > { %1874 = vperm.xlu1 %7169, %v1801_v39   ;;  %1074 = vperm.xlu0 %7168, %v839_v48   ;;  %v9248_v48 = vld [vmem:[#allocation38_spill] sm:$0xff] }
 0x21c   : > { %v1809_v63 = vmul.f32 %v9248_v48, %v8121_v19 }
 0x21e   : > { %v8299_v51 = vpop.permute.xlu1 %918  ;;  %v8301_v34 = vpop.permute.xlu0 %915 }
 0x21f   : > { %1029 = vperm.xlu1 %7169, %v824_v62   ;;  %1853 = vperm.xlu0 %7168, %v1794_v56   ;;  %v9249_v56 = vld [vmem:[#allocation40_spill] sm:$0xff] }
 0x220   : > { %v849_v11 = vmul.f32 %v8121_v19, %v9249_v56  ;;  %v2244_v56 = vmul.f32 %v8211_v27, %v8121_v19  ;;  %v2248_v27 = vmul.f32 %v8233_v29, %v8121_v19 }
 0x222   : > { %v8307_v40 = vpop.permute.xlu1 %939  ;;  %v8309_v43 = vpop.permute.xlu0 %948 }
 0x223   : > { %1071 = vperm.xlu1 %7169, %v838_v36   ;;  %1880 = vperm.xlu0 %7168, %v1803_v22   ;;  %v1811_v22 = vmul.f32 %v8147_v31, %v8121_v19  ;;  %v2245_v31 = vmul.f32 %v8293_v7, %v8121_v19  ;;  %v1106_v7 = vlaneseq }
 0x225   : > { %v1107_v42 = vand.u32 127, %v1106_v7 }
 0x226   : > { %v8315_v25 = vpop.permute.xlu1 %942  ;;  %v8317_v61 = vpop.permute.xlu0 %987 }
 0x227   : > { %1850 = vperm.xlu1 %7169, %v1793_v59   ;;  %1901 = vperm.xlu0 %7168, %v1810_v20  }
 0x22a   : > { %v8323_v8 = vpop.permute.xlu1 %921  ;;  %v8325_v13 = vpop.permute.xlu0 %927 }
 0x22b   : > { %1877 = vperm.xlu1 %7169, %v1802_v44   ;;  %1056 = vperm.xlu0 %7168, %v833_v33  }
 0x22e   : > { %v8331_v18 = vpop.permute.xlu1 %945  ;;  %v8333_v24 = vpop.permute.xlu0 %972 }
 0x22f   : > { %1889 = vperm.xlu1 %7169, %v1806_v46   ;;  %1098 = vperm.xlu0 %7168, %v847_v53  }
 0x232   : > { %v8339_v16 = vpop.permute.xlu1 %963  ;;  %v8341_v35 = vpop.permute.xlu0 %1011 }
 0x233   : > { %1053 = vperm.xlu1 %7169, %v832_v60   ;;  %1895 = vperm.xlu0 %7168, %v1808_v4   ;;  %v1109_v4 = vshrl.u32 %v1106_v7, 7 }
 0x236   : > { %v8347_v57 = vpop.permute.xlu1 %966  ;;  %v8349_v39 = vpop.permute.xlu0 %930 }
 0x237   : > { %1095 = vperm.xlu1 %7169, %v846_v58   ;;  %1080 = vperm.xlu0 %7168, %v841_v1   ;;  %v1813_v58 = vmul.f32 %v8185_v47, %v8121_v19  ;;  %v2465_v1 = vmul.f32 %v8291_v21, %v8121_v19 }
 0x23a   : > { %v8355_v62 = vpop.permute.xlu1 %924  ;;  %v8357_v55 = vpop.permute.xlu0 %975 }
 0x23b   : > { %1868 = vperm.xlu1 %7169, %v1799_v10   ;;  %1898 = vperm.xlu0 %7168, %v1809_v63   ;;  %v8413_v10 = vsub.s32 %v1107_v42, %v1109_v4 }
 0x23d   : > { %v1179_v29 = vrot.slane %v8347_v57, %v8413_v10 }
 0x23e   : > { %v8363_v36 = vpop.permute.xlu1 %969  ;;  %v8365_v12 = vpop.permute.xlu0 %1017 }
 0x23f   : > { %1892 = vperm.xlu1 %7169, %v1807_v14   ;;  %1104 = vperm.xlu0 %7168, %v849_v11  }
 0x242   : > { %v8371_v15 = vpop.permute.xlu1 %990  ;;  %v1039_v59 = vpop.permute.xlu0 %1038 }
 0x243   : > { %1904 = vperm.xlu1 %7169, %v1811_v22   ;;  %2262 = vperm.xlu0 %7168, %v2243_v26   ;;  %v1275_v63 = vrot.slane %v1039_v59, %v8413_v10  ;;  %v2247_v59 = vmul.f32 %v8227_v49, %v8121_v19  ;;  %v2250_v49 = vmul.f32 %v8249_v45, %v8121_v19 }
 0x246   : > { %v8377_v20 = vpop.permute.xlu1 %951  ;;  %v8379_v44 = vpop.permute.xlu0 %957 }
 0x247   : > { %1077 = vperm.xlu1 %7169, %v840_v23   ;;  %2271 = vperm.xlu0 %7168, %v2246_v5   ;;  %v1159_v4 = vrot.slane %v8377_v20, %v8413_v10 }
 0x24a   : > { %v8385_v33 = vpop.permute.xlu1 %993  ;;  %v8387_v46 = vpop.permute.xlu0 %999 }
 0x24b   : > { %1883 = vperm.xlu1 %7169, %v1804_v30   ;;  %2268 = vperm.xlu0 %7168, %v2245_v31  }
 0x24e   : > { %v8393_v2 = vpop.permute.xlu1 %1014  ;;  %v1042_v53 = vpop.permute.xlu0 %1041 }
 0x24f   : > { %1907 = vperm.xlu1 %7169, %v1812_v37   ;;  %2280 = vperm.xlu0 %7168, %v2249_v54   ;;  %v1279_v14 = vrot.slane %v1042_v53, %v8413_v10  ;;  %v1147_v37 = vrot.slane %v8315_v25, %v8413_v10  ;;  %v1151_v53 = vrot.slane %v8331_v18, %v8413_v10 }
 0x250   : > { %v1175_v18 = vrot.slane %v8339_v16, %v8413_v10 }
 0x252   : > { %v8399_v60 = vpop.permute.xlu1 %954  ;;  %v1063_v38 = vpop.permute.xlu0 %1062 }
 0x253   : > { %1101 = vperm.xlu1 %7169, %v848_v52   ;;  %2286 = vperm.xlu0 %7168, %v2251_v50   ;;  %v1143_v50 = vrot.slane %v8307_v40, %v8413_v10  ;;  %v1307_v25 = vrot.slane %v1063_v38, %v8413_v10  ;;  %v2462_v40 = vmul.f32 %v8265_v28, %v8121_v19 }
 0x254   : > { %v1155_v38 = vrot.slane %v8309_v43, %v8413_v10  ;;  %v2464_v43 = vmul.f32 %v8281_v32, %v8121_v19  ;;  %v1167_v19 = vrot.slane %v8379_v44, %v8413_v10 }
 0x255   : > { %v1375_v45 = vsel %vm519_vm2, %v1147_v37, %v1143_v50 }
 0x256   : > { %v8405_v9 = vpop.permute.xlu1 %996  ;;  %v8407_v6 = vpop.permute.xlu0 %960  ;;  %v1376_v57 = vsel %vm522_vm4, %v1151_v53, %v1375_v45 }
 0x257   : > { %1910 = vperm.xlu1 %7169, %v1813_v58   ;;  %2474 = vperm.xlu0 %7168, %v2463_v17   ;;  %v1183_v17 = vrot.slane %v8363_v36, %v8413_v10  ;;  %v1382_v58 = vsel %vm519_vm2, %v1179_v29, %v1175_v18  ;;  %v1377_v20 = vsel %vm525_vm5, %v1155_v38, %v1376_v57 }
 0x259   : > { %v1383_v28 = vsel %vm522_vm4, %v1183_v17, %v1382_v58  ;;  %v1115_v58 = vrot.slane %v8299_v51, %v8413_v10 }
 0x25a   : > { %v1036_v41 = vpop.permute.xlu1 %1035  ;;  %v8415_v48 = vpop.permute.xlu0 %1002 }
 0x25b   : > { %v1271_v47 = vrot.slane %v1036_v41, %v8413_v10  ;;  %1913 = vperm.xlu1 %7169, %v1814_v0   ;;  %2480 = vperm.xlu0 %7168, %v2465_v1   ;;  %v1163_v0 = vrot.slane %v8399_v60, %v8413_v10  ;;  %v1187_v41 = vrot.slane %v8333_v24, %v8413_v10 }
 0x25d   : > { %v1403_v3 = vsel %vm519_vm2, %v1275_v63, %v1271_v47  ;;  %v1378_v63 = vsel %vm1367_vm9, %v1159_v4, %v1377_v20  ;;  %v1384_v60 = vsel %vm525_vm5, %v1187_v41, %v1383_v28  ;;  %v1123_v41 = vrot.slane %v8355_v62, %v8413_v10 }
 0x25e   : > { %v8423_v11 = vpop.permute.xlu1 %933  ;;  %v1404_v21 = vsel %vm522_vm4, %v1279_v14, %v1403_v3  ;;  %v1045_v26 = vpop.permute.xlu0 %1044  ;;  %v1379_v47 = vsel %vm1369_vm10, %v1163_v0, %v1378_v63  ;;  %v1171_v14 = vrot.slane %v8407_v6, %v8413_v10  ;;  %v1111_v0 = vrot.slane %v8301_v34, %v8413_v10 }
 0x25f   : > { %v1283_v22 = vrot.slane %v1045_v26, %v8413_v10  ;;  %2265 = vperm.xlu1 %7169, %v2244_v56   ;;  %v1215_v34 = vrot.slane %v8385_v33, %v8413_v10  ;;  %v1219_v62 = vrot.slane %v8405_v9, %v8413_v10 }
 0x260   : > { %v1364_v20 = vsel %vm519_vm2, %v1115_v58, %v1111_v0 }
 0x261   : > { %v8430_v5 = vsel %vm525_vm5, %v1283_v22, %v1404_v21  ;;  %v1191_v21 = vrot.slane %v8357_v55, %v8413_v10  ;;  %v1380_v22 = vsel %vm1371_vm13, %v1167_v19, %v1379_v47  ;;  %v1131_v19 = vrot.slane %v8349_v39, %v8413_v10 }
 0x262   : > { %v979_v23 = vpop.permute.xlu1 %978  ;;  %v8432_v31 = vpop.permute.xlu0 %1083 }
 0x263   : > { %2274 = vperm.xlu1 %7169, %v2247_v59   ;;  %v1195_v56 = vrot.slane %v979_v23, %v8413_v10  ;;  %v1385_v26 = vsel %vm1367_vm9, %v1191_v21, %v1384_v60 }
 0x265   : > { %v1386_v6 = vsel %vm1369_vm10, %v1195_v56, %v1385_v26  ;;  %v1223_v26 = vrot.slane %v8387_v46, %v8413_v10 }
 0x266   : > { %v8436_v30 = vpop.permute.xlu1 %1020  ;;  %v8438_v54 = vpop.permute.xlu0 %1841 }
 0x267   : > { %2277 = vperm.xlu1 %7169, %v2248_v27   ;;  %v1381_v27 = vsel %vm1373_vm14, %v1171_v14, %v1380_v22  ;;  %v1127_v14 = vrot.slane %v8325_v13, %v8413_v10  ;;  %v1227_v13 = vrot.slane %v8415_v48, %v8413_v10 }
 0x268   : > { %v1436_v37 = vsel %vm1432_vm11, %v1381_v27, 0.0 }
 0x26a   : > { %v1060_v7 = vpop.permute.xlu1 %1059  ;;  %v8450_v52 = vpop.permute.xlu0 %1856 }
 0x26b   : > { %v1303_v42 = vrot.slane %v1060_v7, %v8413_v10  ;;  %2283 = vperm.xlu1 %7169, %v2250_v49  }
 0x26d   : > { %v1410_v36 = vsel %vm519_vm2, %v1307_v25, %v1303_v42 }
 0x26e   : > { %v8470_v1 = vpop.permute.xlu1 %936  ;;  %v985_v16 = vpop.permute.xlu0 %984 }
 0x26f   : > { %2471 = vperm.xlu1 %7169, %v2462_v40   ;;  %v1203_v44 = vrot.slane %v985_v16, %v8413_v10  ;;  %v1335_v40 = vrot.slane %v8432_v31, %v8413_v10  ;;  %v1119_v16 = vrot.slane %v8323_v8, %v8413_v10  ;;  %v1207_v8 = vrot.slane %v8317_v61, %v8413_v10 }
 0x271   : > { %v1365_v51 = vsel %vm522_vm4, %v1119_v16, %v1364_v20 }
 0x272   : > { %v982_v24 = vpop.permute.xlu1 %981  ;;  %v8484_v3 = vpop.permute.xlu0 %1026  ;;  %v1366_v47 = vsel %vm525_vm5, %v1123_v41, %v1365_v51 }
 0x273   : > { %v1199_v32 = vrot.slane %v982_v24, %v8413_v10  ;;  %2477 = vperm.xlu1 %7169, %v2464_v43   ;;  %v1211_v43 = vrot.slane %v8371_v15, %v8413_v10  ;;  %v1368_v56 = vsel %vm1367_vm9, %v1127_v14, %v1366_v47  ;;  %v1135_v24 = vrot.slane %v8423_v11, %v8413_v10 }
 0x274   : > { %v1370_v22 = vsel %vm1369_vm10, %v1131_v19, %v1368_v56 }
 0x275   : > { %v1387_v55 = vsel %vm1371_vm13, %v1199_v32, %v1386_v6  ;;  %v1389_v15 = vsel %vm519_vm2, %v1211_v43, %v1207_v8  ;;  %v1139_v32 = vrot.slane %v8470_v1, %v8413_v10  ;;  %v1372_v27 = vsel %vm1371_vm13, %v1135_v24, %v1370_v22 }
 0x276   : > { %v8494_v59 = vpop.permute.xlu1 %1023  ;;  %v1069_v23 = vpop.permute.xlu0 %1068  ;;  %v1388_v50 = vsel %vm1373_vm14, %v1203_v44, %v1387_v55  ;;  %v1390_v33 = vsel %vm522_vm4, %v1215_v34, %v1389_v15  ;;  %v1243_v1 = vrot.slane %v8393_v2, %v8413_v10  ;;  %v1251_v2 = vrot.slane %v8436_v30, %v8413_v10 }
 0x277   : > { %v1315_v7 = vrot.slane %v1069_v23, %v8413_v10  ;;  %v1439_v25 = vsel %vm1432_vm11, %v1388_v50, 0.0  ;;  %v1391_v9 = vsel %vm525_vm5, %v1219_v62, %v1390_v33  ;;  %v1374_v55 = vsel %vm1373_vm14, %v1139_v32, %v1372_v27 }
 0x278   : > { %v1392_v6 = vsel %vm1367_vm9, %v1223_v26, %v1391_v9  ;;  %v1259_v30 = vrot.slane %v8484_v3, %v8413_v10  ;;  %v1918_v3 = vrot.slane %v8438_v54, %v8413_v10 }
 0x279   : > { %v1393_v48 = vsel %vm1369_vm10, %v1227_v13, %v1392_v6 }
 0x27a   : > { %v1066_v49 = vpop.permute.xlu1 %1065  ;;  %1437 = vadd.xlane.f32.xlu0 %v1436_v37  ;;  %v8500_v53 = vpop.permute.xlu0 %1847  ;;  %v1239_v37 = vrot.slane %v8341_v35, %v8413_v10 }
 0x27b   : > { %v1311_v29 = vrot.slane %v1066_v49, %v8413_v10  ;;  %v1926_v14 = vrot.slane %v8500_v53, %v8413_v10 }
 0x27d   : > { %v1411_v17 = vsel %vm522_vm4, %v1311_v29, %v1410_v36  ;;  %v1433_v29 = vsel %vm1432_vm11, %v1374_v55, 0.0 }
 0x27e   : > { %v1087_v42 = vpop.permute.xlu1 %1086  ;;  %1440 = vadd.xlane.f32.xlu0 %v1439_v25  ;;  %v8507_v45 = vpop.permute.xlu0 %1871  ;;  %v8510_v18 = vsel %vm525_vm5, %v1315_v7, %v1411_v17  ;;  %v1396_v17 = vsel %vm519_vm2, %v1243_v1, %v1239_v37  ;;  %v1247_v25 = vrot.slane %v8365_v12, %v8413_v10 }
 0x27f   : > { %v1339_v57 = vrot.slane %v1087_v42, %v8413_v10  ;;  %v1255_v42 = vrot.slane %v8494_v59, %v8413_v10 }
 0x281   : > { %v8516_v4 = vsel %vm519_vm2, %v1339_v57, %v1335_v40 }
 0x282   : > { %v8518_v38 = vpop.permute.xlu1 %1844  ;;  %v1009_v36 = vpop.permute.xlu0 %1008 }
 0x283   : > { %v1235_v44 = vrot.slane %v1009_v36, %v8413_v10  ;;  %v1397_v36 = vsel %vm522_vm4, %v1247_v25, %v1396_v17  ;;  %v1922_v43 = vrot.slane %v8518_v38, %v8413_v10 }
 0x284   : > { %v1398_v58 = vsel %vm525_vm5, %v1251_v2, %v1397_v36 }
 0x285   : > { %v1399_v0 = vsel %vm1367_vm9, %v1255_v42, %v1398_v58  ;;  %v2015_v62 = vsel %vm519_vm2, %v1922_v43, %v1918_v3 }
 0x286   : > { %v8526_v28 = vpop.permute.xlu1 %1859  ;;  %v8528_v31 = vpop.permute.xlu0 %1050  ;;  %v1400_v20 = vsel %vm1369_vm10, %v1259_v30, %v1399_v0  ;;  %v2016_v24 = vsel %vm522_vm4, %v1926_v14, %v2015_v62 }
 0x287   : > { %v1291_v6 = vrot.slane %v8528_v31, %v8413_v10  ;;  %v1942_v55 = vrot.slane %v8526_v28, %v8413_v10 }
 0x28a   : > { %v1006_v63 = vpop.permute.xlu1 %1005  ;;  %v8538_v60 = vpop.permute.xlu0 %1092 }
 0x28b   : > { %v1231_v11 = vrot.slane %v1006_v63, %v8413_v10 }
 0x28d   : > { %v1394_v46 = vsel %vm1371_vm13, %v1231_v11, %v1393_v48 }
 0x28e   : > { %v8552_v21 = vpop.permute.xlu1 %1047  ;;  %v8554_v61 = vpop.permute.xlu0 %1865  ;;  %v1395_v7 = vsel %vm1373_vm14, %v1235_v44, %v1394_v46 }
 0x28f   : > { %v1442_v57 = vsel %vm1432_vm11, %v1395_v7, 0.0  ;;  %v1287_v53 = vrot.slane %v8552_v21, %v8413_v10  ;;  %v1950_v17 = vrot.slane %v8554_v61, %v8413_v10 }
 0x291   : > { %v1406_v22 = vsel %vm1367_vm9, %v1287_v53, %v8430_v5  ;;  %v1938_v5 = vrot.slane %v8450_v52, %v8413_v10 }
 0x292   : > { %v8568_v23 = vpop.permute.xlu1 %1089  ;;  %v8570_v39 = vpop.permute.xlu0 %1886  ;;  %v1407_v21 = vsel %vm1369_vm10, %v1291_v6, %v1406_v22  ;;  %v1347_v22 = vrot.slane %v8538_v60, %v8413_v10 }
 0x293   : > { %v2019_v28 = vsel %vm519_vm2, %v1942_v55, %v1938_v5  ;;  %v1978_v43 = vrot.slane %v8570_v39, %v8413_v10 }
 0x296   : > { %v8581_v49 = vpop.permute.xlu1 %1862  ;;  %v1033_v50 = vpop.permute.xlu0 %1032 }
 0x297   : > { %1434 = vadd.xlane.f32.xlu1 %v1433_v29  ;;  %v1267_v41 = vrot.slane %v1033_v50, %v8413_v10  ;;  %v1946_v44 = vrot.slane %v8581_v49, %v8413_v10 }
 0x299   : > { %v2020_v7 = vsel %vm522_vm4, %v1946_v44, %v2019_v28 }
 0x29a   : > { %v8592_v35 = vpop.permute.xlu1 %1874  ;;  %v8594_v40 = vpop.permute.xlu0 %1074  ;;  %v2021_v42 = vsel %vm525_vm5, %v1950_v17, %v2020_v7 }
 0x29b   : > { %1443 = vadd.xlane.f32.xlu1 %v1442_v57 }
 0x29e   : > { %v1030_v12 = vpop.permute.xlu1 %1029  ;;  %v1854_v16 = vpop.permute.xlu0 %1853 }
 0x29f   : > { %v1263_v59 = vrot.slane %v1030_v12, %v8413_v10  ;;  %v1934_v33 = vrot.slane %v1854_v16, %v8413_v10  ;;  %v1962_v12 = vrot.slane %v8592_v35, %v8413_v10 }
 0x2a1   : > { %v1401_v51 = vsel %vm1371_vm13, %v1263_v59, %v1400_v20  ;;  %v1958_v20 = vrot.slane %v8507_v45, %v8413_v10  ;;  %v1343_v45 = vrot.slane %v8568_v23, %v8413_v10 }
 0x2a2   : > { %v1072_v34 = vpop.permute.xlu1 %1071  ;;  %v8608_v63 = vpop.permute.xlu0 %1880  ;;  %v1402_v8 = vsel %vm1373_vm14, %v1267_v41, %v1401_v51  ;;  %v1323_v51 = vrot.slane %v8594_v40, %v8413_v10 }
 0x2a3   : > { %v1445_v47 = vsel %vm1432_vm11, %v1402_v8, 0.0  ;;  %v1319_v0 = vrot.slane %v1072_v34, %v8413_v10  ;;  %v2023_v3 = vsel %vm519_vm2, %v1962_v12, %v1958_v20 }
 0x2a4   : > { %1446 = vadd.xlane.f32.xlu0 %v1445_v47 }
 0x2a5   : > { %v1413_v16 = vsel %vm1367_vm9, %v1319_v0, %v8510_v18 }
 0x2a6   : > { %v1851_v15 = vpop.permute.xlu1 %1850  ;;  %v8617_v38 = vpop.permute.xlu0 %1901  ;;  %v1414_v62 = vsel %vm1369_vm10, %v1323_v51, %v1413_v16 }
 0x2a7   : > { %v1930_v56 = vrot.slane %v1851_v15, %v8413_v10  ;;  %v1970_v15 = vrot.slane %v8608_v63, %v8413_v10  ;;  %v1998_v17 = vrot.slane %v8617_v38, %v8413_v10 }
 0x2a9   : > { %v2017_v54 = vsel %vm525_vm5, %v1930_v56, %v2016_v24 }
 0x2aa   : > { %v1878_v19 = vpop.permute.xlu1 %1877  ;;  %v1057_v9 = vpop.permute.xlu0 %1056  ;;  %v2018_v13 = vsel %vm1367_vm9, %v1934_v33, %v2017_v54 }
 0x2ab   : > { %v2041_v32 = vsel %vm2040_vm0, %v2018_v13, 0.0  ;;  %v1299_v1 = vrot.slane %v1057_v9, %v8413_v10  ;;  %v1966_v59 = vrot.slane %v1878_v19, %v8413_v10 }
 0x2ac   : > { %2042 = vadd.xlane.f32.xlu1 %v2041_v32  ;;  %v1418_v32 = vsel %vm522_vm4, %v1343_v45, %v8516_v4 }
 0x2ad   : > { %v2024_v39 = vsel %vm522_vm4, %v1966_v59, %v2023_v3  ;;  %v1419_v55 = vsel %vm525_vm5, %v1347_v22, %v1418_v32 }
 0x2ae   : > { %v1890_v26 = vpop.permute.xlu1 %1889  ;;  %v8627_v11 = vpop.permute.xlu0 %1098  ;;  %v2025_v23 = vsel %vm525_vm5, %v1970_v15, %v2024_v39 }
 0x2af   : > { %v1982_v61 = vrot.slane %v1890_v26, %v8413_v10  ;;  %v1355_v4 = vrot.slane %v8627_v11, %v8413_v10 }
 0x2b1   : > { %v2027_v18 = vsel %vm519_vm2, %v1982_v61, %v1978_v43 }
 0x2b2   : > { %v1054_v27 = vpop.permute.xlu1 %1053  ;;  %v1896_v46 = vpop.permute.xlu0 %1895 }
 0x2b3   : > { %v1295_v48 = vrot.slane %v1054_v27, %v8413_v10  ;;  %v1990_v56 = vrot.slane %v1896_v46, %v8413_v10 }
 0x2b5   : > { %v1408_v37 = vsel %vm1371_vm13, %v1295_v48, %v1407_v21 }
 0x2b6   : > { %v1096_v31 = vpop.permute.xlu1 %1095  ;;  %v1409_v50 = vsel %vm1373_vm14, %v1299_v1, %v1408_v37  ;;  %v1081_v2 = vpop.permute.xlu0 %1080 }
 0x2b7   : > { %v1448_v29 = vsel %vm1432_vm11, %v1409_v50, 0.0  ;;  %v1331_v47 = vrot.slane %v1081_v2, %v8413_v10  ;;  %v1351_v63 = vrot.slane %v1096_v31, %v8413_v10 }
 0x2b8   : > { %1449 = vadd.xlane.f32.xlu1 %v1448_v29 }
 0x2b9   : > { %v1420_v1 = vsel %vm1367_vm9, %v1351_v63, %v1419_v55 }
 0x2ba   : > { %v1869_v49 = vpop.permute.xlu1 %1868  ;;  %v1899_v58 = vpop.permute.xlu0 %1898  ;;  %v1421_v5 = vsel %vm1369_vm10, %v1355_v4, %v1420_v1 }
 0x2bb   : > { %v1954_v25 = vrot.slane %v1869_v49, %v8413_v10  ;;  %v1994_v53 = vrot.slane %v1899_v58, %v8413_v10 }
 0x2bd   : > { %v2022_v52 = vsel %vm1367_vm9, %v1954_v25, %v2021_v42 }
 0x2be   : > { %v1893_v57 = vpop.permute.xlu1 %1892  ;;  %v2044_v36 = vsel %vm2040_vm0, %v2022_v52, 0.0  ;;  %v1105_v34 = vpop.permute.xlu0 %1104 }
 0x2bf   : > { %2045 = vadd.xlane.f32.xlu0 %v2044_v36  ;;  %v1986_v41 = vrot.slane %v1893_v57, %v8413_v10  ;;  %v1363_v60 = vrot.slane %v1105_v34, %v8413_v10 }
 0x2c1   : > { %v2028_v14 = vsel %vm522_vm4, %v1986_v41, %v2027_v18 }
 0x2c2   : > { %v1905_v30 = vpop.permute.xlu1 %1904  ;;  %v2263_v9 = vpop.permute.xlu0 %2262  ;;  %v2029_v13 = vsel %vm525_vm5, %v1990_v56, %v2028_v14 }
 0x2c3   : > { %v2030_v48 = vsel %vm1367_vm9, %v1994_v53, %v2029_v13  ;;  %v2002_v50 = vrot.slane %v1905_v30, %v8413_v10  ;;  %v2291_v38 = vrot.slane %v2263_v9, %v8413_v10 }
 0x2c4   : > { %v2050_v44 = vsel %vm2040_vm0, %v2030_v48, 0.0 }
 0x2c5   : > { %v2031_v25 = vsel %vm519_vm2, %v2002_v50, %v1998_v17 }
 0x2c6   : > { %v1078_v35 = vpop.permute.xlu1 %1077  ;;  %v2272_v46 = vpop.permute.xlu0 %2271 }
 0x2c7   : > { %v1327_v8 = vrot.slane %v1078_v35, %v8413_v10  ;;  %v7280_v35 = vmov 0.0  }
 0x2c8   : > { %254 = vst.msk [vmem:[#allocation2] sm:$0xff] %vm253_vm1, %v7280_v35  ;;  %255 = vst.msk [vmem:[#allocation2 + $0x8] sm:$0xff] %vm253_vm1, %v7280_v35 }
 0x2c9   : > { %v1415_v40 = vsel %vm1371_vm13, %v1327_v8, %v1414_v62  ;;  %256 = vst.msk [vmem:[#allocation2 + $0x10] sm:$0xff] %vm253_vm1, %v7280_v35  ;;  %257 = vst.msk [vmem:[#allocation2 + $0x18] sm:$0xff] %vm253_vm1, %v7280_v35  ;;  %v2303_v8 = vrot.slane %v2272_v46, %v8413_v10 }
 0x2ca   : > { %v1884_v33 = vpop.permute.xlu1 %1883  ;;  %v1416_v24 = vsel %vm1373_vm14, %v1331_v47, %v1415_v40  ;;  %v2269_v2 = vpop.permute.xlu0 %2268 }
 0x2cb   : > { %v1974_v54 = vrot.slane %v1884_v33, %v8413_v10  ;;  %v1451_v19 = vsel %vm1432_vm11, %v1416_v24, 0.0  ;;  %v2299_v16 = vrot.slane %v2269_v2, %v8413_v10 }
 0x2cc   : > { %1452 = vadd.xlane.f32.xlu1 %v1451_v19 }
 0x2cd   : > { %v2026_v26 = vsel %vm1367_vm9, %v1974_v54, %v2025_v23 }
 0x2ce   : > { %v1908_v6 = vpop.permute.xlu1 %1907  ;;  %v2047_v27 = vsel %vm2040_vm0, %v2026_v26, 0.0  ;;  %v2281_v0 = vpop.permute.xlu0 %2280 }
 0x2cf   : > { %2048 = vadd.xlane.f32.xlu0 %v2047_v27  ;;  %v2006_v11 = vrot.slane %v1908_v6, %v8413_v10  ;;  %v2315_v40 = vrot.slane %v2281_v0, %v8413_v10  ;;  %v2524_v27 = vld [vmem:[%s9179_s3] sm:$0xff] }
 0x2d0   : > { %v2537_v55 = vsel %vm253_vm1, %v2524_v27, 0 }
 0x2d1   : > { %v2032_v52 = vsel %vm522_vm4, %v2006_v11, %v2031_v25  ;;  %v8748_v1 = vand.u32 4294901760, %v2537_v55 }
 0x2d2   : > { %v1102_v21 = vpop.permute.xlu1 %1101  ;;  %v2287_v51 = vpop.permute.xlu0 %2286 }
 0x2d3   : > { %v1359_v37 = vrot.slane %v1102_v21, %v8413_v10  ;;  %2051 = vadd.xlane.f32.xlu0 %v2050_v44  ;;  %v2323_v56 = vrot.slane %v2287_v51, %v8413_v10  ;;  %v8751_v4 = vsub.f32 %v2537_v55, %v8748_v1 }
 0x2d5   : > { %v1422_v31 = vsel %vm1371_vm13, %v1359_v37, %v1421_v5  ;;  %v2613_v46 = vand.u32 4294901760, %v8751_v4  ;;  %v2526_v37 = vld [vmem:[%s9179_s3 + $0x10] sm:$0xff] }
 0x2d6   : > { %v1911_v29 = vpop.permute.xlu1 %1910  ;;  %v1423_v28 = vsel %vm1373_vm14, %v1363_v60, %v1422_v31  ;;  %v2475_v45 = vpop.permute.xlu0 %2474  ;;  %v3035_v60 = vsel %vm253_vm1, %v2526_v37, 0 }
 0x2d7   : > { %v1454_v7 = vsel %vm1432_vm11, %v1423_v28, 0.0  ;;  %v2010_v49 = vrot.slane %v1911_v29, %v8413_v10  ;;  %v2489_v19 = vrot.slane %v2475_v45, %v8413_v10  ;;  %v2614_v21 = vsub.f32 %v8751_v4, %v2613_v46 }
 0x2d8   : > { %1455 = vadd.xlane.f32.xlu1 %v1454_v7  ;;  %v8761_v5 = vand.u32 4294901760, %v3035_v60 }
 0x2d9   : > { %v2033_v36 = vsel %vm525_vm5, %v2010_v49, %v2032_v52  ;;  %v2615_v44 = vand.u32 4294901760, %v2614_v21 }
 0x2da   : > { %v1914_v42 = vpop.permute.xlu1 %1913  ;;  %v2481_v13 = vpop.permute.xlu0 %2480  ;;  %v8764_v31 = vsub.f32 %v3035_v60, %v8761_v5 }
 0x2db   : > { %v2014_v57 = vrot.slane %v1914_v42, %v8413_v10  ;;  %v2497_v26 = vrot.slane %v2481_v13, %v8413_v10  ;;  %6790 = vmatprep.mubr.f32.mxu0 %v2615_v44 }
 0x2dc   : > { %v3111_v50 = vand.u32 4294901760, %v8764_v31 }
 0x2dd   : > { %v2034_v58 = vsel %vm1367_vm9, %v2014_v57, %v2033_v36 }
 0x2de   : > { %v2266_v30 = vpop.permute.xlu1 %2265  ;;  %v2053_v12 = vsel %vm2040_vm0, %v2034_v58, 0.0  ;;  %v3112_v29 = vsub.f32 %v8764_v31, %v3111_v50  ;;  %v2525_v58 = vld [vmem:[%s9179_s3 + $0x8] sm:$0xff] }
 0x2df   : > { %v2295_v61 = vrot.slane %v2266_v30, %v8413_v10  ;;  %2054 = vadd.xlane.f32.xlu0 %v2053_v12 }
 0x2e0   : > { %v3113_v28 = vand.u32 4294901760, %v3112_v29 }
 0x2e1   : > { %v2324_v59 = vsel %vm519_vm2, %v2295_v61, %v2291_v38 }
 0x2e2   : > { %v2275_v41 = vpop.permute.xlu1 %2274  ;;  %v2325_v20 = vsel %vm522_vm4, %v2299_v16, %v2324_v59  ;;  %6820 = vmatprep.mubr.f32.mxu1 %v3113_v28  ;;  %v2540_v59 = vsel %vm253_vm1, %v2525_v58, 0 }
 0x2e3   : > { %v2334_v43 = vsel %vm2333_vm12, %v2325_v20, 0.0  ;;  %v2307_v34 = vrot.slane %v2275_v41, %v8413_v10 }
 0x2e4   : > { %2335 = vadd.xlane.f32.xlu1 %v2334_v43 }
 0x2e5   : > { %v2326_v47 = vsel %vm519_vm2, %v2307_v34, %v2303_v8  ;;  %v8784_v34 = vand.u32 4294901760, %v2540_v59 }
 0x2e6   : > { %v2278_v3 = vpop.permute.xlu1 %2277 }
 0x2e7   : > { %v2311_v18 = vrot.slane %v2278_v3, %v8413_v10  ;;  %v2527_v3 = vld [vmem:[%s9179_s3 + $0x18] sm:$0xff] }
 0x2e9   : > { %v2327_v62 = vsel %vm522_vm4, %v2311_v18, %v2326_v47 }
 0x2ea   : > { %v2284_v39 = vpop.permute.xlu1 %2283  ;;  %v2337_v14 = vsel %vm2333_vm12, %v2327_v62, 0.0 }
 0x2eb   : > { %v2319_v15 = vrot.slane %v2284_v39, %v8413_v10  ;;  %2338 = vadd.xlane.f32.xlu0 %v2337_v14 }
 0x2ed   : > { %v2328_v33 = vsel %vm519_vm2, %v2319_v15, %v2315_v40  ;;  %v8796_v40 = vsub.f32 %v2540_v59, %v8784_v34  ;;  %v3038_v15 = vsel %vm253_vm1, %v2527_v3, 0 }
 0x2ee   : > { %v2472_v24 = vpop.permute.xlu1 %2471  ;;  %v2329_v54 = vsel %vm522_vm4, %v2323_v56, %v2328_v33 }
 0x2ef   : > { %v2485_v9 = vrot.slane %v2472_v24, %v8413_v10  ;;  %v2340_v23 = vsel %vm2333_vm12, %v2329_v54, 0.0  ;;  %v8803_v54 = vand.u32 4294901760, %v3038_v15 }
 0x2f0   : > { %2341 = vadd.xlane.f32.xlu1 %v2340_v23  ;;  %v2623_v23 = vand.u32 4294901760, %v8796_v40 }
 0x2f1   : > { %v2498_v32 = vsel %vm519_vm2, %v2489_v19, %v2485_v9 }
 0x2f2   : > { %v2478_v63 = vpop.permute.xlu1 %2477  ;;  %v2503_v53 = vsel %vm2502_vm15, %v2498_v32, 0.0 }
 0x2f3   : > { %v2493_v22 = vrot.slane %v2478_v63, %v8413_v10  ;;  %2504 = vadd.xlane.f32.xlu0 %v2503_v53 }
 0x2f5   : > { %v2499_v6 = vsel %vm519_vm2, %v2497_v26, %v2493_v22  ;;  %v8812_v26 = vsub.f32 %v3038_v15, %v8803_v54 }
 0x2f6   : > { %v2506_v48 = vsel %vm2502_vm15, %v2499_v6, 0.0  ;;  %v2624_v6 = vsub.f32 %v8796_v40, %v2623_v23 }
 0x2f7   : > { %2507 = vadd.xlane.f32.xlu1 %v2506_v48  ;;  %v3121_v55 = vand.u32 4294901760, %v8812_v26 }
 0x2f8   : > { %v2625_v21 = vand.u32 4294901760, %v2624_v6 }
 0x2f9   : > { %v3122_v29 = vsub.f32 %v8812_v26, %v3121_v55 }
 0x307   : > { %v1438_v7 = vpop.xlane.xlu0 %1437 }
 0x308   : > { %v1472_v36 = vrot.slane %v1438_v7, %v8413_v10 }
 0x30b   : > { %v1441_v2 = vpop.xlane.xlu0 %1440 }
 0x30c   : > { %v1476_v38 = vrot.slane %v1441_v2, %v8413_v10 }
 0x324   : > { %v1435_v11 = vpop.xlane.xlu1 %1434 }
 0x325   : > { %v1468_v42 = vrot.slane %v1435_v11, %v8413_v10 }
 0x327   : > { %v1497_v0 = vsel %vm519_vm2, %v1472_v36, %v1468_v42  ;;  %v3123_v42 = vand.u32 4294901760, %v3122_v29 }
 0x328   : > { %v1444_v17 = vpop.xlane.xlu1 %1443  ;;  %v1498_v20 = vsel %vm522_vm4, %v1476_v38, %v1497_v0 }
 0x329   : > { %v1480_v30 = vrot.slane %v1444_v17, %v8413_v10 }
 0x32b   : > { %v1499_v51 = vsel %vm525_vm5, %v1480_v30, %v1498_v20 }
 0x331   : > { %v1447_v25 = vpop.xlane.xlu0 %1446 }
 0x332   : > { %v1484_v61 = vrot.slane %v1447_v25, %v8413_v10 }
 0x334   : > { %v1500_v35 = vsel %vm1367_vm9, %v1484_v61, %v1499_v51  ;;  %v2528_v51 = vld [vmem:[%s9179_s3 + $0x20] sm:$0xff] }
 0x339   : > { %v2043_v49 = vpop.xlane.xlu1 %2042 }
 0x33a   : > { %v2064_v33 = vrot.slane %v2043_v49, %v8413_v10 }
 0x345   : > { %v1450_v52 = vpop.xlane.xlu1 %1449 }
 0x346   : > { %v1488_v41 = vrot.slane %v1450_v52, %v8413_v10 }
 0x348   : > { %v1501_v18 = vsel %vm1369_vm10, %v1488_v41, %v1500_v35 }
 0x34c   : > { %v2046_v57 = vpop.xlane.xlu0 %2045 }
 0x34d   : > { %v2068_v39 = vrot.slane %v2046_v57, %v8413_v10 }
 0x34f   : > { %v2081_v19 = vsel %vm519_vm2, %v2068_v39, %v2064_v33 }
 0x359   : > { %v1453_v12 = vpop.xlane.xlu1 %1452 }
 0x35a   : > { %v1492_v43 = vrot.slane %v1453_v12, %v8413_v10 }
 0x35c   : > { %v2049_v16 = vpop.xlane.xlu0 %2048  ;;  %v1502_v62 = vsel %vm1371_vm13, %v1492_v43, %v1501_v18 }
 0x35d   : > { %v2072_v56 = vrot.slane %v2049_v16, %v8413_v10 }
 0x35f   : > { %v2082_v13 = vsel %vm522_vm4, %v2072_v56, %v2081_v19 }
 0x360   : > { %v2052_v45 = vpop.xlane.xlu0 %2051 }
 0x361   : > { %v2076_v24 = vrot.slane %v2052_v45, %v8413_v10 }
 0x363   : > { %v2083_v63 = vsel %vm525_vm5, %v2076_v24, %v2082_v13  ;;  %vm2362_vm5 = vcmask 18432  }
 0x365   : > { %v1456_v8 = vpop.xlane.xlu1 %1455 }
 0x366   : > { %v1496_v47 = vrot.slane %v1456_v8, %v8413_v10  ;;  %v3533_v8 = vsel %vm253_vm1, %v2528_v51, 0 }
 0x368   : > { %v1503_v14 = vsel %vm1373_vm14, %v1496_v47, %v1502_v62  ;;  %v8869_v47 = vand.u32 4294901760, %v3533_v8  ;;  %v2530_v62 = vld [vmem:[%s9179_s3 + $0x30] sm:$0xff] }
 0x369   : > { %1505 = vst.msk [vmem:[#allocation2] sm:$0xff] %vm253_vm1, %v1503_v14  ;;  %v4031_v39 = vsel %vm253_vm1, %v2530_v62, 0  ;;  %v2531_v14 = vld [vmem:[%s9179_s3 + $0x38] sm:$0xff] }
 0x36a   : > { %v8900_v24 = vand.u32 4294901760, %v4031_v39  ;;  %v4034_v19 = vsel %vm253_vm1, %v2531_v14, 0 }
 0x36c   : > { %v2055_v9 = vpop.xlane.xlu0 %2054 }
 0x36d   : > { %v2080_v32 = vrot.slane %v2055_v9, %v8413_v10 }
 0x36f   : > { %v2084_v53 = vsel %vm1367_vm9, %v2080_v32, %v2083_v63  ;;  %v4106_v32 = vsub.f32 %v4031_v39, %v8900_v24 }
 0x370   : > { %2088 = vst.msk [vmem:[#allocation2 + $0x8] sm:$0x1f] %vm2087_vm3, %v2084_v53  ;;  %v2532_v22 = vld [vmem:[#allocation2] sm:$0xff] }
 0x371   : > { %v2543_v27 = vsel %vm253_vm1, %v2532_v22, 0  ;;  %v2336_v17 = vpop.xlane.xlu1 %2335 }
 0x372   : > { %v8818_v48 = vand.u32 4294901760, %v2543_v27  ;;  %v2349_v57 = vrot.slane %v2336_v17, %v8413_v10 }
 0x374   : > { %6788 = vmatprep.subr.mxu0 %v8818_v48  ;;  %v2633_v44 = vsub.f32 %v2543_v27, %v8818_v48  ;;  %v4107_v27 = vand.u32 4294901760, %v4106_v32 }
 0x375   : > { %6789 = vmatpush3.xpose.msra.mxu0 %v8818_v48 }
 0x376   : > { %v8824_v37 = vand.u32 4294901760, %v2633_v44 }
 0x377   : > { %v2533_v60 = vld [vmem:[#allocation2 + $0x8] sm:$0xff] }
 0x378   : > { %6791 = vmatmul.mubr.f32.vlgmr.msra.gmra.mrb[0].mxu0 %v2625_v21  ;;  %v2339_v28 = vpop.xlane.xlu0 %2338  ;;  %v3041_v11 = vsel %vm253_vm1, %v2533_v60, 0  ;;  %v2635_v7 = vsub.f32 %v2633_v44, %v8824_v37 }
 0x379   : > { %v8831_v2 = vand.u32 4294901760, %v3041_v11  ;;  %6795 = vmatprep.mubr.f32.mxu0 %v8748_v1  ;;  %v2353_v25 = vrot.slane %v2339_v28, %v8413_v10 }
 0x37a   : > { %v2636_v49 = vand.u32 4294901760, %v2635_v7 }
 0x37b   : > { %6818 = vmatprep.subr.mxu1 %v8831_v2  ;;  %v3131_v52 = vsub.f32 %v3041_v11, %v8831_v2  ;;  %v2358_v30 = vsel %vm519_vm2, %v2353_v25, %v2349_v57 }
 0x37c   : > { %6793 = vmatprep.subr.mxu0 %v2636_v49  ;;  %6819 = vmatpush3.xpose.msra.mxu1 %v8831_v2 }
 0x37d   : > { %v2342_v36 = vpop.xlane.xlu1 %2341  ;;  %6794 = vmatpush3.xpose.msra.mxu0 %v2636_v49  ;;  %v8839_v58 = vand.u32 4294901760, %v3131_v52 }
 0x37e   : > { %v2357_v0 = vrot.slane %v2342_v36, %v8413_v10  ;;  %6798 = vmatprep.subr.mxu0 %v2633_v44 }
 0x37f   : > { %6821 = vmatmul.mubr.f32.vlgmr.msra.gmra.mrb[0].mxu1 %v3123_v42  ;;  %v3133_v12 = vsub.f32 %v3131_v52, %v8839_v58 }
 0x380   : > { %v2359_v38 = vsel %vm522_vm4, %v2357_v0, %v2358_v30  ;;  %6796 = vmatmul.mubr.f32.vlgmr.msra.gmra.mrb[0].mxu0 %v8784_v34  ;;  %6825 = vmatprep.mubr.f32.mxu1 %v8761_v5  ;;  %v2505_v16 = vpop.xlane.xlu0 %2504 }
 0x381   : > { %2363 = vst.msk [vmem:[#allocation2 + $0x10] sm:$0x7] %vm2362_vm5, %v2359_v38  ;;  %6799 = vmatpush3.xpose.msra.mxu0 %v2633_v44  ;;  %v3134_v61 = vand.u32 4294901760, %v3133_v12  ;;  %6800 = vmatprep.mubr.f32.mxu0 %v8751_v4  ;;  %v2514_v41 = vrot.slane %v2505_v16, %v8413_v10 }
 0x382   : > { %6803 = vmatprep.subr.mxu0 %v8818_v48 }
 0x383   : > { %6823 = vmatprep.subr.mxu1 %v3134_v61 }
 0x384   : > { %v2508_v59 = vpop.xlane.xlu1 %2507  ;;  %6824 = vmatpush3.xpose.msra.mxu1 %v3134_v61 }
 0x385   : > { %v2518_v20 = vrot.slane %v2508_v59, %v8413_v10  ;;  %6828 = vmatprep.subr.mxu1 %v3131_v52  ;;  %v2529_v10 = vld [vmem:[%s9179_s3 + $0x28] sm:$0xff] }
 0x386   : > { %v3536_v3 = vsel %vm253_vm1, %v2529_v10, 0 }
 0x387   : > { %v2519_v43 = vsel %vm519_vm2, %v2518_v20, %v2514_v41  ;;  %6826 = vmatmul.mubr.f32.vlgmr.msra.gmra.mrb[0].mxu1 %v8803_v54  ;;  %v8875_v45 = vand.u32 4294901760, %v3536_v3  ;;  %vm6514_vm2 = vcmask 130048  }
 0x388   : > { %2523 = vst.msk [vmem:[#allocation2 + $0x18] sm:$0x3] %vm2522_vm6, %v2519_v43  ;;  %6801 = vmatmul.mubr.f32.vlgmr.msra.gmra.mrb[0].mxu0 %v8796_v40  ;;  %6829 = vmatpush3.xpose.msra.mxu1 %v3131_v52  ;;  %v2534_v35 = vld [vmem:[#allocation2 + $0x10] sm:$0xff]  ;;  %v8892_v40 = vsub.f32 %v3533_v8, %v8869_v47 }
 0x389   : > { %6804 = vmatpush3.xpose.msra.mxu0 %v8818_v48  ;;  %6833 = vmatprep.subr.mxu1 %v8831_v2  ;;  %v3539_v18 = vsel %vm253_vm1, %v2534_v35, 0  ;;  %v8896_v15 = vsub.f32 %v3536_v3, %v8875_v45 }
 0x38a   : > { %6808 = vmatprep.subr.mxu0 %v8824_v37  ;;  %6830 = vmatprep.mubr.f32.mxu1 %v8764_v31  ;;  %v8880_v4 = vand.u32 4294901760, %v3539_v18  ;;  %v3609_v9 = vand.u32 4294901760, %v8892_v40 }
 0x38b   : > { %6805 = vmatprep.mubr.f32.mxu0 %v2613_v46  ;;  %v3619_v13 = vand.u32 4294901760, %v8896_v15 }
 0x38c   : > { %v3629_v33 = vsub.f32 %v3539_v18, %v8880_v4  ;;  %v3610_v63 = vsub.f32 %v8892_v40, %v3609_v9 }
 0x38d   : > { %v3620_v6 = vsub.f32 %v8896_v15, %v3619_v13 }
 0x38f   : > { %6831 = vmatmul.mubr.f32.vlgmr.msra.gmra.mrb[0].mxu1 %v8812_v26  ;;  %v2535_v46 = vld [vmem:[#allocation2 + $0x18] sm:$0xff] }
 0x390   : > { %6834 = vmatpush3.xpose.msra.mxu1 %v8831_v2  ;;  %6806 = vmatmul.mubr.f32.vlgmr.msra.gmra.mrb[0].mxu0 %v2623_v23  ;;  %v4037_v56 = vsel %vm253_vm1, %v2535_v46, 0  ;;  %v3630_v23 = vand.u32 4294901760, %v3629_v33 }
 0x391   : > { %6809 = vmatpush3.xpose.msra.mxu0 %v8824_v37  ;;  %6838 = vmatprep.subr.mxu1 %v8839_v58  ;;  %v8906_v31 = vand.u32 4294901760, %v4037_v56  ;;  %v3621_v37 = vand.u32 4294901760, %v3620_v6 }
 0x392   : > { %6813 = vmatprep.subr.mxu0 %v8818_v48  ;;  %6835 = vmatprep.mubr.f32.mxu1 %v3111_v50  ;;  %v8908_v50 = vand.u32 4294901760, %v4034_v19  ;;  %v3631_v22 = vsub.f32 %v3629_v33, %v3630_v23 }
 0x393   : > { %6810 = vmatprep.mubr.f32.mxu0 %v8748_v1  ;;  %v4127_v53 = vsub.f32 %v4037_v56, %v8906_v31 }
 0x394   : > { %v4116_v26 = vsub.f32 %v4034_v19, %v8908_v50  ;;  %v3632_v44 = vand.u32 4294901760, %v3631_v22  ;;  %v4530_v19 = vld [vmem:[%s9180_s4 + $0x10] sm:$0xff] }
 0x396   : > { %v4117_v21 = vand.u32 4294901760, %v4116_v26 }
 0x397   : > { %6836 = vmatmul.mubr.f32.vlgmr.msra.gmra.mrb[0].mxu1 %v3121_v55  ;;  %v3611_v55 = vand.u32 4294901760, %v3610_v63 }
 0x398   : > { %6839 = vmatpush3.xpose.msra.mxu1 %v8839_v58  ;;  %6811 = vmatmul.mubr.f32.vlgmr.msra.gmra.mrb[0].mxu0 %v8784_v34  ;;  %v4118_v29 = vsub.f32 %v4116_v26, %v4117_v21 }
 0x399   : > { %6814 = vmatpush3.xpose.msra.mxu0 %v8818_v48  ;;  %6843 = vmatprep.subr.mxu1 %v8831_v2  ;;  %v4128_v48 = vand.u32 4294901760, %v4127_v53 }
 0x39a   : > { %6848 = vmatprep.subr.mxu0 %v8880_v4  ;;  %6840 = vmatprep.mubr.f32.mxu1 %v8761_v5  ;;  %v4119_v11 = vand.u32 4294901760, %v4118_v29 }
 0x39b   : > { %6815 = vmatprep.mubr.f32.mxu0 %v8748_v1  ;;  %v4108_v1 = vsub.f32 %v4106_v32, %v4107_v27  ;;  %v4129_v60 = vsub.f32 %v4127_v53, %v4128_v48 }
 0x39d   : > { %v4109_v28 = vand.u32 4294901760, %v4108_v1 }
 0x39f   : > { %6841 = vmatmul.mubr.f32.vlgmr.msra.gmra.mrb[0].mxu1 %v8803_v54 }
 0x3a0   : > { %6844 = vmatpush3.xpose.msra.mxu1 %v8831_v2  ;;  %6816 = vmatmul.mubr.f32.vlgmr.msra.gmra.mrb[0].mxu0 %v8784_v34  ;;  %v4130_v34 = vand.u32 4294901760, %v4129_v60 }
 0x3a1   : > { %6849 = vmatpush3.xpose.msra.mxu0 %v8880_v4  ;;  %6878 = vmatprep.subr.mxu1 %v8906_v31 }
 0x3a2   : > { %6853 = vmatprep.subr.mxu0 %v3632_v44  ;;  %6850 = vmatprep.mubr.f32.mxu0 %v3611_v55 }
 0x3a3   : > { %6845 = vmatprep.mubr.f32.mxu1 %v8761_v5  ;;  %v4528_v5 = vld [vmem:[%s9180_s4] sm:$0xff] }
 0x3a4   : > { %6851 = vmatmul.mubr.f32.vlgmr.msra.gmra.mrb[2].mxu0 %v3621_v37  ;;  %v8959_v7 = vand.u32 4294901760, %v4528_v5 }
 0x3a5   : > { %6854 = vmatpush3.xpose.msra.mxu0 %v3632_v44  ;;  %6855 = vmatprep.mubr.f32.mxu0 %v8869_v47 }
 0x3a6   : > { %6858 = vmatprep.subr.mxu0 %v3629_v33  ;;  %v4628_v2 = vsub.f32 %v4528_v5, %v8959_v7 }
 0x3a7   : > { %6846 = vmatmul.mubr.f32.vlgmr.msra.gmra.mrb[0].mxu1 %v8803_v54  ;;  %v4529_v54 = vld [vmem:[%s9180_s4 + $0x8] sm:$0xff] }
 0x3a8   : > { %6879 = vmatpush3.xpose.msra.mxu1 %v8906_v31  ;;  %6880 = vmatprep.mubr.f32.mxu1 %v4109_v28  ;;  %v8961_v17 = vand.u32 4294901760, %v4529_v54  ;;  %v8968_v49 = vand.u32 4294901760, %v4628_v2 }
 0x3a9   : > { %6883 = vmatprep.subr.mxu1 %v4130_v34 }
 0x3aa   : > { %v5123_v25 = vsub.f32 %v4529_v54, %v8961_v17  ;;  %v4630_v42 = vsub.f32 %v4628_v2, %v8968_v49 }
 0x3ab   : > { %6881 = vmatmul.mubr.f32.vlgmr.msra.gmra.mrb[2].mxu1 %v4119_v11 }
 0x3ac   : > { %6884 = vmatpush3.xpose.msra.mxu1 %v4130_v34  ;;  %6856 = vmatmul.mubr.f32.vlgmr.msra.gmra.mrb[2].mxu0 %v8875_v45  ;;  %v8972_v52 = vand.u32 4294901760, %v5123_v25  ;;  %v4631_v57 = vand.u32 4294901760, %v4630_v42 }
 0x3ad   : > { %6859 = vmatpush3.xpose.msra.mxu0 %v3629_v33  ;;  %6888 = vmatprep.subr.mxu1 %v4127_v53 }
 0x3ae   : > { %6863 = vmatprep.subr.mxu0 %v8880_v4  ;;  %6885 = vmatprep.mubr.f32.mxu1 %v8900_v24  ;;  %v5125_v36 = vsub.f32 %v5123_v25, %v8972_v52 }
 0x3af   : > { %6860 = vmatprep.mubr.f32.mxu0 %v8892_v40 }
 0x3b0   : > { %v5126_v58 = vand.u32 4294901760, %v5125_v36 }
 0x3b3   : > { %6886 = vmatmul.mubr.f32.vlgmr.msra.gmra.mrb[2].mxu1 %v8908_v50 }
 0x3b4   : > { %6889 = vmatpush3.xpose.msra.mxu1 %v4127_v53  ;;  %6861 = vmatmul.mubr.f32.vlgmr.msra.gmra.mrb[2].mxu0 %v8896_v15 }
 0x3b5   : > { %6864 = vmatpush3.xpose.msra.mxu0 %v8880_v4  ;;  %6893 = vmatprep.subr.mxu1 %v8906_v31 }
 0x3b6   : > { %6868 = vmatprep.subr.mxu0 %v3630_v23  ;;  %6890 = vmatprep.mubr.f32.mxu1 %v4106_v32 }
 0x3b7   : > { %6865 = vmatprep.mubr.f32.mxu0 %v3609_v9  ;;  %v9002_v9 = vand.u32 4294901760, %v4530_v19 }
 0x3bb   : > { %6891 = vmatmul.mubr.f32.vlgmr.msra.gmra.mrb[2].mxu1 %v4116_v26 }
 0x3bc   : > { %6894 = vmatpush3.xpose.msra.mxu1 %v8906_v31  ;;  %6866 = vmatmul.mubr.f32.vlgmr.msra.gmra.mrb[2].mxu0 %v3619_v13 }
 0x3bd   : > { %6869 = vmatpush3.xpose.msra.mxu0 %v3630_v23  ;;  %6898 = vmatprep.subr.mxu1 %v4128_v48 }
 0x3be   : > { %6873 = vmatprep.subr.mxu0 %v8880_v4  ;;  %6895 = vmatprep.mubr.f32.mxu1 %v4107_v27 }
 0x3bf   : > { %6870 = vmatprep.mubr.f32.mxu0 %v8869_v47 }
 0x3c3   : > { %6896 = vmatmul.mubr.f32.vlgmr.msra.gmra.mrb[2].mxu1 %v4117_v21 }
 0x3c4   : > { %6899 = vmatpush3.xpose.msra.mxu1 %v4128_v48  ;;  %6871 = vmatmul.mubr.f32.vlgmr.msra.gmra.mrb[2].mxu0 %v8875_v45 }
 0x3c5   : > { %6874 = vmatpush3.xpose.msra.mxu0 %v8880_v4  ;;  %6903 = vmatprep.subr.mxu1 %v8906_v31 }
 0x3c6   : > { %6900 = vmatprep.mubr.f32.mxu1 %v8900_v24  ;;  %6875 = vmatprep.mubr.f32.mxu0 %v8869_v47 }
 0x3c7   : > { %6908 = vmatprep.subr.mxu0 %v8959_v7 }
 0x3cb   : > { %6901 = vmatmul.mubr.f32.vlgmr.msra.gmra.mrb[2].mxu1 %v8908_v50 }
 0x3cc   : > { %6904 = vmatpush3.xpose.msra.mxu1 %v8906_v31  ;;  %6876 = vmatmul.mubr.f32.vlgmr.msra.gmra.mrb[2].mxu0 %v8875_v45  ;;  %v4531_v31 = vld [vmem:[%s9180_s4 + $0x18] sm:$0xff] }
 0x3cd   : > { %6905 = vmatprep.mubr.f32.mxu1 %v8900_v24  ;;  %6938 = vmatprep.subr.mxu1 %v8961_v17  ;;  %v9015_v23 = vand.u32 4294901760, %v4531_v31 }
 0x3ce   : > { %6909 = vmatpush3.msra.mxu0 %v8959_v7 }
 0x3cf   : > { %6913 = vmatprep.subr.mxu0 %v4631_v57  ;;  %v6113_v27 = vsub.f32 %v4531_v31, %v9015_v23 }
 0x3d1   : > { %v9041_v60 = vand.u32 4294901760, %v6113_v27 }
 0x3d3   : > { %6906 = vmatmul.mubr.f32.vlgmr.msra.gmra.mrb[2].mxu1 %v8908_v50  ;;  %v9012_v50 = vsub.f32 %v4530_v19, %v9002_v9  ;;  %v6115_v42 = vsub.f32 %v6113_v27, %v9041_v60 }
 0x3d4   : > { %6939 = vmatpush3.msra.mxu1 %v8961_v17 }
 0x3d5   : > { %6943 = vmatprep.subr.mxu1 %v5126_v58  ;;  %v9018_v32 = vand.u32 4294901760, %v9012_v50 }
 0x3d7   : > { %v5620_v48 = vsub.f32 %v9012_v50, %v9018_v32 }
 0x3d9   : > { %v5621_v11 = vand.u32 4294901760, %v5620_v48 }
 0x473   : > { %v6817_v0 = vpop.f32.mrb[0].mxu0 }
 0x474   : > { %v4538_v30 = vsel %vm253_vm1, %v6817_v0, 0  ;;  %v3024_v12 = vpop.f32.mrb[1].mxu0 }
 0x475   : > { %v8976_v38 = vand.u32 4294901760, %v4538_v30  ;;  %v4535_v61 = vsel %vm253_vm1, %v3024_v12, 0 }
 0x476   : > { %v8979_v16 = vand.u32 4294901760, %v4535_v61 }
 0x477   : > { %v4617_v59 = vsub.f32 %v4538_v30, %v8976_v38  ;;  %v6116_v30 = vand.u32 4294901760, %v6115_v42 }
 0x478   : > { %v4607_v41 = vsub.f32 %v4535_v61, %v8979_v16  ;;  %v9250_v61 = vld [vmem:[#allocation11_spill] sm:$0xff] }
 0x479   : > { %v4618_v20 = vand.u32 4294901760, %v4617_v59  ;;  %6629 = vst.msk [vmem:[%s9083_s12 + $0x40] sm:$0xff] %vm6514_vm2, %v9250_v61 }
 0x47a   : > { %v4608_v43 = vand.u32 4294901760, %v4607_v41  ;;  %v6847_v51 = vpop.f32.mrb[0].mxu1 }
 0x47b   : > { %v4619_v10 = vsub.f32 %v4617_v59, %v4618_v20  ;;  %v5033_v35 = vsel %vm253_vm1, %v6847_v51, 0  ;;  %v3522_v8 = vpop.f32.mrb[1].mxu1  ;;  %v9256_v51 = vld [vmem:[#allocation13_spill] sm:$0xff] }
 0x47c   : > { %v8984_v3 = vand.u32 4294901760, %v5033_v35  ;;  %v5030_v18 = vsel %vm253_vm1, %v3522_v8, 0  ;;  %v4609_v47 = vsub.f32 %v4607_v41, %v4608_v43  ;;  %6635 = vst.msk [vmem:[%s9083_s12 + $0x70] sm:$0xff] %vm6514_vm2, %v9256_v51 }
 0x47d   : > { %v8987_v62 = vand.u32 4294901760, %v5030_v18  ;;  %v4620_v46 = vand.u32 4294901760, %v4619_v10  ;;  %v9257_v10 = vld [vmem:[#allocation17_spill] sm:$0xff] }
 0x47e   : > { %v5112_v45 = vsub.f32 %v5033_v35, %v8984_v3  ;;  %v4610_v4 = vand.u32 4294901760, %v4609_v47  ;;  %6636 = vst.msk [vmem:[%s9083_s12 + $0x78] sm:$0xff] %vm6514_vm2, %v9257_v10  ;;  %v4533_v35 = vstv %s4532_s14 }
 0x47f   : > { %v5102_v39 = vsub.f32 %v5030_v18, %v8987_v62 }
 0x480   : > { %v5113_v14 = vand.u32 4294901760, %v5112_v45  ;;  %6910 = vmatprep.mubr.f32.mxu0 %v4610_v4 }
 0x481   : > { %v5103_v40 = vand.u32 4294901760, %v5102_v39  ;;  %6911 = vmatmul.mubr.f32.vlgmr.msra.gmra.mrb[4].mxu0 %v4620_v46 }
 0x482   : > { %v5114_v15 = vsub.f32 %v5112_v45, %v5113_v14  ;;  %6915 = vmatprep.mubr.f32.mxu0 %v8979_v16  ;;  %6914 = vmatpush3.msra.mxu0 %v4631_v57 }
 0x483   : > { %v5104_v56 = vsub.f32 %v5102_v39, %v5103_v40  ;;  %6918 = vmatprep.subr.mxu0 %v4628_v2 }
 0x484   : > { %v5115_v24 = vand.u32 4294901760, %v5114_v15 }
 0x485   : > { %v5105_v33 = vand.u32 4294901760, %v5104_v56 }
 0x487   : > { %6940 = vmatprep.mubr.f32.mxu1 %v5105_v33 }
 0x488   : > { %6941 = vmatmul.mubr.f32.vlgmr.msra.gmra.mrb[4].mxu1 %v5115_v24 }
 0x489   : > { %6916 = vmatmul.mubr.f32.vlgmr.msra.gmra.mrb[4].mxu0 %v8976_v38  ;;  %6945 = vmatprep.mubr.f32.mxu1 %v8987_v62 }
 0x48a   : > { %6920 = vmatprep.mubr.f32.mxu0 %v4607_v41  ;;  %6944 = vmatpush3.msra.mxu1 %v5126_v58  ;;  %v9253_v41 = vld [vmem:[#allocation14_spill] sm:$0xff] }
 0x48b   : > { %6919 = vmatpush3.msra.mxu0 %v4628_v2  ;;  %6948 = vmatprep.subr.mxu1 %v5123_v25  ;;  %6632 = vst.msk [vmem:[%s9083_s12 + $0x58] sm:$0xff] %vm6514_vm2, %v9253_v41 }
 0x48c   : > { %6923 = vmatprep.subr.mxu0 %v8959_v7 }
 0x490   : > { %6946 = vmatmul.mubr.f32.vlgmr.msra.gmra.mrb[4].mxu1 %v8984_v3 }
 0x491   : > { %6921 = vmatmul.mubr.f32.vlgmr.msra.gmra.mrb[4].mxu0 %v4617_v59  ;;  %6950 = vmatprep.mubr.f32.mxu1 %v5102_v39  ;;  %v9252_v59 = vld [vmem:[#allocation10_spill] sm:$0xff] }
 0x492   : > { %6925 = vmatprep.mubr.f32.mxu0 %v4608_v43  ;;  %6949 = vmatpush3.msra.mxu1 %v5123_v25  ;;  %6631 = vst.msk [vmem:[%s9083_s12 + $0x50] sm:$0xff] %vm6514_vm2, %v9252_v59  ;;  %v9255_v43 = vld [vmem:[#allocation16_spill] sm:$0xff] }
 0x493   : > { %6924 = vmatpush3.msra.mxu0 %v8959_v7  ;;  %6953 = vmatprep.subr.mxu1 %v8961_v17  ;;  %6634 = vst.msk [vmem:[%s9083_s12 + $0x68] sm:$0xff] %vm6514_vm2, %v9255_v43 }
 0x494   : > { %6928 = vmatprep.subr.mxu0 %v8968_v49 }
 0x498   : > { %6951 = vmatmul.mubr.f32.vlgmr.msra.gmra.mrb[4].mxu1 %v5112_v45 }
 0x499   : > { %6926 = vmatmul.mubr.f32.vlgmr.msra.gmra.mrb[4].mxu0 %v4618_v20  ;;  %6955 = vmatprep.mubr.f32.mxu1 %v5103_v40  ;;  %v9254_v20 = vld [vmem:[#allocation12_spill] sm:$0xff] }
 0x49a   : > { %6930 = vmatprep.mubr.f32.mxu0 %v8979_v16  ;;  %6954 = vmatpush3.msra.mxu1 %v8961_v17  ;;  %6633 = vst.msk [vmem:[%s9083_s12 + $0x60] sm:$0xff] %vm6514_vm2, %v9254_v20 }
 0x49b   : > { %6929 = vmatpush3.msra.mxu0 %v8968_v49  ;;  %6958 = vmatprep.subr.mxu1 %v8972_v52 }
 0x49c   : > { %6933 = vmatprep.subr.mxu0 %v8959_v7 }
 0x49f   : > { %v6877_v13 = vpop.f32.mrb[2].mxu0 }
 0x4a0   : > { %v5528_v63 = vsel %vm253_vm1, %v6877_v13, 0  ;;  %v4020_v53 = vpop.f32.mrb[3].mxu0  ;;  %6956 = vmatmul.mubr.f32.vlgmr.msra.gmra.mrb[4].mxu1 %v5113_v14 }
 0x4a1   : > { %v9021_v26 = vand.u32 4294901760, %v5528_v63  ;;  %v5525_v22 = vsel %vm253_vm1, %v4020_v53, 0  ;;  %6931 = vmatmul.mubr.f32.vlgmr.msra.gmra.mrb[4].mxu0 %v8976_v38  ;;  %6960 = vmatprep.mubr.f32.mxu1 %v8987_v62 }
 0x4a2   : > { %v9026_v6 = vand.u32 4294901760, %v5525_v22  ;;  %6935 = vmatprep.mubr.f32.mxu0 %v8979_v16  ;;  %6959 = vmatpush3.msra.mxu1 %v8972_v52  ;;  %v9251_v16 = vld [vmem:[#allocation15_spill] sm:$0xff] }
 0x4a3   : > { %v9032_v55 = vsub.f32 %v5528_v63, %v9021_v26  ;;  %6934 = vmatpush3.msra.mxu0 %v8959_v7  ;;  %6963 = vmatprep.subr.mxu1 %v8961_v17  ;;  %6630 = vst.msk [vmem:[%s9083_s12 + $0x48] sm:$0xff] %vm6514_vm2, %v9251_v16 }
 0x4a4   : > { %v5597_v21 = vsub.f32 %v5525_v22, %v9026_v6  ;;  %6968 = vmatprep.subr.mxu0 %v9002_v9 }
 0x4a5   : > { %v5608_v44 = vand.u32 4294901760, %v9032_v55 }
 0x4a6   : > { %v5598_v37 = vand.u32 4294901760, %v5597_v21  ;;  %v6907_v1 = vpop.f32.mrb[2].mxu1 }
 0x4a7   : > { %v5609_v29 = vsub.f32 %v9032_v55, %v5608_v44  ;;  %v6023_v28 = vsel %vm253_vm1, %v6907_v1, 0  ;;  %v4518_v34 = vpop.f32.mrb[3].mxu1 }
 0x4a8   : > { %v9045_v5 = vand.u32 4294901760, %v6023_v28  ;;  %v6020_v54 = vsel %vm253_vm1, %v4518_v34, 0  ;;  %6961 = vmatmul.mubr.f32.vlgmr.msra.gmra.mrb[4].mxu1 %v8984_v3  ;;  %v5599_v7 = vsub.f32 %v5597_v21, %v5598_v37 }
 0x4a9   : > { %v6091_v2 = vand.u32 4294901760, %v6020_v54  ;;  %6936 = vmatmul.mubr.f32.vlgmr.msra.gmra.mrb[4].mxu0 %v8976_v38  ;;  %6965 = vmatprep.mubr.f32.mxu1 %v8987_v62  ;;  %v5610_v52 = vand.u32 4294901760, %v5609_v29 }
 0x4aa   : > { %v6102_v49 = vsub.f32 %v6023_v28, %v9045_v5  ;;  %6969 = vmatpush3.msra.mxu0 %v9002_v9  ;;  %v5600_v25 = vand.u32 4294901760, %v5599_v7  ;;  %6964 = vmatpush3.msra.mxu1 %v8961_v17 }
 0x4ab   : > { %v6092_v57 = vsub.f32 %v6020_v54, %v6091_v2  ;;  %6998 = vmatprep.subr.mxu1 %v9015_v23  ;;  %6973 = vmatprep.subr.mxu0 %v5621_v11 }
 0x4ac   : > { %v6103_v36 = vand.u32 4294901760, %v6102_v49  ;;  %6970 = vmatprep.mubr.f32.mxu0 %v5600_v25 }
 0x4ad   : > { %v6093_v58 = vand.u32 4294901760, %v6092_v57  ;;  %6971 = vmatmul.mubr.f32.vlgmr.msra.gmra.mrb[6].mxu0 %v5610_v52 }
 0x4ae   : > { %v6104_v0 = vsub.f32 %v6102_v49, %v6103_v36  ;;  %6975 = vmatprep.mubr.f32.mxu0 %v9026_v6  ;;  %6974 = vmatpush3.msra.mxu0 %v5621_v11 }
 0x4af   : > { %v6094_v12 = vsub.f32 %v6092_v57, %v6093_v58  ;;  %6978 = vmatprep.subr.mxu0 %v9012_v50 }
 0x4b0   : > { %6966 = vmatmul.mubr.f32.vlgmr.msra.gmra.mrb[4].mxu1 %v8984_v3  ;;  %v6105_v38 = vand.u32 4294901760, %v6104_v0 }
 0x4b1   : > { %6999 = vmatpush3.msra.mxu1 %v9015_v23  ;;  %v6095_v17 = vand.u32 4294901760, %v6094_v12 }
 0x4b2   : > { %7003 = vmatprep.subr.mxu1 %v6116_v30 }
 0x4b3   : > { %7000 = vmatprep.mubr.f32.mxu1 %v6095_v17 }
 0x4b4   : > { %7001 = vmatmul.mubr.f32.vlgmr.msra.gmra.mrb[6].mxu1 %v6105_v38 }
 0x4b5   : > { %6976 = vmatmul.mubr.f32.vlgmr.msra.gmra.mrb[6].mxu0 %v9021_v26  ;;  %7005 = vmatprep.mubr.f32.mxu1 %v6091_v2 }
 0x4b6   : > { %6980 = vmatprep.mubr.f32.mxu0 %v5597_v21  ;;  %7004 = vmatpush3.msra.mxu1 %v6116_v30 }
 0x4b7   : > { %6979 = vmatpush3.msra.mxu0 %v9012_v50  ;;  %7008 = vmatprep.subr.mxu1 %v6113_v27 }
 0x4b8   : > { %6983 = vmatprep.subr.mxu0 %v9002_v9 }
 0x4bc   : > { %7006 = vmatmul.mubr.f32.vlgmr.msra.gmra.mrb[6].mxu1 %v9045_v5 }
 0x4bd   : > { %6981 = vmatmul.mubr.f32.vlgmr.msra.gmra.mrb[6].mxu0 %v9032_v55  ;;  %7010 = vmatprep.mubr.f32.mxu1 %v6092_v57 }
 0x4be   : > { %6985 = vmatprep.mubr.f32.mxu0 %v5598_v37  ;;  %7009 = vmatpush3.msra.mxu1 %v6113_v27 }
 0x4bf   : > { %6984 = vmatpush3.msra.mxu0 %v9002_v9  ;;  %7013 = vmatprep.subr.mxu1 %v9015_v23 }
 0x4c0   : > { %6988 = vmatprep.subr.mxu0 %v9018_v32 }
 0x4c4   : > { %7011 = vmatmul.mubr.f32.vlgmr.msra.gmra.mrb[6].mxu1 %v6102_v49 }
 0x4c5   : > { %6986 = vmatmul.mubr.f32.vlgmr.msra.gmra.mrb[6].mxu0 %v5608_v44  ;;  %7015 = vmatprep.mubr.f32.mxu1 %v6093_v58 }
 0x4c6   : > { %6990 = vmatprep.mubr.f32.mxu0 %v9026_v6  ;;  %7014 = vmatpush3.msra.mxu1 %v9015_v23 }
 0x4c7   : > { %6989 = vmatpush3.msra.mxu0 %v9018_v32  ;;  %7018 = vmatprep.subr.mxu1 %v9041_v60 }
 0x4c8   : > { %6993 = vmatprep.subr.mxu0 %v9002_v9 }
 0x4cc   : > { %7016 = vmatmul.mubr.f32.vlgmr.msra.gmra.mrb[6].mxu1 %v6103_v36 }
 0x4cd   : > { %6991 = vmatmul.mubr.f32.vlgmr.msra.gmra.mrb[6].mxu0 %v9021_v26  ;;  %7020 = vmatprep.mubr.f32.mxu1 %v6091_v2 }
 0x4ce   : > { %6995 = vmatprep.mubr.f32.mxu0 %v9026_v6  ;;  %7019 = vmatpush3.msra.mxu1 %v9041_v60 }
 0x4cf   : > { %6994 = vmatpush3.msra.mxu0 %v9002_v9  ;;  %7023 = vmatprep.subr.mxu1 %v9015_v23 }
 0x4d4   : > { %7021 = vmatmul.mubr.f32.vlgmr.msra.gmra.mrb[6].mxu1 %v9045_v5 }
 0x4d5   : > { %6996 = vmatmul.mubr.f32.vlgmr.msra.gmra.mrb[6].mxu0 %v9021_v26  ;;  %7025 = vmatprep.mubr.f32.mxu1 %v6091_v2 }
 0x4d6   : > { %7024 = vmatpush3.msra.mxu1 %v9015_v23 }
 0x4dc   : > { %7026 = vmatmul.mubr.f32.vlgmr.msra.gmra.mrb[6].mxu1 %v9045_v5 }
 0x57c   : > { %v6937_v8 = vpop.f32.mrb[4].mxu0 }
 0x57d   : > { %v7028_v3 = vadd.f32 %v6937_v8, %v4533_v35  ;;  %v5019_v18 = vpop.f32.mrb[5].mxu0 }
 0x57e   : > { %v7029_v47 = vadd.f32 %v5019_v18, %v4533_v35 }
 0x57f   : > { %6516 = vst.msk [vmem:[%s9083_s12 + $0x8] sm:$0xff] %vm6514_vm2, %v7028_v3 }
 0x580   : > { %6515 = vst.msk [vmem:[%s9083_s12] sm:$0xff] %vm6514_vm2, %v7029_v47 }
 0x583   : > { %v6967_v62 = vpop.f32.mrb[4].mxu1 }
 0x584   : > { %v7030_v45 = vadd.f32 %v6967_v62, %v4533_v35  ;;  %v5514_v4 = vpop.f32.mrb[5].mxu1 }
 0x585   : > { %v7031_v46 = vadd.f32 %v5514_v4, %v4533_v35 }
 0x586   : > { %6518 = vst.msk [vmem:[%s9083_s12 + $0x18] sm:$0xff] %vm6514_vm2, %v7030_v45 }
 0x587   : > { %6517 = vst.msk [vmem:[%s9083_s12 + $0x10] sm:$0xff] %vm6514_vm2, %v7031_v46 }
 0x5a8   : > { %v6997_v39 = vpop.f32.mrb[6].mxu0 }
 0x5a9   : > { %v7032_v14 = vadd.f32 %v6997_v39, %v4533_v35  ;;  %v6009_v40 = vpop.f32.mrb[7].mxu0 }
 0x5aa   : > { %v7033_v15 = vadd.f32 %v6009_v40, %v4533_v35 }
 0x5ab   : > { %6520 = vst.msk [vmem:[%s9083_s12 + $0x28] sm:$0xff] %vm6514_vm2, %v7032_v14 }
 0x5ac   : > { %6519 = vst.msk [vmem:[%s9083_s12 + $0x20] sm:$0xff] %vm6514_vm2, %v7033_v15 }
 0x5af   : > { %v7027_v56 = vpop.f32.mrb[6].mxu1 }
 0x5b0   : > { %v7034_v33 = vadd.f32 %v7027_v56, %v4533_v35  ;;  %v6504_v24 = vpop.f32.mrb[7].mxu1 }
 0x5b1   : > { %v7035_v19 = vadd.f32 %v6504_v24, %v4533_v35 }
 0x5b2   : > { %6522 = vst.msk [vmem:[%s9083_s12 + $0x38] sm:$0xff] %vm6514_vm2, %v7034_v33 }
 0x5b3   : > { %6521 = vst.msk [vmem:[%s9083_s12 + $0x30] sm:$0xff] %vm6514_vm2, %v7035_v19 }
 0x5b4   : > { %7221 = shalt.err (!%p7218_p2)
}
 0x5b5   : > { %s7222_s29 = scalar_lea.hbm %s9126_s13, 2048  ;;  %s7226_s10 = scalar_lea.hbm %s9181_s5, 4096 }
 0x5b6   : > { %p7223_p4 = scmp.ne.s32.totalorder %s9126_s13, %s7222_s29  ;;  %p7227_p9 = scmp.lt.u32.totalorder %s9126_s13, %s9181_s5 }
 0x5b7   : > { %p7228_p1 = scmp.lt.u32.totalorder %s7226_s10, %s7222_s29  ;;  %p7230_p6 = scmp.lt.u32.totalorder %s7222_s29, %s9126_s13 }
 0x5b8   : > { %p7224_p5 = pnand %p7223_p4, %p9258_p11 }
 0x5b9   : > { %p7229_p3 = por %p7228_p1, %p7227_p9 }
 0x5ba   : > { %p7225_p7 = pneg %p7224_p5 }
 0x5bb   : > { %p7231_p12 = por %p7230_p6, %p7229_p3 }
 0x5bd   : > { %p7232_p13 = pnand %p7231_p12, %p7225_p7 }
 0x5bf   : > { %7235 = shalt.err (!%p7232_p13)
}
 0x5c0   : > { %s7282_s14 = smov 128   ;;  %s7283_s19 = smov 8  }
 0x5c1   : > { %7118 = dma.vmem_to_hbm [thread:$0]  (%p9258_p11), %s9128_s24, 2048, %s9126_s13, %s6533_s2, %s7282_s14, %s7282_s14, %s7283_s19  }
 0x5c2 PF: > { %s6561_s26 = sand.u32 1, %s7262_s20   ;;  %p9259_p8 = scmp.ne.s32.totalorder %s9194_s7, 0 }
 0x5c3   : > { %p9260_p10 = scmp.ge.s32.totalorder %s7274_s23, 2  ;;  %s6562_s30 = scalar_lea.sflag [#allocation6], %s6561_s26 }
 0x5c5   : > { %p7125_p0 = pnand %p9260_p10, %p9259_p8 }
 0x5c7   : > { %7257 = dma.done.wait (!%p7125_p0), %s6562_s30, 2048  }
 0x5c8   : > { %7259 = vsyncadd (!%p7125_p0), %s6562_s30, 4294965248  ;;  %p19_p2 = scmp.ge.s32.totalorder %s7342_s25, 4   ;;  %s9261_s20 = smov %s7266_s21 }
 0x5c9   : > { %s9262_s21 = smov %s7270_s22  ;;  %s9263_s22 = smov %s7354_s28 }
 0x5ca   : > { %s9264_s23 = smov %s7342_s25  ;;  %21 = sbr.rel (!%p19_p2) target bundleno = 7 (0x7), region = 89 }
 0x5d1   :  { %6567 = vsyncpa [#allocation5], 1 }
 0x5d2   :  { %6569 = vsyncpa [#allocation5 + $0x1], 1 }
 0x5d3   :  { %6570 = vsyncpa [#allocation6], 1 }
 0x5d4   :  { %6572 = vsyncpa [#allocation6 + $0x1], 1 }

</bundles_post_ra>
